<compile_context>
chip_gen: v7x
topology: tpu7x:2x2x1
jax: 0.10.0
libtpu: 0.0.40
codegen_flags: <defaults>
</compile_context>

<pallas_src>
import functools
import math

import jax
import jax.numpy as jnp
from jax.experimental import pallas as pl
from jax.experimental.pallas import tpu as pltpu

EPS = 1e-6
VMEM_LIMIT = 48 * 1024 * 1024   # <= v7x 64 MiB physical; above v5e's 16 MiB default scoped limit


# ----------------------------- in-kernel helpers -----------------------------

def _ln(x, a, b):
    """Annotated-transformer LayerNorm: unbiased std (ddof=1), eps added to std.  Exact f32."""
    d = x.shape[-1]
    mean = jnp.mean(x, axis=-1, keepdims=True)
    xc = x - mean
    var = jnp.sum(xc * xc, axis=-1, keepdims=True) * (1.0 / (d - 1))
    return a * xc / (jnp.sqrt(var) + EPS) + b


def _softmax_rows(s):
    """Row softmax, exact f32 normalization (mask bias already added to s)."""
    s = s - jnp.max(s, axis=-1, keepdims=True)
    p = jnp.exp(s)
    return p / jnp.sum(p, axis=-1, keepdims=True)


def _bf16_dot(a, b):
    """MXU matmul with bf16 operands, f32 accumulation."""
    return jnp.dot(a.astype(jnp.bfloat16), b.astype(jnp.bfloat16),
                   preferred_element_type=jnp.float32)


def _bf16_dot_t(a, b):
    """a @ b.T with bf16 operands, f32 accumulation (contraction on the last dims)."""
    return jax.lax.dot_general(a.astype(jnp.bfloat16), b.astype(jnp.bfloat16),
                               (((1,), (1,)), ((), ())),
                               preferred_element_type=jnp.float32)


def _multihead(q_all, k_all, v_all, mask_bias, H):
    """Per-head attention over lane-sliced heads; returns (Tq, D) concat -> single W_o matmul.

    Scale 1/sqrt(dk) is pre-folded into the query projection; mask_bias (0 / -1e9) is computed
    once by the caller (hoisted out of this loop).
    TODO(synk): for large H/dk, lane-align head slices (pad dk to 128) or put heads on a grid
    axis / fori_loop so live ranges stay bounded; static unroll is fine for small H.
    """
    D = q_all.shape[-1]
    dk = D // H
    heads = []
    for h in range(H):
        q = q_all[:, h * dk:(h + 1) * dk]
        k = k_all[:, h * dk:(h + 1) * dk]
        v = v_all[:, h * dk:(h + 1) * dk]
        s = _bf16_dot_t(q, k) + mask_bias          # (Tq, Tk)
        p = _softmax_rows(s)
        heads.append(_bf16_dot(p, v))              # (Tq, dk)
    return jnp.concatenate(heads, axis=-1)         # (Tq, D)


# ----------------------------- Pallas kernels -----------------------------

def _attn_pair_kernel(x_ref, mem_ref, tmask_ref, smask_ref,
                      ln0a_ref, ln0b_ref, wqkv_ref, bqkv_ref, wo_s_ref, bo_s_ref,
                      ln1a_ref, ln1b_ref, wq_ref, bq_ref, wkv_ref, bkv_ref,
                      wo_c_ref, bo_c_ref, o_ref, *, H):
    """Both attention sublayers of one decoder layer, fused, for one batch element:
         x = x + W_o . MHA(LN0(x), LN0(x), LN0(x), tgt_mask)
         x = x + W_o . MHA(LN1(x), memory,  memory,  src_mask)
       LN / softmax / residual math stays f32; matmul operands are bf16 (f32 accumulate)."""
    x = x_ref[0]           # (T, D) f32
    mem = mem_ref[0]       # (S, D) f32
    D = x.shape[-1]

    # additive masks, computed once per grid step (hoisted out of the head loops)
    tgt_bias = jnp.where(tmask_ref[0] == 0.0, -1e9, 0.0)    # (T, T)
    src_bias = jnp.where(smask_ref[0] == 0.0, -1e9, 0.0)    # (1, S) -> broadcast over rows

    # ---- self-attention sublayer ----
    xn = _ln(x, ln0a_ref[...], ln0b_ref[...])
    qkv = _bf16_dot(xn, wqkv_ref[...]) + bqkv_ref[...]       # fused QKV, lane-dense over 3D
    heads = _multihead(qkv[:, :D], qkv[:, D:2 * D], qkv[:, 2 * D:], tgt_bias, H)
    x = x + _bf16_dot(heads, wo_s_ref[...]) + bo_s_ref[...]  # single fused out-proj + residual

    # ---- cross-attention sublayer (memory is NOT layer-normed) ----
    xn = _ln(x, ln1a_ref[...], ln1b_ref[...])
    q_all = _bf16_dot(xn, wq_ref[...]) + bq_ref[...]
    kv = _bf16_dot(mem, wkv_ref[...]) + bkv_ref[...]          # fused K/V projection of memory
    heads = _multihead(q_all, kv[:, :D], kv[:, D:], src_bias, H)
    o_ref[0] = x + _bf16_dot(heads, wo_c_ref[...]) + bo_c_ref[...]


def _ffn_block_kernel(x_ref, lna_ref, lnb_ref, w1_ref, b1_ref, w2_ref, b2_ref, o_ref):
    """x = x + W2 . relu(W1 . LN2(x)) — LN + FFN + residual, row-tiled."""
    x = x_ref[...]                                  # (TM, D) f32
    xn = _ln(x, lna_ref[...], lnb_ref[...])
    h = jnp.maximum(_bf16_dot(xn, w1_ref[...]) + b1_ref[...], 0.0)
    # TODO(synk): for large D/F (v7x 64 MiB VMEM), K-tile w1/w2 over F with a pl.when-initialized
    # f32 accumulator instead of keeping both weights fully resident.
    o_ref[...] = x + _bf16_dot(h, w2_ref[...]) + b2_ref[...]


def _layernorm_kernel(x_ref, a_ref, b_ref, o_ref):
    o_ref[...] = _ln(x_ref[...], a_ref[...], b_ref[...])


# ----------------------------- kernel wrappers -----------------------------

def _row_tile(m, target=512):
    """Largest row tile (mult of 8, <= target) dividing m; falls back to the full extent."""
    if m <= target:
        return m
    for t in (target, 256, 128, 64, 32, 16, 8):
        if m % t == 0:
            return t
    return m


def attn_pair_block(x, memory, src_mask, tgt_mask, p, H):
    B, T, D = x.shape
    S = memory.shape[1]
    kern = functools.partial(_attn_pair_kernel, H=H)
    full = lambda shape: pl.BlockSpec(shape, lambda b, _n=len(shape): (0,) * _n)
    return pl.pallas_call(
        kern,
        out_shape=jax.ShapeDtypeStruct((B, T, D), jnp.float32),
        grid=(B,),
        in_specs=[
            pl.BlockSpec((1, T, D), lambda b: (b, 0, 0)),        # x
            pl.BlockSpec((1, S, D), lambda b: (b, 0, 0)),        # memory
            pl.BlockSpec((1, T, T), lambda b: (b, 0, 0)),        # tgt_mask
            pl.BlockSpec((1, 1, S), lambda b: (b, 0, 0)),        # src_mask
            full((1, D)), full((1, D)),                          # ln0 a / b
            full((D, 3 * D)), full((1, 3 * D)),                  # wqkv (bf16) / bqkv
            full((D, D)), full((1, D)),                          # wo_self (bf16) / bo_self
            full((1, D)), full((1, D)),                          # ln1 a / b
            full((D, D)), full((1, D)),                          # wq_cross (bf16) / bq_cross
            full((D, 2 * D)), full((1, 2 * D)),                  # wkv_cross (bf16) / bkv_cross
            full((D, D)), full((1, D)),                          # wo_cross (bf16) / bo_cross
        ],
        out_specs=pl.BlockSpec((1, T, D), lambda b: (b, 0, 0)),
        input_output_aliases={0: 0},                             # residual update in place
        compiler_params=pltpu.CompilerParams(
            dimension_semantics=("parallel",), vmem_limit_bytes=VMEM_LIMIT),
    )(x, memory, tgt_mask, src_mask,
      p["ln0_a"], p["ln0_b"], p["wqkv"], p["bqkv"], p["wo_s"], p["bo_s"],
      p["ln1_a"], p["ln1_b"], p["wq"], p["bq"], p["wkv"], p["bkv"], p["wo_c"], p["bo_c"])


def ffn_block(x, p):
    B, T, D = x.shape
    F = p["w1"].shape[1]
    M = B * T
    TM = _row_tile(M)
    out = pl.pallas_call(
        _ffn_block_kernel,
        out_shape=jax.ShapeDtypeStruct((M, D), jnp.float32),
        grid=(M // TM,),
        in_specs=[
            pl.BlockSpec((TM, D), lambda i: (i, 0)),
            pl.BlockSpec((1, D), lambda i: (0, 0)),
            pl.BlockSpec((1, D), lambda i: (0, 0)),
            pl.BlockSpec((D, F), lambda i: (0, 0)),
            pl.BlockSpec((1, F), lambda i: (0, 0)),
            pl.BlockSpec((F, D), lambda i: (0, 0)),
            pl.BlockSpec((1, D), lambda i: (0, 0)),
        ],
        out_specs=pl.BlockSpec((TM, D), lambda i: (i, 0)),
        input_output_aliases={0: 0},
        compiler_params=pltpu.CompilerParams(
            dimension_semantics=("parallel",), vmem_limit_bytes=VMEM_LIMIT),
    )(x.reshape(M, D), p["ln_a"], p["ln_b"], p["w1"], p["b1"], p["w2"], p["b2"])
    return out.reshape(B, T, D)


def layernorm(x2d, a, b):
    M, D = x2d.shape
    TM = _row_tile(M)
    return pl.pallas_call(
        _layernorm_kernel,
        out_shape=jax.ShapeDtypeStruct((M, D), jnp.float32),
        grid=(M // TM,),
        in_specs=[pl.BlockSpec((TM, D), lambda i: (i, 0)),
                  pl.BlockSpec((1, D), lambda i: (0, 0)),
                  pl.BlockSpec((1, D), lambda i: (0, 0))],
        out_specs=pl.BlockSpec((TM, D), lambda i: (i, 0)),
        compiler_params=pltpu.CompilerParams(
            dimension_semantics=("parallel",), vmem_limit_bytes=VMEM_LIMIT),
    )(x2d, a, b)


# --------------------------- parameter prep (one-time, OUTSIDE the forward) ---------------------

def prepare_params(params, H):
    """Fuse Q/K/V (and K/V) weights, fold the 1/sqrt(dk) attention scale into the query
    projection, reshape biases/LN params to kernel layout and cast matmul weights to bf16
    (accumulation stays f32 in-kernel).  Done once at load time, not per forward pass."""
    bf16 = lambda w: w.astype(jnp.bfloat16)
    out_layers = []
    for p in params["layers"]:
        D = p["ln0_a"].shape[0]
        scale = 1.0 / math.sqrt(D // H)
        sa, ca = p["self_attn"], p["src_attn"]
        out_layers.append(dict(
            attn=dict(
                ln0_a=p["ln0_a"].reshape(1, D), ln0_b=p["ln0_b"].reshape(1, D),
                wqkv=bf16(jnp.concatenate([sa["wq"] * scale, sa["wk"], sa["wv"]], axis=1)),
                bqkv=jnp.concatenate([sa["bq"] * scale, sa["bk"], sa["bv"]]).reshape(1, 3 * D),
                wo_s=bf16(sa["wo"]), bo_s=sa["bo"].reshape(1, D),
                ln1_a=p["ln1_a"].reshape(1, D), ln1_b=p["ln1_b"].reshape(1, D),
                wq=bf16(ca["wq"] * scale), bq=(ca["bq"] * scale).reshape(1, D),
                wkv=bf16(jnp.concatenate([ca["wk"], ca["wv"]], axis=1)),
                bkv=jnp.concatenate([ca["bk"], ca["bv"]]).reshape(1, 2 * D),
                wo_c=bf16(ca["wo"]), bo_c=ca["bo"].reshape(1, D)),
            ffn=dict(
                ln_a=p["ln2_a"].reshape(1, D), ln_b=p["ln2_b"].reshape(1, D),
                w1=bf16(p["w1"]), b1=p["b1"].reshape(1, -1),
                w2=bf16(p["w2"]), b2=p["b2"].reshape(1, D)),
        ))
    D = params["norm_a"].shape[0]
    return dict(layers=out_layers,
                norm_a=params["norm_a"].reshape(1, D),
                norm_b=params["norm_b"].reshape(1, D))


def decoder_forward(prepped, x, memory, src_mask, tgt_mask, H):
    for lp in prepped["layers"]:
        x = attn_pair_block(x, memory, src_mask, tgt_mask, lp["attn"], H)
        x = ffn_block(x, lp["ffn"])
    B, T, D = x.shape
    return layernorm(x.reshape(B * T, D), prepped["norm_a"], prepped["norm_b"]).reshape(B, T, D)


# ------------------------- pure-JAX reference ------------------------------

def ref_layernorm(x, a, b):
    mean = jnp.mean(x, axis=-1, keepdims=True)
    std = jnp.std(x, axis=-1, keepdims=True, ddof=1)
    return a * (x - mean) / (std + EPS) + b


def ref_mha(p, q_in, k_in, v_in, mask, H):
    B, Tq, D = q_in.shape
    Tk = k_in.shape[1]
    dk = D // H
    q = (q_in @ p["wq"] + p["bq"]).reshape(B, Tq, H, dk).transpose(0, 2, 1, 3)
    k = (k_in @ p["wk"] + p["bk"]).reshape(B, Tk, H, dk).transpose(0, 2, 1, 3)
    v = (v_in @ p["wv"] + p["bv"]).reshape(B, Tk, H, dk).transpose(0, 2, 1, 3)
    s = jnp.einsum("bhqd,bhkd->bhqk", q, k) / math.sqrt(dk)
    s = jnp.where(mask[:, None] == 0, -1e9, s)
    s = s - jnp.max(s, axis=-1, keepdims=True)
    prob = jnp.exp(s)
    prob = prob / jnp.sum(prob, axis=-1, keepdims=True)
    o = jnp.einsum("bhqk,bhkd->bhqd", prob, v).transpose(0, 2, 1, 3).reshape(B, Tq, D)
    return o @ p["wo"] + p["bo"]


def ref_decoder(params, x, memory, src_mask, tgt_mask, H):
    for p in params["layers"]:
        xn = ref_layernorm(x, p["ln0_a"], p["ln0_b"])
        x = x + ref_mha(p["self_attn"], xn, xn, xn, tgt_mask, H)
        xn = ref_layernorm(x, p["ln1_a"], p["ln1_b"])
        x = x + ref_mha(p["src_attn"], xn, memory, memory, src_mask, H)
        xn = ref_layernorm(x, p["ln2_a"], p["ln2_b"])
        x = x + (jnp.maximum(xn @ p["w1"] + p["b1"], 0.0) @ p["w2"] + p["b2"])
    return ref_layernorm(x, params["norm_a"], params["norm_b"])


# ------------------------------ param init ---------------------------------

def _init_lin(key, din, dout):
    kw, kb = jax.random.split(key)
    return (jax.random.normal(kw, (din, dout), jnp.float32) * 0.05,
            jax.random.normal(kb, (dout,), jnp.float32) * 0.01)


def _init_attn(key, D):
    ks = jax.random.split(key, 4)
    (wq, bq), (wk, bk), (wv, bv), (wo, bo) = [_init_lin(k, D, D) for k in ks]
    return dict(wq=wq, bq=bq, wk=wk, bk=bk, wv=wv, bv=bv, wo=wo, bo=bo)


def init_params(key, N, D, F):
    layers = []
    keys = jax.random.split(key, N + 1)
    for lk in keys[:N]:
        k1, k2, k3, k4 = jax.random.split(lk, 4)
        w1, b1 = _init_lin(k3, D, F)
        w2, b2 = _init_lin(k4, F, D)
        layers.append(dict(
            self_attn=_init_attn(k1, D),
            src_attn=_init_attn(k2, D),
            w1=w1, b1=b1, w2=w2, b2=b2,
            ln0_a=jnp.ones((D,), jnp.float32), ln0_b=jnp.zeros((D,), jnp.float32),
            ln1_a=jnp.ones((D,), jnp.float32), ln1_b=jnp.zeros((D,), jnp.float32),
            ln2_a=jnp.ones((D,), jnp.float32), ln2_b=jnp.zeros((D,), jnp.float32),
        ))
    return dict(layers=layers,
                norm_a=jnp.ones((D,), jnp.float32),
                norm_b=jnp.zeros((D,), jnp.float32))


# --------------------------------- main -------------------------------------

if __name__ == "__main__":
    B, T, S, D, H, F, N = 2, 8, 8, 32, 4, 64, 2
    assert D % H == 0

    key = jax.random.PRNGKey(0)
    kx, km, kp = jax.random.split(key, 3)
    x = jax.random.normal(kx, (B, T, D), jnp.float32)
    memory = jax.random.normal(km, (B, S, D), jnp.float32)
    tgt_mask = jnp.broadcast_to(jnp.tril(jnp.ones((T, T), jnp.float32))[None], (B, T, T))
    src_mask = jnp.ones((B, 1, S), jnp.float32).at[1, 0, S - 2:].set(0.0)  # pad last 2 src tokens of batch 1

    params = init_params(kp, N, D, F)
    prepped = prepare_params(params, H)        # weight fusion / scale folding / bf16 cast, once

    fwd = jax.jit(functools.partial(decoder_forward, H=H))
    out = jax.block_until_ready(fwd(prepped, x, memory, src_mask, tgt_mask))

    ref = ref_decoder(params, x, memory, src_mask, tgt_mask, H)
    assert out.shape == (B, T, D)
    # Kernel matmuls use bf16 operands (f32 accumulation) on the MXU, so the expected deviation
    # vs the pure-f32 reference is ~2^-9 per-operand rounding propagated through 2 layers;
    # LN / softmax / residual math is exact f32.
    assert jnp.allclose(out, ref, atol=3e-2, rtol=3e-2), "mismatch vs pure-JAX reference"

    print("KERNEL_OK")
</pallas_src>

<mosaic_0001>
module attributes {stable_mosaic.version = 11 : i64} {
  func.func @_ffn_block_kernel(%arg0: i32, %arg1: memref<16x32xf32, #tpu.memory_space<vmem>>, %arg2: memref<1x32xf32, #tpu.memory_space<vmem>>, %arg3: memref<1x32xf32, #tpu.memory_space<vmem>>, %arg4: memref<32x64xbf16, #tpu.memory_space<vmem>>, %arg5: memref<1x64xf32, #tpu.memory_space<vmem>>, %arg6: memref<64x32xbf16, #tpu.memory_space<vmem>>, %arg7: memref<1x32xf32, #tpu.memory_space<vmem>>, %arg8: memref<16x32xf32, #tpu.memory_space<vmem>>) attributes {dimension_semantics = [#tpu.dimension_semantics<parallel>], iteration_bounds = array<i64: 1>, scalar_prefetch = 0 : i64, scratch_operands = 0 : i64, tpu.core_type = #tpu.core_type<tc>, window_params = [{transform_indices = @transform_0, window_bounds = array<i64: 16, 32>}, {pipeline_mode = #tpu.pipeline_mode<synchronous>, transform_indices = @transform_1, window_bounds = array<i64: 1, 32>}, {pipeline_mode = #tpu.pipeline_mode<synchronous>, transform_indices = @transform_2, window_bounds = array<i64: 1, 32>}, {pipeline_mode = #tpu.pipeline_mode<synchronous>, transform_indices = @transform_3, window_bounds = array<i64: 32, 64>}, {pipeline_mode = #tpu.pipeline_mode<synchronous>, transform_indices = @transform_4, window_bounds = array<i64: 1, 64>}, {pipeline_mode = #tpu.pipeline_mode<synchronous>, transform_indices = @transform_5, window_bounds = array<i64: 64, 32>}, {pipeline_mode = #tpu.pipeline_mode<synchronous>, transform_indices = @transform_6, window_bounds = array<i64: 1, 32>}, {transform_indices = @transform_7, window_bounds = array<i64: 16, 32>}]} {
    %c0 = arith.constant 0 : index
    %c0_0 = arith.constant 0 : index
    %0 = vector.load %arg1[%c0, %c0_0] : memref<16x32xf32, #tpu.memory_space<vmem>>, vector<16x32xf32>
    %c0_1 = arith.constant 0 : index
    %c0_2 = arith.constant 0 : index
    %1 = vector.load %arg2[%c0_1, %c0_2] : memref<1x32xf32, #tpu.memory_space<vmem>>, vector<1x32xf32>
    %c0_3 = arith.constant 0 : index
    %c0_4 = arith.constant 0 : index
    %2 = vector.load %arg3[%c0_3, %c0_4] : memref<1x32xf32, #tpu.memory_space<vmem>>, vector<1x32xf32>
    %cst = arith.constant dense<0.000000e+00> : vector<16xf32>
    %3 = vector.multi_reduction <add>, %0, %cst [1] : vector<16x32xf32> to vector<16xf32>
    %4 = vector.shape_cast %3 : vector<16xf32> to vector<16x1xf32>
    %cst_5 = arith.constant 3.200000e+01 : f32
    %5 = vector.broadcast %cst_5 : f32 to vector<16x1xf32>
    %6 = arith.divf %4, %5 : vector<16x1xf32>
    %7 = vector.broadcast %6 : vector<16x1xf32> to vector<16x32xf32>
    %8 = arith.subf %0, %7 : vector<16x32xf32>
    %9 = arith.mulf %8, %8 : vector<16x32xf32>
    %cst_6 = arith.constant dense<0.000000e+00> : vector<16xf32>
    %10 = vector.multi_reduction <add>, %9, %cst_6 [1] : vector<16x32xf32> to vector<16xf32>
    %11 = vector.shape_cast %10 : vector<16xf32> to vector<16x1xf32>
    %cst_7 = arith.constant 0.0322580636 : f32
    %12 = vector.broadcast %cst_7 : f32 to vector<16x1xf32>
    %13 = arith.mulf %11, %12 : vector<16x1xf32>
    %14 = vector.broadcast %1 : vector<1x32xf32> to vector<16x32xf32>
    %15 = arith.mulf %14, %8 : vector<16x32xf32>
    %16 = math.sqrt %13 : vector<16x1xf32>
    %cst_8 = arith.constant 9.99999997E-7 : f32
    %17 = vector.broadcast %cst_8 : f32 to vector<16x1xf32>
    %18 = arith.addf %16, %17 : vector<16x1xf32>
    %19 = vector.broadcast %18 : vector<16x1xf32> to vector<16x32xf32>
    %20 = arith.divf %15, %19 : vector<16x32xf32>
    %21 = vector.broadcast %2 : vector<1x32xf32> to vector<16x32xf32>
    %22 = arith.addf %20, %21 : vector<16x32xf32>
    %c0_9 = arith.constant 0 : index
    %c0_10 = arith.constant 0 : index
    %23 = vector.load %arg4[%c0_9, %c0_10] : memref<32x64xbf16, #tpu.memory_space<vmem>>, vector<32x64xbf16>
    %24 = arith.truncf %22 : vector<16x32xf32> to vector<16x32xbf16>
    %cst_11 = arith.constant dense<0.000000e+00> : vector<16x64xf32>
    %25 = tpu.matmul %24, %23, %cst_11 {dimension_numbers = #tpu.dot_dimension_numbers<[1], [0], [0], [1], [0, 0, 1, 1], [], []>} : vector<16x32xbf16>, vector<32x64xbf16>, vector<16x64xf32> -> vector<16x64xf32>
    %c0_12 = arith.constant 0 : index
    %c0_13 = arith.constant 0 : index
    %26 = vector.load %arg5[%c0_12, %c0_13] : memref<1x64xf32, #tpu.memory_space<vmem>>, vector<1x64xf32>
    %27 = vector.broadcast %26 : vector<1x64xf32> to vector<16x64xf32>
    %28 = arith.addf %25, %27 : vector<16x64xf32>
    %cst_14 = arith.constant 0.000000e+00 : f32
    %29 = vector.broadcast %cst_14 : f32 to vector<16x64xf32>
    %30 = arith.maximumf %28, %29 : vector<16x64xf32>
    %c0_15 = arith.constant 0 : index
    %c0_16 = arith.constant 0 : index
    %31 = vector.load %arg6[%c0_15, %c0_16] : memref<64x32xbf16, #tpu.memory_space<vmem>>, vector<64x32xbf16>
    %32 = arith.truncf %30 : vector<16x64xf32> to vector<16x64xbf16>
    %cst_17 = arith.constant dense<0.000000e+00> : vector<16x32xf32>
    %33 = tpu.matmul %32, %31, %cst_17 {dimension_numbers = #tpu.dot_dimension_numbers<[1], [0], [0], [1], [0, 0, 1, 1], [], []>} : vector<16x64xbf16>, vector<64x32xbf16>, vector<16x32xf32> -> vector<16x32xf32>
    %34 = arith.addf %0, %33 : vector<16x32xf32>
    %c0_18 = arith.constant 0 : index
    %c0_19 = arith.constant 0 : index
    %35 = vector.load %arg7[%c0_18, %c0_19] : memref<1x32xf32, #tpu.memory_space<vmem>>, vector<1x32xf32>
    %36 = vector.broadcast %35 : vector<1x32xf32> to vector<16x32xf32>
    %37 = arith.addf %34, %36 : vector<16x32xf32>
    %c0_20 = arith.constant 0 : index
    %c0_21 = arith.constant 0 : index
    %38 = vector.load %arg8[%c0_20, %c0_21] : memref<16x32xf32, #tpu.memory_space<vmem>>, vector<16x32xf32>
    tpu.vector_store %arg8[%c0_20, %c0_21], %37 {strides = array<i32>} : memref<16x32xf32, #tpu.memory_space<vmem>>, vector<16x32xf32>,
    return
  }
  func.func @transform_0(%arg0: i32) -> (i32, i32) {
    %c0_i32 = arith.constant 0 : i32
    %c0_i32_0 = arith.constant 0 : i32
    return %arg0, %c0_i32 : i32, i32
  }
  func.func @transform_1(%arg0: i32) -> (i32, i32) {
    %c0_i32 = arith.constant 0 : i32
    %c0_i32_0 = arith.constant 0 : i32
    %c0_i32_1 = arith.constant 0 : i32
    return %c0_i32, %c0_i32_0 : i32, i32
  }
  func.func @transform_2(%arg0: i32) -> (i32, i32) {
    %c0_i32 = arith.constant 0 : i32
    %c0_i32_0 = arith.constant 0 : i32
    %c0_i32_1 = arith.constant 0 : i32
    return %c0_i32, %c0_i32_0 : i32, i32
  }
  func.func @transform_3(%arg0: i32) -> (i32, i32) {
    %c0_i32 = arith.constant 0 : i32
    %c0_i32_0 = arith.constant 0 : i32
    %c0_i32_1 = arith.constant 0 : i32
    return %c0_i32, %c0_i32_0 : i32, i32
  }
  func.func @transform_4(%arg0: i32) -> (i32, i32) {
    %c0_i32 = arith.constant 0 : i32
    %c0_i32_0 = arith.constant 0 : i32
    %c0_i32_1 = arith.constant 0 : i32
    return %c0_i32, %c0_i32_0 : i32, i32
  }
  func.func @transform_5(%arg0: i32) -> (i32, i32) {
    %c0_i32 = arith.constant 0 : i32
    %c0_i32_0 = arith.constant 0 : i32
    %c0_i32_1 = arith.constant 0 : i32
    return %c0_i32, %c0_i32_0 : i32, i32
  }
  func.func @transform_6(%arg0: i32) -> (i32, i32) {
    %c0_i32 = arith.constant 0 : i32
    %c0_i32_0 = arith.constant 0 : i32
    %c0_i32_1 = arith.constant 0 : i32
    return %c0_i32, %c0_i32_0 : i32, i32
  }
  func.func @transform_7(%arg0: i32) -> (i32, i32) {
    %c0_i32 = arith.constant 0 : i32
    %c0_i32_0 = arith.constant 0 : i32
    return %arg0, %c0_i32 : i32, i32
  }
}

module attributes {stable_mosaic.version = 11 : i64} {
  func.func @_attn_pair_kernel(%arg0: i32, %arg1: memref<1x8x32xf32, #tpu.memory_space<vmem>>, %arg2: memref<1x8x32xf32, #tpu.memory_space<vmem>>, %arg3: memref<1x8x8xf32, #tpu.memory_space<vmem>>, %arg4: memref<1x1x8xf32, #tpu.memory_space<vmem>>, %arg5: memref<1x32xf32, #tpu.memory_space<vmem>>, %arg6: memref<1x32xf32, #tpu.memory_space<vmem>>, %arg7: memref<32x96xbf16, #tpu.memory_space<vmem>>, %arg8: memref<1x96xf32, #tpu.memory_space<vmem>>, %arg9: memref<32x32xbf16, #tpu.memory_space<vmem>>, %arg10: memref<1x32xf32, #tpu.memory_space<vmem>>, %arg11: memref<1x32xf32, #tpu.memory_space<vmem>>, %arg12: memref<1x32xf32, #tpu.memory_space<vmem>>, %arg13: memref<32x32xbf16, #tpu.memory_space<vmem>>, %arg14: memref<1x32xf32, #tpu.memory_space<vmem>>, %arg15: memref<32x64xbf16, #tpu.memory_space<vmem>>, %arg16: memref<1x64xf32, #tpu.memory_space<vmem>>, %arg17: memref<32x32xbf16, #tpu.memory_space<vmem>>, %arg18: memref<1x32xf32, #tpu.memory_space<vmem>>, %arg19: memref<1x8x32xf32, #tpu.memory_space<vmem>>) attributes {dimension_semantics = [#tpu.dimension_semantics<parallel>], iteration_bounds = array<i64: 2>, scalar_prefetch = 0 : i64, scratch_operands = 0 : i64, tpu.core_type = #tpu.core_type<tc>, window_params = [{transform_indices = @transform_0, window_bounds = array<i64: 1, 8, 32>}, {transform_indices = @transform_1, window_bounds = array<i64: 1, 8, 32>}, {transform_indices = @transform_2, window_bounds = array<i64: 1, 8, 8>}, {transform_indices = @transform_3, window_bounds = array<i64: 1, 1, 8>}, {pipeline_mode = #tpu.pipeline_mode<synchronous>, transform_indices = @transform_4, window_bounds = array<i64: 1, 32>}, {pipeline_mode = #tpu.pipeline_mode<synchronous>, transform_indices = @transform_5, window_bounds = array<i64: 1, 32>}, {pipeline_mode = #tpu.pipeline_mode<synchronous>, transform_indices = @transform_6, window_bounds = array<i64: 32, 96>}, {pipeline_mode = #tpu.pipeline_mode<synchronous>, transform_indices = @transform_7, window_bounds = array<i64: 1, 96>}, {pipeline_mode = #tpu.pipeline_mode<synchronous>, transform_indices = @transform_8, window_bounds = array<i64: 32, 32>}, {pipeline_mode = #tpu.pipeline_mode<synchronous>, transform_indices = @transform_9, window_bounds = array<i64: 1, 32>}, {pipeline_mode = #tpu.pipeline_mode<synchronous>, transform_indices = @transform_10, window_bounds = array<i64: 1, 32>}, {pipeline_mode = #tpu.pipeline_mode<synchronous>, transform_indices = @transform_11, window_bounds = array<i64: 1, 32>}, {pipeline_mode = #tpu.pipeline_mode<synchronous>, transform_indices = @transform_12, window_bounds = array<i64: 32, 32>}, {pipeline_mode = #tpu.pipeline_mode<synchronous>, transform_indices = @transform_13, window_bounds = array<i64: 1, 32>}, {pipeline_mode = #tpu.pipeline_mode<synchronous>, transform_indices = @transform_14, window_bounds = array<i64: 32, 64>}, {pipeline_mode = #tpu.pipeline_mode<synchronous>, transform_indices = @transform_15, window_bounds = array<i64: 1, 64>}, {pipeline_mode = #tpu.pipeline_mode<synchronous>, transform_indices = @transform_16, window_bounds = array<i64: 32, 32>}, {pipeline_mode = #tpu.pipeline_mode<synchronous>, transform_indices = @transform_17, window_bounds = array<i64: 1, 32>}, {transform_indices = @transform_18, window_bounds = array<i64: 1, 8, 32>}]} {
    %c0 = arith.constant 0 : index
    %c0_0 = arith.constant 0 : index
    %c0_1 = arith.constant 0 : index
    %0 = vector.load %arg1[%c0, %c0_0, %c0_1] : memref<1x8x32xf32, #tpu.memory_space<vmem>>, vector<1x8x32xf32>
    %1 = vector.shape_cast %0 : vector<1x8x32xf32> to vector<8x32xf32>
    %c0_2 = arith.constant 0 : index
    %c0_3 = arith.constant 0 : index
    %c0_4 = arith.constant 0 : index
    %2 = vector.load %arg2[%c0_2, %c0_3, %c0_4] : memref<1x8x32xf32, #tpu.memory_space<vmem>>, vector<1x8x32xf32>
    %3 = vector.shape_cast %2 : vector<1x8x32xf32> to vector<8x32xf32>
    %c0_5 = arith.constant 0 : index
    %c0_6 = arith.constant 0 : index
    %c0_7 = arith.constant 0 : index
    %4 = vector.load %arg3[%c0_5, %c0_6, %c0_7] : memref<1x8x8xf32, #tpu.memory_space<vmem>>, vector<1x8x8xf32>
    %5 = vector.shape_cast %4 : vector<1x8x8xf32> to vector<8x8xf32>
    %cst = arith.constant 0.000000e+00 : f32
    %6 = vector.broadcast %cst : f32 to vector<8x8xf32>
    %7 = arith.cmpf oeq, %5, %6 : vector<8x8xf32>
    %cst_8 = arith.constant -1.000000e+09 : f32
    %cst_9 = arith.constant 0.000000e+00 : f32
    %8 = vector.broadcast %cst_8 : f32 to vector<8x8xf32>
    %9 = vector.broadcast %cst_9 : f32 to vector<8x8xf32>
    %10 = arith.select %7, %8, %9 : vector<8x8xi1>, vector<8x8xf32>
    %c0_10 = arith.constant 0 : index
    %c0_11 = arith.constant 0 : index
    %c0_12 = arith.constant 0 : index
    %11 = vector.load %arg4[%c0_10, %c0_11, %c0_12] : memref<1x1x8xf32, #tpu.memory_space<vmem>>, vector<1x1x8xf32>
    %12 = vector.shape_cast %11 : vector<1x1x8xf32> to vector<1x8xf32>
    %cst_13 = arith.constant 0.000000e+00 : f32
    %13 = vector.broadcast %cst_13 : f32 to vector<1x8xf32>
    %14 = arith.cmpf oeq, %12, %13 : vector<1x8xf32>
    %cst_14 = arith.constant -1.000000e+09 : f32
    %cst_15 = arith.constant 0.000000e+00 : f32
    %15 = vector.broadcast %cst_14 : f32 to vector<1x8xf32>
    %16 = vector.broadcast %cst_15 : f32 to vector<1x8xf32>
    %17 = arith.select %14, %15, %16 : vector<1x8xi1>, vector<1x8xf32>
    %c0_16 = arith.constant 0 : index
    %c0_17 = arith.constant 0 : index
    %18 = vector.load %arg5[%c0_16, %c0_17] : memref<1x32xf32, #tpu.memory_space<vmem>>, vector<1x32xf32>
    %c0_18 = arith.constant 0 : index
    %c0_19 = arith.constant 0 : index
    %19 = vector.load %arg6[%c0_18, %c0_19] : memref<1x32xf32, #tpu.memory_space<vmem>>, vector<1x32xf32>
    %cst_20 = arith.constant dense<0.000000e+00> : vector<8xf32>
    %20 = vector.multi_reduction <add>, %1, %cst_20 [1] : vector<8x32xf32> to vector<8xf32>
    %21 = vector.shape_cast %20 : vector<8xf32> to vector<8x1xf32>
    %cst_21 = arith.constant 3.200000e+01 : f32
    %22 = vector.broadcast %cst_21 : f32 to vector<8x1xf32>
    %23 = arith.divf %21, %22 : vector<8x1xf32>
    %24 = vector.broadcast %23 : vector<8x1xf32> to vector<8x32xf32>
    %25 = arith.subf %1, %24 : vector<8x32xf32>
    %26 = arith.mulf %25, %25 : vector<8x32xf32>
    %cst_22 = arith.constant dense<0.000000e+00> : vector<8xf32>
    %27 = vector.multi_reduction <add>, %26, %cst_22 [1] : vector<8x32xf32> to vector<8xf32>
    %28 = vector.shape_cast %27 : vector<8xf32> to vector<8x1xf32>
    %cst_23 = arith.constant 0.0322580636 : f32
    %29 = vector.broadcast %cst_23 : f32 to vector<8x1xf32>
    %30 = arith.mulf %28, %29 : vector<8x1xf32>
    %31 = vector.broadcast %18 : vector<1x32xf32> to vector<8x32xf32>
    %32 = arith.mulf %31, %25 : vector<8x32xf32>
    %33 = math.sqrt %30 : vector<8x1xf32>
    %cst_24 = arith.constant 9.99999997E-7 : f32
    %34 = vector.broadcast %cst_24 : f32 to vector<8x1xf32>
    %35 = arith.addf %33, %34 : vector<8x1xf32>
    %36 = vector.broadcast %35 : vector<8x1xf32> to vector<8x32xf32>
    %37 = arith.divf %32, %36 : vector<8x32xf32>
    %38 = vector.broadcast %19 : vector<1x32xf32> to vector<8x32xf32>
    %39 = arith.addf %37, %38 : vector<8x32xf32>
    %c0_25 = arith.constant 0 : index
    %c0_26 = arith.constant 0 : index
    %40 = vector.load %arg7[%c0_25, %c0_26] : memref<32x96xbf16, #tpu.memory_space<vmem>>, vector<32x96xbf16>
    %41 = arith.truncf %39 : vector<8x32xf32> to vector<8x32xbf16>
    %cst_27 = arith.constant dense<0.000000e+00> : vector<8x96xf32>
    %42 = tpu.matmul %41, %40, %cst_27 {dimension_numbers = #tpu.dot_dimension_numbers<[1], [0], [0], [1], [0, 0, 1, 1], [], []>} : vector<8x32xbf16>, vector<32x96xbf16>, vector<8x96xf32> -> vector<8x96xf32>
    %c0_28 = arith.constant 0 : index
    %c0_29 = arith.constant 0 : index
    %43 = vector.load %arg8[%c0_28, %c0_29] : memref<1x96xf32, #tpu.memory_space<vmem>>, vector<1x96xf32>
    %44 = vector.broadcast %43 : vector<1x96xf32> to vector<8x96xf32>
    %45 = arith.addf %42, %44 : vector<8x96xf32>
    %46 = vector.extract_strided_slice %45 {offsets = [0, 0], sizes = [8, 32], strides = [1, 1]} : vector<8x96xf32> to vector<8x32xf32>
    %47 = vector.extract_strided_slice %45 {offsets = [0, 32], sizes = [8, 32], strides = [1, 1]} : vector<8x96xf32> to vector<8x32xf32>
    %48 = vector.extract_strided_slice %45 {offsets = [0, 64], sizes = [8, 32], strides = [1, 1]} : vector<8x96xf32> to vector<8x32xf32>
    %49 = vector.extract_strided_slice %46 {offsets = [0, 0], sizes = [8, 8], strides = [1, 1]} : vector<8x32xf32> to vector<8x8xf32>
    %50 = vector.extract_strided_slice %47 {offsets = [0, 0], sizes = [8, 8], strides = [1, 1]} : vector<8x32xf32> to vector<8x8xf32>
    %51 = vector.extract_strided_slice %48 {offsets = [0, 0], sizes = [8, 8], strides = [1, 1]} : vector<8x32xf32> to vector<8x8xf32>
    %52 = arith.truncf %49 : vector<8x8xf32> to vector<8x8xbf16>
    %53 = arith.truncf %50 : vector<8x8xf32> to vector<8x8xbf16>
    %cst_30 = arith.constant dense<0.000000e+00> : vector<8x8xf32>
    %54 = tpu.matmul %52, %53, %cst_30 {dimension_numbers = #tpu.dot_dimension_numbers<[1], [1], [0], [0], [0, 0, 1, 0], [], []>} : vector<8x8xbf16>, vector<8x8xbf16>, vector<8x8xf32> -> vector<8x8xf32>
    %55 = arith.addf %54, %10 : vector<8x8xf32>
    %cst_31 = arith.constant dense<0xFF800000> : vector<8xf32>
    %56 = vector.multi_reduction <maximumf>, %55, %cst_31 [1] : vector<8x8xf32> to vector<8xf32>
    %57 = vector.shape_cast %56 : vector<8xf32> to vector<8x1xf32>
    %58 = vector.broadcast %57 : vector<8x1xf32> to vector<8x8xf32>
    %59 = arith.subf %55, %58 : vector<8x8xf32>
    %60 = math.exp %59 : vector<8x8xf32>
    %cst_32 = arith.constant dense<0.000000e+00> : vector<8xf32>
    %61 = vector.multi_reduction <add>, %60, %cst_32 [1] : vector<8x8xf32> to vector<8xf32>
    %62 = vector.shape_cast %61 : vector<8xf32> to vector<8x1xf32>
    %63 = vector.broadcast %62 : vector<8x1xf32> to vector<8x8xf32>
    %64 = arith.divf %60, %63 : vector<8x8xf32>
    %65 = arith.truncf %64 : vector<8x8xf32> to vector<8x8xbf16>
    %66 = arith.truncf %51 : vector<8x8xf32> to vector<8x8xbf16>
    %cst_33 = arith.constant dense<0.000000e+00> : vector<8x8xf32>
    %67 = tpu.matmul %65, %66, %cst_33 {dimension_numbers = #tpu.dot_dimension_numbers<[1], [0], [0], [1], [0, 0, 1, 1], [], []>} : vector<8x8xbf16>, vector<8x8xbf16>, vector<8x8xf32> -> vector<8x8xf32>
    %68 = vector.extract_strided_slice %46 {offsets = [0, 8], sizes = [8, 8], strides = [1, 1]} : vector<8x32xf32> to vector<8x8xf32>
    %69 = vector.extract_strided_slice %47 {offsets = [0, 8], sizes = [8, 8], strides = [1, 1]} : vector<8x32xf32> to vector<8x8xf32>
    %70 = vector.extract_strided_slice %48 {offsets = [0, 8], sizes = [8, 8], strides = [1, 1]} : vector<8x32xf32> to vector<8x8xf32>
    %71 = arith.truncf %68 : vector<8x8xf32> to vector<8x8xbf16>
    %72 = arith.truncf %69 : vector<8x8xf32> to vector<8x8xbf16>
    %cst_34 = arith.constant dense<0.000000e+00> : vector<8x8xf32>
    %73 = tpu.matmul %71, %72, %cst_34 {dimension_numbers = #tpu.dot_dimension_numbers<[1], [1], [0], [0], [0, 0, 1, 0], [], []>} : vector<8x8xbf16>, vector<8x8xbf16>, vector<8x8xf32> -> vector<8x8xf32>
    %74 = arith.addf %73, %10 : vector<8x8xf32>
    %cst_35 = arith.constant dense<0xFF800000> : vector<8xf32>
    %75 = vector.multi_reduction <maximumf>, %74, %cst_35 [1] : vector<8x8xf32> to vector<8xf32>
    %76 = vector.shape_cast %75 : vector<8xf32> to vector<8x1xf32>
    %77 = vector.broadcast %76 : vector<8x1xf32> to vector<8x8xf32>
    %78 = arith.subf %74, %77 : vector<8x8xf32>
    %79 = math.exp %78 : vector<8x8xf32>
    %cst_36 = arith.constant dense<0.000000e+00> : vector<8xf32>
    %80 = vector.multi_reduction <add>, %79, %cst_36 [1] : vector<8x8xf32> to vector<8xf32>
    %81 = vector.shape_cast %80 : vector<8xf32> to vector<8x1xf32>
    %82 = vector.broadcast %81 : vector<8x1xf32> to vector<8x8xf32>
    %83 = arith.divf %79, %82 : vector<8x8xf32>
    %84 = arith.truncf %83 : vector<8x8xf32> to vector<8x8xbf16>
    %85 = arith.truncf %70 : vector<8x8xf32> to vector<8x8xbf16>
    %cst_37 = arith.constant dense<0.000000e+00> : vector<8x8xf32>
    %86 = tpu.matmul %84, %85, %cst_37 {dimension_numbers = #tpu.dot_dimension_numbers<[1], [0], [0], [1], [0, 0, 1, 1], [], []>} : vector<8x8xbf16>, vector<8x8xbf16>, vector<8x8xf32> -> vector<8x8xf32>
    %87 = vector.extract_strided_slice %46 {offsets = [0, 16], sizes = [8, 8], strides = [1, 1]} : vector<8x32xf32> to vector<8x8xf32>
    %88 = vector.extract_strided_slice %47 {offsets = [0, 16], sizes = [8, 8], strides = [1, 1]} : vector<8x32xf32> to vector<8x8xf32>
    %89 = vector.extract_strided_slice %48 {offsets = [0, 16], sizes = [8, 8], strides = [1, 1]} : vector<8x32xf32> to vector<8x8xf32>
    %90 = arith.truncf %87 : vector<8x8xf32> to vector<8x8xbf16>
    %91 = arith.truncf %88 : vector<8x8xf32> to vector<8x8xbf16>
    %cst_38 = arith.constant dense<0.000000e+00> : vector<8x8xf32>
    %92 = tpu.matmul %90, %91, %cst_38 {dimension_numbers = #tpu.dot_dimension_numbers<[1], [1], [0], [0], [0, 0, 1, 0], [], []>} : vector<8x8xbf16>, vector<8x8xbf16>, vector<8x8xf32> -> vector<8x8xf32>
    %93 = arith.addf %92, %10 : vector<8x8xf32>
    %cst_39 = arith.constant dense<0xFF800000> : vector<8xf32>
    %94 = vector.multi_reduction <maximumf>, %93, %cst_39 [1] : vector<8x8xf32> to vector<8xf32>
    %95 = vector.shape_cast %94 : vector<8xf32> to vector<8x1xf32>
    %96 = vector.broadcast %95 : vector<8x1xf32> to vector<8x8xf32>
    %97 = arith.subf %93, %96 : vector<8x8xf32>
    %98 = math.exp %97 : vector<8x8xf32>
    %cst_40 = arith.constant dense<0.000000e+00> : vector<8xf32>
    %99 = vector.multi_reduction <add>, %98, %cst_40 [1] : vector<8x8xf32> to vector<8xf32>
    %100 = vector.shape_cast %99 : vector<8xf32> to vector<8x1xf32>
    %101 = vector.broadcast %100 : vector<8x1xf32> to vector<8x8xf32>
    %102 = arith.divf %98, %101 : vector<8x8xf32>
    %103 = arith.truncf %102 : vector<8x8xf32> to vector<8x8xbf16>
    %104 = arith.truncf %89 : vector<8x8xf32> to vector<8x8xbf16>
    %cst_41 = arith.constant dense<0.000000e+00> : vector<8x8xf32>
    %105 = tpu.matmul %103, %104, %cst_41 {dimension_numbers = #tpu.dot_dimension_numbers<[1], [0], [0], [1], [0, 0, 1, 1], [], []>} : vector<8x8xbf16>, vector<8x8xbf16>, vector<8x8xf32> -> vector<8x8xf32>
    %106 = vector.extract_strided_slice %46 {offsets = [0, 24], sizes = [8, 8], strides = [1, 1]} : vector<8x32xf32> to vector<8x8xf32>
    %107 = vector.extract_strided_slice %47 {offsets = [0, 24], sizes = [8, 8], strides = [1, 1]} : vector<8x32xf32> to vector<8x8xf32>
    %108 = vector.extract_strided_slice %48 {offsets = [0, 24], sizes = [8, 8], strides = [1, 1]} : vector<8x32xf32> to vector<8x8xf32>
    %109 = arith.truncf %106 : vector<8x8xf32> to vector<8x8xbf16>
    %110 = arith.truncf %107 : vector<8x8xf32> to vector<8x8xbf16>
    %cst_42 = arith.constant dense<0.000000e+00> : vector<8x8xf32>
    %111 = tpu.matmul %109, %110, %cst_42 {dimension_numbers = #tpu.dot_dimension_numbers<[1], [1], [0], [0], [0, 0, 1, 0], [], []>} : vector<8x8xbf16>, vector<8x8xbf16>, vector<8x8xf32> -> vector<8x8xf32>
    %112 = arith.addf %111, %10 : vector<8x8xf32>
    %cst_43 = arith.constant dense<0xFF800000> : vector<8xf32>
    %113 = vector.multi_reduction <maximumf>, %112, %cst_43 [1] : vector<8x8xf32> to vector<8xf32>
    %114 = vector.shape_cast %113 : vector<8xf32> to vector<8x1xf32>
    %115 = vector.broadcast %114 : vector<8x1xf32> to vector<8x8xf32>
    %116 = arith.subf %112, %115 : vector<8x8xf32>
    %117 = math.exp %116 : vector<8x8xf32>
    %cst_44 = arith.constant dense<0.000000e+00> : vector<8xf32>
    %118 = vector.multi_reduction <add>, %117, %cst_44 [1] : vector<8x8xf32> to vector<8xf32>
    %119 = vector.shape_cast %118 : vector<8xf32> to vector<8x1xf32>
    %120 = vector.broadcast %119 : vector<8x1xf32> to vector<8x8xf32>
    %121 = arith.divf %117, %120 : vector<8x8xf32>
    %122 = arith.truncf %121 : vector<8x8xf32> to vector<8x8xbf16>
    %123 = arith.truncf %108 : vector<8x8xf32> to vector<8x8xbf16>
    %cst_45 = arith.constant dense<0.000000e+00> : vector<8x8xf32>
    %124 = tpu.matmul %122, %123, %cst_45 {dimension_numbers = #tpu.dot_dimension_numbers<[1], [0], [0], [1], [0, 0, 1, 1], [], []>} : vector<8x8xbf16>, vector<8x8xbf16>, vector<8x8xf32> -> vector<8x8xf32>
    %125 = tpu.concatenate %67, %86, %105, %124 in 1 : vector<8x8xf32>, vector<8x8xf32>, vector<8x8xf32>, vector<8x8xf32> -> vector<8x32xf32>
    %c0_46 = arith.constant 0 : index
    %c0_47 = arith.constant 0 : index
    %126 = vector.load %arg9[%c0_46, %c0_47] : memref<32x32xbf16, #tpu.memory_space<vmem>>, vector<32x32xbf16>
    %127 = arith.truncf %125 : vector<8x32xf32> to vector<8x32xbf16>
    %cst_48 = arith.constant dense<0.000000e+00> : vector<8x32xf32>
    %128 = tpu.matmul %127, %126, %cst_48 {dimension_numbers = #tpu.dot_dimension_numbers<[1], [0], [0], [1], [0, 0, 1, 1], [], []>} : vector<8x32xbf16>, vector<32x32xbf16>, vector<8x32xf32> -> vector<8x32xf32>
    %129 = arith.addf %1, %128 : vector<8x32xf32>
    %c0_49 = arith.constant 0 : index
    %c0_50 = arith.constant 0 : index
    %130 = vector.load %arg10[%c0_49, %c0_50] : memref<1x32xf32, #tpu.memory_space<vmem>>, vector<1x32xf32>
    %131 = vector.broadcast %130 : vector<1x32xf32> to vector<8x32xf32>
    %132 = arith.addf %129, %131 : vector<8x32xf32>
    %c0_51 = arith.constant 0 : index
    %c0_52 = arith.constant 0 : index
    %133 = vector.load %arg11[%c0_51, %c0_52] : memref<1x32xf32, #tpu.memory_space<vmem>>, vector<1x32xf32>
    %c0_53 = arith.constant 0 : index
    %c0_54 = arith.constant 0 : index
    %134 = vector.load %arg12[%c0_53, %c0_54] : memref<1x32xf32, #tpu.memory_space<vmem>>, vector<1x32xf32>
    %cst_55 = arith.constant dense<0.000000e+00> : vector<8xf32>
    %135 = vector.multi_reduction <add>, %132, %cst_55 [1] : vector<8x32xf32> to vector<8xf32>
    %136 = vector.shape_cast %135 : vector<8xf32> to vector<8x1xf32>
    %cst_56 = arith.constant 3.200000e+01 : f32
    %137 = vector.broadcast %cst_56 : f32 to vector<8x1xf32>
    %138 = arith.divf %136, %137 : vector<8x1xf32>
    %139 = vector.broadcast %138 : vector<8x1xf32> to vector<8x32xf32>
    %140 = arith.subf %132, %139 : vector<8x32xf32>
    %141 = arith.mulf %140, %140 : vector<8x32xf32>
    %cst_57 = arith.constant dense<0.000000e+00> : vector<8xf32>
    %142 = vector.multi_reduction <add>, %141, %cst_57 [1] : vector<8x32xf32> to vector<8xf32>
    %143 = vector.shape_cast %142 : vector<8xf32> to vector<8x1xf32>
    %cst_58 = arith.constant 0.0322580636 : f32
    %144 = vector.broadcast %cst_58 : f32 to vector<8x1xf32>
    %145 = arith.mulf %143, %144 : vector<8x1xf32>
    %146 = vector.broadcast %133 : vector<1x32xf32> to vector<8x32xf32>
    %147 = arith.mulf %146, %140 : vector<8x32xf32>
    %148 = math.sqrt %145 : vector<8x1xf32>
    %cst_59 = arith.constant 9.99999997E-7 : f32
    %149 = vector.broadcast %cst_59 : f32 to vector<8x1xf32>
    %150 = arith.addf %148, %149 : vector<8x1xf32>
    %151 = vector.broadcast %150 : vector<8x1xf32> to vector<8x32xf32>
    %152 = arith.divf %147, %151 : vector<8x32xf32>
    %153 = vector.broadcast %134 : vector<1x32xf32> to vector<8x32xf32>
    %154 = arith.addf %152, %153 : vector<8x32xf32>
    %c0_60 = arith.constant 0 : index
    %c0_61 = arith.constant 0 : index
    %155 = vector.load %arg13[%c0_60, %c0_61] : memref<32x32xbf16, #tpu.memory_space<vmem>>, vector<32x32xbf16>
    %156 = arith.truncf %154 : vector<8x32xf32> to vector<8x32xbf16>
    %cst_62 = arith.constant dense<0.000000e+00> : vector<8x32xf32>
    %157 = tpu.matmul %156, %155, %cst_62 {dimension_numbers = #tpu.dot_dimension_numbers<[1], [0], [0], [1], [0, 0, 1, 1], [], []>} : vector<8x32xbf16>, vector<32x32xbf16>, vector<8x32xf32> -> vector<8x32xf32>
    %c0_63 = arith.constant 0 : index
    %c0_64 = arith.constant 0 : index
    %158 = vector.load %arg14[%c0_63, %c0_64] : memref<1x32xf32, #tpu.memory_space<vmem>>, vector<1x32xf32>
    %159 = vector.broadcast %158 : vector<1x32xf32> to vector<8x32xf32>
    %160 = arith.addf %157, %159 : vector<8x32xf32>
    %c0_65 = arith.constant 0 : index
    %c0_66 = arith.constant 0 : index
    %161 = vector.load %arg15[%c0_65, %c0_66] : memref<32x64xbf16, #tpu.memory_space<vmem>>, vector<32x64xbf16>
    %162 = arith.truncf %3 : vector<8x32xf32> to vector<8x32xbf16>
    %cst_67 = arith.constant dense<0.000000e+00> : vector<8x64xf32>
    %163 = tpu.matmul %162, %161, %cst_67 {dimension_numbers = #tpu.dot_dimension_numbers<[1], [0], [0], [1], [0, 0, 1, 1], [], []>} : vector<8x32xbf16>, vector<32x64xbf16>, vector<8x64xf32> -> vector<8x64xf32>
    %c0_68 = arith.constant 0 : index
    %c0_69 = arith.constant 0 : index
    %164 = vector.load %arg16[%c0_68, %c0_69] : memref<1x64xf32, #tpu.memory_space<vmem>>, vector<1x64xf32>
    %165 = vector.broadcast %164 : vector<1x64xf32> to vector<8x64xf32>
    %166 = arith.addf %163, %165 : vector<8x64xf32>
    %167 = vector.extract_strided_slice %166 {offsets = [0, 0], sizes = [8, 32], strides = [1, 1]} : vector<8x64xf32> to vector<8x32xf32>
    %168 = vector.extract_strided_slice %166 {offsets = [0, 32], sizes = [8, 32], strides = [1, 1]} : vector<8x64xf32> to vector<8x32xf32>
    %169 = vector.extract_strided_slice %160 {offsets = [0, 0], sizes = [8, 8], strides = [1, 1]} : vector<8x32xf32> to vector<8x8xf32>
    %170 = vector.extract_strided_slice %167 {offsets = [0, 0], sizes = [8, 8], strides = [1, 1]} : vector<8x32xf32> to vector<8x8xf32>
    %171 = vector.extract_strided_slice %168 {offsets = [0, 0], sizes = [8, 8], strides = [1, 1]} : vector<8x32xf32> to vector<8x8xf32>
    %172 = arith.truncf %169 : vector<8x8xf32> to vector<8x8xbf16>
    %173 = arith.truncf %170 : vector<8x8xf32> to vector<8x8xbf16>
    %cst_70 = arith.constant dense<0.000000e+00> : vector<8x8xf32>
    %174 = tpu.matmul %172, %173, %cst_70 {dimension_numbers = #tpu.dot_dimension_numbers<[1], [1], [0], [0], [0, 0, 1, 0], [], []>} : vector<8x8xbf16>, vector<8x8xbf16>, vector<8x8xf32> -> vector<8x8xf32>
    %175 = vector.broadcast %17 : vector<1x8xf32> to vector<8x8xf32>
    %176 = arith.addf %174, %175 : vector<8x8xf32>
    %cst_71 = arith.constant dense<0xFF800000> : vector<8xf32>
    %177 = vector.multi_reduction <maximumf>, %176, %cst_71 [1] : vector<8x8xf32> to vector<8xf32>
    %178 = vector.shape_cast %177 : vector<8xf32> to vector<8x1xf32>
    %179 = vector.broadcast %178 : vector<8x1xf32> to vector<8x8xf32>
    %180 = arith.subf %176, %179 : vector<8x8xf32>
    %181 = math.exp %180 : vector<8x8xf32>
    %cst_72 = arith.constant dense<0.000000e+00> : vector<8xf32>
    %182 = vector.multi_reduction <add>, %181, %cst_72 [1] : vector<8x8xf32> to vector<8xf32>
    %183 = vector.shape_cast %182 : vector<8xf32> to vector<8x1xf32>
    %184 = vector.broadcast %183 : vector<8x1xf32> to vector<8x8xf32>
    %185 = arith.divf %181, %184 : vector<8x8xf32>
    %186 = arith.truncf %185 : vector<8x8xf32> to vector<8x8xbf16>
    %187 = arith.truncf %171 : vector<8x8xf32> to vector<8x8xbf16>
    %cst_73 = arith.constant dense<0.000000e+00> : vector<8x8xf32>
    %188 = tpu.matmul %186, %187, %cst_73 {dimension_numbers = #tpu.dot_dimension_numbers<[1], [0], [0], [1], [0, 0, 1, 1], [], []>} : vector<8x8xbf16>, vector<8x8xbf16>, vector<8x8xf32> -> vector<8x8xf32>
    %189 = vector.extract_strided_slice %160 {offsets = [0, 8], sizes = [8, 8], strides = [1, 1]} : vector<8x32xf32> to vector<8x8xf32>
    %190 = vector.extract_strided_slice %167 {offsets = [0, 8], sizes = [8, 8], strides = [1, 1]} : vector<8x32xf32> to vector<8x8xf32>
    %191 = vector.extract_strided_slice %168 {offsets = [0, 8], sizes = [8, 8], strides = [1, 1]} : vector<8x32xf32> to vector<8x8xf32>
    %192 = arith.truncf %189 : vector<8x8xf32> to vector<8x8xbf16>
    %193 = arith.truncf %190 : vector<8x8xf32> to vector<8x8xbf16>
    %cst_74 = arith.constant dense<0.000000e+00> : vector<8x8xf32>
    %194 = tpu.matmul %192, %193, %cst_74 {dimension_numbers = #tpu.dot_dimension_numbers<[1], [1], [0], [0], [0, 0, 1, 0], [], []>} : vector<8x8xbf16>, vector<8x8xbf16>, vector<8x8xf32> -> vector<8x8xf32>
    %195 = vector.broadcast %17 : vector<1x8xf32> to vector<8x8xf32>
    %196 = arith.addf %194, %195 : vector<8x8xf32>
    %cst_75 = arith.constant dense<0xFF800000> : vector<8xf32>
    %197 = vector.multi_reduction <maximumf>, %196, %cst_75 [1] : vector<8x8xf32> to vector<8xf32>
    %198 = vector.shape_cast %197 : vector<8xf32> to vector<8x1xf32>
    %199 = vector.broadcast %198 : vector<8x1xf32> to vector<8x8xf32>
    %200 = arith.subf %196, %199 : vector<8x8xf32>
    %201 = math.exp %200 : vector<8x8xf32>
    %cst_76 = arith.constant dense<0.000000e+00> : vector<8xf32>
    %202 = vector.multi_reduction <add>, %201, %cst_76 [1] : vector<8x8xf32> to vector<8xf32>
    %203 = vector.shape_cast %202 : vector<8xf32> to vector<8x1xf32>
    %204 = vector.broadcast %203 : vector<8x1xf32> to vector<8x8xf32>
    %205 = arith.divf %201, %204 : vector<8x8xf32>
    %206 = arith.truncf %205 : vector<8x8xf32> to vector<8x8xbf16>
    %207 = arith.truncf %191 : vector<8x8xf32> to vector<8x8xbf16>
    %cst_77 = arith.constant dense<0.000000e+00> : vector<8x8xf32>
    %208 = tpu.matmul %206, %207, %cst_77 {dimension_numbers = #tpu.dot_dimension_numbers<[1], [0], [0], [1], [0, 0, 1, 1], [], []>} : vector<8x8xbf16>, vector<8x8xbf16>, vector<8x8xf32> -> vector<8x8xf32>
    %209 = vector.extract_strided_slice %160 {offsets = [0, 16], sizes = [8, 8], strides = [1, 1]} : vector<8x32xf32> to vector<8x8xf32>
    %210 = vector.extract_strided_slice %167 {offsets = [0, 16], sizes = [8, 8], strides = [1, 1]} : vector<8x32xf32> to vector<8x8xf32>
    %211 = vector.extract_strided_slice %168 {offsets = [0, 16], sizes = [8, 8], strides = [1, 1]} : vector<8x32xf32> to vector<8x8xf32>
    %212 = arith.truncf %209 : vector<8x8xf32> to vector<8x8xbf16>
    %213 = arith.truncf %210 : vector<8x8xf32> to vector<8x8xbf16>
    %cst_78 = arith.constant dense<0.000000e+00> : vector<8x8xf32>
    %214 = tpu.matmul %212, %213, %cst_78 {dimension_numbers = #tpu.dot_dimension_numbers<[1], [1], [0], [0], [0, 0, 1, 0], [], []>} : vector<8x8xbf16>, vector<8x8xbf16>, vector<8x8xf32> -> vector<8x8xf32>
    %215 = vector.broadcast %17 : vector<1x8xf32> to vector<8x8xf32>
    %216 = arith.addf %214, %215 : vector<8x8xf32>
    %cst_79 = arith.constant dense<0xFF800000> : vector<8xf32>
    %217 = vector.multi_reduction <maximumf>, %216, %cst_79 [1] : vector<8x8xf32> to vector<8xf32>
    %218 = vector.shape_cast %217 : vector<8xf32> to vector<8x1xf32>
    %219 = vector.broadcast %218 : vector<8x1xf32> to vector<8x8xf32>
    %220 = arith.subf %216, %219 : vector<8x8xf32>
    %221 = math.exp %220 : vector<8x8xf32>
    %cst_80 = arith.constant dense<0.000000e+00> : vector<8xf32>
    %222 = vector.multi_reduction <add>, %221, %cst_80 [1] : vector<8x8xf32> to vector<8xf32>
    %223 = vector.shape_cast %222 : vector<8xf32> to vector<8x1xf32>
    %224 = vector.broadcast %223 : vector<8x1xf32> to vector<8x8xf32>
    %225 = arith.divf %221, %224 : vector<8x8xf32>
    %226 = arith.truncf %225 : vector<8x8xf32> to vector<8x8xbf16>
    %227 = arith.truncf %211 : vector<8x8xf32> to vector<8x8xbf16>
    %cst_81 = arith.constant dense<0.000000e+00> : vector<8x8xf32>
    %228 = tpu.matmul %226, %227, %cst_81 {dimension_numbers = #tpu.dot_dimension_numbers<[1], [0], [0], [1], [0, 0, 1, 1], [], []>} : vector<8x8xbf16>, vector<8x8xbf16>, vector<8x8xf32> -> vector<8x8xf32>
    %229 = vector.extract_strided_slice %160 {offsets = [0, 24], sizes = [8, 8], strides = [1, 1]} : vector<8x32xf32> to vector<8x8xf32>
    %230 = vector.extract_strided_slice %167 {offsets = [0, 24], sizes = [8, 8], strides = [1, 1]} : vector<8x32xf32> to vector<8x8xf32>
    %231 = vector.extract_strided_slice %168 {offsets = [0, 24], sizes = [8, 8], strides = [1, 1]} : vector<8x32xf32> to vector<8x8xf32>
    %232 = arith.truncf %229 : vector<8x8xf32> to vector<8x8xbf16>
    %233 = arith.truncf %230 : vector<8x8xf32> to vector<8x8xbf16>
    %cst_82 = arith.constant dense<0.000000e+00> : vector<8x8xf32>
    %234 = tpu.matmul %232, %233, %cst_82 {dimension_numbers = #tpu.dot_dimension_numbers<[1], [1], [0], [0], [0, 0, 1, 0], [], []>} : vector<8x8xbf16>, vector<8x8xbf16>, vector<8x8xf32> -> vector<8x8xf32>
    %235 = vector.broadcast %17 : vector<1x8xf32> to vector<8x8xf32>
    %236 = arith.addf %234, %235 : vector<8x8xf32>
    %cst_83 = arith.constant dense<0xFF800000> : vector<8xf32>
    %237 = vector.multi_reduction <maximumf>, %236, %cst_83 [1] : vector<8x8xf32> to vector<8xf32>
    %238 = vector.shape_cast %237 : vector<8xf32> to vector<8x1xf32>
    %239 = vector.broadcast %238 : vector<8x1xf32> to vector<8x8xf32>
    %240 = arith.subf %236, %239 : vector<8x8xf32>
    %241 = math.exp %240 : vector<8x8xf32>
    %cst_84 = arith.constant dense<0.000000e+00> : vector<8xf32>
    %242 = vector.multi_reduction <add>, %241, %cst_84 [1] : vector<8x8xf32> to vector<8xf32>
    %243 = vector.shape_cast %242 : vector<8xf32> to vector<8x1xf32>
    %244 = vector.broadcast %243 : vector<8x1xf32> to vector<8x8xf32>
    %245 = arith.divf %241, %244 : vector<8x8xf32>
    %246 = arith.truncf %245 : vector<8x8xf32> to vector<8x8xbf16>
    %247 = arith.truncf %231 : vector<8x8xf32> to vector<8x8xbf16>
    %cst_85 = arith.constant dense<0.000000e+00> : vector<8x8xf32>
    %248 = tpu.matmul %246, %247, %cst_85 {dimension_numbers = #tpu.dot_dimension_numbers<[1], [0], [0], [1], [0, 0, 1, 1], [], []>} : vector<8x8xbf16>, vector<8x8xbf16>, vector<8x8xf32> -> vector<8x8xf32>
    %249 = tpu.concatenate %188, %208, %228, %248 in 1 : vector<8x8xf32>, vector<8x8xf32>, vector<8x8xf32>, vector<8x8xf32> -> vector<8x32xf32>
    %c0_86 = arith.constant 0 : index
    %c0_87 = arith.constant 0 : index
    %250 = vector.load %arg17[%c0_86, %c0_87] : memref<32x32xbf16, #tpu.memory_space<vmem>>, vector<32x32xbf16>
    %251 = arith.truncf %249 : vector<8x32xf32> to vector<8x32xbf16>
    %cst_88 = arith.constant dense<0.000000e+00> : vector<8x32xf32>
    %252 = tpu.matmul %251, %250, %cst_88 {dimension_numbers = #tpu.dot_dimension_numbers<[1], [0], [0], [1], [0, 0, 1, 1], [], []>} : vector<8x32xbf16>, vector<32x32xbf16>, vector<8x32xf32> -> vector<8x32xf32>
    %253 = arith.addf %132, %252 : vector<8x32xf32>
    %c0_89 = arith.constant 0 : index
    %c0_90 = arith.constant 0 : index
    %254 = vector.load %arg18[%c0_89, %c0_90] : memref<1x32xf32, #tpu.memory_space<vmem>>, vector<1x32xf32>
    %255 = vector.broadcast %254 : vector<1x32xf32> to vector<8x32xf32>
    %256 = arith.addf %253, %255 : vector<8x32xf32>
    %c0_91 = arith.constant 0 : index
    %c0_92 = arith.constant 0 : index
    %c0_93 = arith.constant 0 : index
    %257 = vector.load %arg19[%c0_91, %c0_92, %c0_93] : memref<1x8x32xf32, #tpu.memory_space<vmem>>, vector<1x8x32xf32>
    %258 = vector.shape_cast %257 : vector<1x8x32xf32> to vector<8x32xf32>
    %259 = vector.shape_cast %256 : vector<8x32xf32> to vector<1x8x32xf32>
    tpu.vector_store %arg19[%c0_91, %c0_92, %c0_93], %259 {strides = array<i32>} : memref<1x8x32xf32, #tpu.memory_space<vmem>>, vector<1x8x32xf32>,
    return
  }
  func.func @transform_0(%arg0: i32) -> (i32, i32, i32) {
    %c0_i32 = arith.constant 0 : i32
    %c0_i32_0 = arith.constant 0 : i32
    %c0_i32_1 = arith.constant 0 : i32
    return %arg0, %c0_i32, %c0_i32_0 : i32, i32, i32
  }
  func.func @transform_1(%arg0: i32) -> (i32, i32, i32) {
    %c0_i32 = arith.constant 0 : i32
    %c0_i32_0 = arith.constant 0 : i32
    %c0_i32_1 = arith.constant 0 : i32
    return %arg0, %c0_i32, %c0_i32_0 : i32, i32, i32
  }
  func.func @transform_2(%arg0: i32) -> (i32, i32, i32) {
    %c0_i32 = arith.constant 0 : i32
    %c0_i32_0 = arith.constant 0 : i32
    %c0_i32_1 = arith.constant 0 : i32
    return %arg0, %c0_i32, %c0_i32_0 : i32, i32, i32
  }
  func.func @transform_3(%arg0: i32) -> (i32, i32, i32) {
    %c0_i32 = arith.constant 0 : i32
    %c0_i32_0 = arith.constant 0 : i32
    %c0_i32_1 = arith.constant 0 : i32
    return %arg0, %c0_i32, %c0_i32_0 : i32, i32, i32
  }
  func.func @transform_4(%arg0: i32) -> (i32, i32) {
    %c0_i32 = arith.constant 0 : i32
    %c0_i32_0 = arith.constant 0 : i32
    %c0_i32_1 = arith.constant 0 : i32
    return %c0_i32, %c0_i32_0 : i32, i32
  }
  func.func @transform_5(%arg0: i32) -> (i32, i32) {
    %c0_i32 = arith.constant 0 : i32
    %c0_i32_0 = arith.constant 0 : i32
    %c0_i32_1 = arith.constant 0 : i32
    return %c0_i32, %c0_i32_0 : i32, i32
  }
  func.func @transform_6(%arg0: i32) -> (i32, i32) {
    %c0_i32 = arith.constant 0 : i32
    %c0_i32_0 = arith.constant 0 : i32
    %c0_i32_1 = arith.constant 0 : i32
    return %c0_i32, %c0_i32_0 : i32, i32
  }
  func.func @transform_7(%arg0: i32) -> (i32, i32) {
    %c0_i32 = arith.constant 0 : i32
    %c0_i32_0 = arith.constant 0 : i32
    %c0_i32_1 = arith.constant 0 : i32
    return %c0_i32, %c0_i32_0 : i32, i32
  }
  func.func @transform_8(%arg0: i32) -> (i32, i32) {
    %c0_i32 = arith.constant 0 : i32
    %c0_i32_0 = arith.constant 0 : i32
    %c0_i32_1 = arith.constant 0 : i32
    return %c0_i32, %c0_i32_0 : i32, i32
  }
  func.func @transform_9(%arg0: i32) -> (i32, i32) {
    %c0_i32 = arith.constant 0 : i32
    %c0_i32_0 = arith.constant 0 : i32
    %c0_i32_1 = arith.constant 0 : i32
    return %c0_i32, %c0_i32_0 : i32, i32
  }
  func.func @transform_10(%arg0: i32) -> (i32, i32) {
    %c0_i32 = arith.constant 0 : i32
    %c0_i32_0 = arith.constant 0 : i32
    %c0_i32_1 = arith.constant 0 : i32
    return %c0_i32, %c0_i32_0 : i32, i32
  }
  func.func @transform_11(%arg0: i32) -> (i32, i32) {
    %c0_i32 = arith.constant 0 : i32
    %c0_i32_0 = arith.constant 0 : i32
    %c0_i32_1 = arith.constant 0 : i32
    return %c0_i32, %c0_i32_0 : i32, i32
  }
  func.func @transform_12(%arg0: i32) -> (i32, i32) {
    %c0_i32 = arith.constant 0 : i32
    %c0_i32_0 = arith.constant 0 : i32
    %c0_i32_1 = arith.constant 0 : i32
    return %c0_i32, %c0_i32_0 : i32, i32
  }
  func.func @transform_13(%arg0: i32) -> (i32, i32) {
    %c0_i32 = arith.constant 0 : i32
    %c0_i32_0 = arith.constant 0 : i32
    %c0_i32_1 = arith.constant 0 : i32
    return %c0_i32, %c0_i32_0 : i32, i32
  }
  func.func @transform_14(%arg0: i32) -> (i32, i32) {
    %c0_i32 = arith.constant 0 : i32
    %c0_i32_0 = arith.constant 0 : i32
    %c0_i32_1 = arith.constant 0 : i32
    return %c0_i32, %c0_i32_0 : i32, i32
  }
  func.func @transform_15(%arg0: i32) -> (i32, i32) {
    %c0_i32 = arith.constant 0 : i32
    %c0_i32_0 = arith.constant 0 : i32
    %c0_i32_1 = arith.constant 0 : i32
    return %c0_i32, %c0_i32_0 : i32, i32
  }
  func.func @transform_16(%arg0: i32) -> (i32, i32) {
    %c0_i32 = arith.constant 0 : i32
    %c0_i32_0 = arith.constant 0 : i32
    %c0_i32_1 = arith.constant 0 : i32
    return %c0_i32, %c0_i32_0 : i32, i32
  }
  func.func @transform_17(%arg0: i32) -> (i32, i32) {
    %c0_i32 = arith.constant 0 : i32
    %c0_i32_0 = arith.constant 0 : i32
    %c0_i32_1 = arith.constant 0 : i32
    return %c0_i32, %c0_i32_0 : i32, i32
  }
  func.func @transform_18(%arg0: i32) -> (i32, i32, i32) {
    %c0_i32 = arith.constant 0 : i32
    %c0_i32_0 = arith.constant 0 : i32
    %c0_i32_1 = arith.constant 0 : i32
    return %arg0, %c0_i32, %c0_i32_0 : i32, i32, i32
  }
}

module attributes {stable_mosaic.version = 11 : i64} {
  func.func @_attn_pair_kernel(%arg0: i32, %arg1: memref<1x8x32xf32, #tpu.memory_space<vmem>>, %arg2: memref<1x8x32xf32, #tpu.memory_space<vmem>>, %arg3: memref<1x8x8xf32, #tpu.memory_space<vmem>>, %arg4: memref<1x1x8xf32, #tpu.memory_space<vmem>>, %arg5: memref<1x32xf32, #tpu.memory_space<vmem>>, %arg6: memref<1x32xf32, #tpu.memory_space<vmem>>, %arg7: memref<32x96xbf16, #tpu.memory_space<vmem>>, %arg8: memref<1x96xf32, #tpu.memory_space<vmem>>, %arg9: memref<32x32xbf16, #tpu.memory_space<vmem>>, %arg10: memref<1x32xf32, #tpu.memory_space<vmem>>, %arg11: memref<1x32xf32, #tpu.memory_space<vmem>>, %arg12: memref<1x32xf32, #tpu.memory_space<vmem>>, %arg13: memref<32x32xbf16, #tpu.memory_space<vmem>>, %arg14: memref<1x32xf32, #tpu.memory_space<vmem>>, %arg15: memref<32x64xbf16, #tpu.memory_space<vmem>>, %arg16: memref<1x64xf32, #tpu.memory_space<vmem>>, %arg17: memref<32x32xbf16, #tpu.memory_space<vmem>>, %arg18: memref<1x32xf32, #tpu.memory_space<vmem>>, %arg19: memref<1x8x32xf32, #tpu.memory_space<vmem>>) attributes {dimension_semantics = [#tpu.dimension_semantics<parallel>], iteration_bounds = array<i64: 2>, scalar_prefetch = 0 : i64, scratch_operands = 0 : i64, tpu.core_type = #tpu.core_type<tc>, window_params = [{transform_indices = @transform_0, window_bounds = array<i64: 1, 8, 32>}, {transform_indices = @transform_1, window_bounds = array<i64: 1, 8, 32>}, {transform_indices = @transform_2, window_bounds = array<i64: 1, 8, 8>}, {transform_indices = @transform_3, window_bounds = array<i64: 1, 1, 8>}, {pipeline_mode = #tpu.pipeline_mode<synchronous>, transform_indices = @transform_4, window_bounds = array<i64: 1, 32>}, {pipeline_mode = #tpu.pipeline_mode<synchronous>, transform_indices = @transform_5, window_bounds = array<i64: 1, 32>}, {pipeline_mode = #tpu.pipeline_mode<synchronous>, transform_indices = @transform_6, window_bounds = array<i64: 32, 96>}, {pipeline_mode = #tpu.pipeline_mode<synchronous>, transform_indices = @transform_7, window_bounds = array<i64: 1, 96>}, {pipeline_mode = #tpu.pipeline_mode<synchronous>, transform_indices = @transform_8, window_bounds = array<i64: 32, 32>}, {pipeline_mode = #tpu.pipeline_mode<synchronous>, transform_indices = @transform_9, window_bounds = array<i64: 1, 32>}, {pipeline_mode = #tpu.pipeline_mode<synchronous>, transform_indices = @transform_10, window_bounds = array<i64: 1, 32>}, {pipeline_mode = #tpu.pipeline_mode<synchronous>, transform_indices = @transform_11, window_bounds = array<i64: 1, 32>}, {pipeline_mode = #tpu.pipeline_mode<synchronous>, transform_indices = @transform_12, window_bounds = array<i64: 32, 32>}, {pipeline_mode = #tpu.pipeline_mode<synchronous>, transform_indices = @transform_13, window_bounds = array<i64: 1, 32>}, {pipeline_mode = #tpu.pipeline_mode<synchronous>, transform_indices = @transform_14, window_bounds = array<i64: 32, 64>}, {pipeline_mode = #tpu.pipeline_mode<synchronous>, transform_indices = @transform_15, window_bounds = array<i64: 1, 64>}, {pipeline_mode = #tpu.pipeline_mode<synchronous>, transform_indices = @transform_16, window_bounds = array<i64: 32, 32>}, {pipeline_mode = #tpu.pipeline_mode<synchronous>, transform_indices = @transform_17, window_bounds = array<i64: 1, 32>}, {transform_indices = @transform_18, window_bounds = array<i64: 1, 8, 32>}]} {
    %c0 = arith.constant 0 : index
    %c0_0 = arith.constant 0 : index
    %c0_1 = arith.constant 0 : index
    %0 = vector.load %arg1[%c0, %c0_0, %c0_1] : memref<1x8x32xf32, #tpu.memory_space<vmem>>, vector<1x8x32xf32>
    %1 = vector.shape_cast %0 : vector<1x8x32xf32> to vector<8x32xf32>
    %c0_2 = arith.constant 0 : index
    %c0_3 = arith.constant 0 : index
    %c0_4 = arith.constant 0 : index
    %2 = vector.load %arg2[%c0_2, %c0_3, %c0_4] : memref<1x8x32xf32, #tpu.memory_space<vmem>>, vector<1x8x32xf32>
    %3 = vector.shape_cast %2 : vector<1x8x32xf32> to vector<8x32xf32>
    %c0_5 = arith.constant 0 : index
    %c0_6 = arith.constant 0 : index
    %c0_7 = arith.constant 0 : index
    %4 = vector.load %arg3[%c0_5, %c0_6, %c0_7] : memref<1x8x8xf32, #tpu.memory_space<vmem>>, vector<1x8x8xf32>
    %5 = vector.shape_cast %4 : vector<1x8x8xf32> to vector<8x8xf32>
    %cst = arith.constant 0.000000e+00 : f32
    %6 = vector.broadcast %cst : f32 to vector<8x8xf32>
    %7 = arith.cmpf oeq, %5, %6 : vector<8x8xf32>
    %cst_8 = arith.constant -1.000000e+09 : f32
    %cst_9 = arith.constant 0.000000e+00 : f32
    %8 = vector.broadcast %cst_8 : f32 to vector<8x8xf32>
    %9 = vector.broadcast %cst_9 : f32 to vector<8x8xf32>
    %10 = arith.select %7, %8, %9 : vector<8x8xi1>, vector<8x8xf32>
    %c0_10 = arith.constant 0 : index
    %c0_11 = arith.constant 0 : index
    %c0_12 = arith.constant 0 : index
    %11 = vector.load %arg4[%c0_10, %c0_11, %c0_12] : memref<1x1x8xf32, #tpu.memory_space<vmem>>, vector<1x1x8xf32>
    %12 = vector.shape_cast %11 : vector<1x1x8xf32> to vector<1x8xf32>
    %cst_13 = arith.constant 0.000000e+00 : f32
    %13 = vector.broadcast %cst_13 : f32 to vector<1x8xf32>
    %14 = arith.cmpf oeq, %12, %13 : vector<1x8xf32>
    %cst_14 = arith.constant -1.000000e+09 : f32
    %cst_15 = arith.constant 0.000000e+00 : f32
    %15 = vector.broadcast %cst_14 : f32 to vector<1x8xf32>
    %16 = vector.broadcast %cst_15 : f32 to vector<1x8xf32>
    %17 = arith.select %14, %15, %16 : vector<1x8xi1>, vector<1x8xf32>
    %c0_16 = arith.constant 0 : index
    %c0_17 = arith.constant 0 : index
    %18 = vector.load %arg5[%c0_16, %c0_17] : memref<1x32xf32, #tpu.memory_space<vmem>>, vector<1x32xf32>
    %c0_18 = arith.constant 0 : index
    %c0_19 = arith.constant 0 : index
    %19 = vector.load %arg6[%c0_18, %c0_19] : memref<1x32xf32, #tpu.memory_space<vmem>>, vector<1x32xf32>
    %cst_20 = arith.constant dense<0.000000e+00> : vector<8xf32>
    %20 = vector.multi_reduction <add>, %1, %cst_20 [1] : vector<8x32xf32> to vector<8xf32>
    %21 = vector.shape_cast %20 : vector<8xf32> to vector<8x1xf32>
    %cst_21 = arith.constant 3.200000e+01 : f32
    %22 = vector.broadcast %cst_21 : f32 to vector<8x1xf32>
    %23 = arith.divf %21, %22 : vector<8x1xf32>
    %24 = vector.broadcast %23 : vector<8x1xf32> to vector<8x32xf32>
    %25 = arith.subf %1, %24 : vector<8x32xf32>
    %26 = arith.mulf %25, %25 : vector<8x32xf32>
    %cst_22 = arith.constant dense<0.000000e+00> : vector<8xf32>
    %27 = vector.multi_reduction <add>, %26, %cst_22 [1] : vector<8x32xf32> to vector<8xf32>
    %28 = vector.shape_cast %27 : vector<8xf32> to vector<8x1xf32>
    %cst_23 = arith.constant 0.0322580636 : f32
    %29 = vector.broadcast %cst_23 : f32 to vector<8x1xf32>
    %30 = arith.mulf %28, %29 : vector<8x1xf32>
    %31 = vector.broadcast %18 : vector<1x32xf32> to vector<8x32xf32>
    %32 = arith.mulf %31, %25 : vector<8x32xf32>
    %33 = math.sqrt %30 : vector<8x1xf32>
    %cst_24 = arith.constant 9.99999997E-7 : f32
    %34 = vector.broadcast %cst_24 : f32 to vector<8x1xf32>
    %35 = arith.addf %33, %34 : vector<8x1xf32>
    %36 = vector.broadcast %35 : vector<8x1xf32> to vector<8x32xf32>
    %37 = arith.divf %32, %36 : vector<8x32xf32>
    %38 = vector.broadcast %19 : vector<1x32xf32> to vector<8x32xf32>
    %39 = arith.addf %37, %38 : vector<8x32xf32>
    %c0_25 = arith.constant 0 : index
    %c0_26 = arith.constant 0 : index
    %40 = vector.load %arg7[%c0_25, %c0_26] : memref<32x96xbf16, #tpu.memory_space<vmem>>, vector<32x96xbf16>
    %41 = arith.truncf %39 : vector<8x32xf32> to vector<8x32xbf16>
    %cst_27 = arith.constant dense<0.000000e+00> : vector<8x96xf32>
    %42 = tpu.matmul %41, %40, %cst_27 {dimension_numbers = #tpu.dot_dimension_numbers<[1], [0], [0], [1], [0, 0, 1, 1], [], []>} : vector<8x32xbf16>, vector<32x96xbf16>, vector<8x96xf32> -> vector<8x96xf32>
    %c0_28 = arith.constant 0 : index
    %c0_29 = arith.constant 0 : index
    %43 = vector.load %arg8[%c0_28, %c0_29] : memref<1x96xf32, #tpu.memory_space<vmem>>, vector<1x96xf32>
    %44 = vector.broadcast %43 : vector<1x96xf32> to vector<8x96xf32>
    %45 = arith.addf %42, %44 : vector<8x96xf32>
    %46 = vector.extract_strided_slice %45 {offsets = [0, 0], sizes = [8, 32], strides = [1, 1]} : vector<8x96xf32> to vector<8x32xf32>
    %47 = vector.extract_strided_slice %45 {offsets = [0, 32], sizes = [8, 32], strides = [1, 1]} : vector<8x96xf32> to vector<8x32xf32>
    %48 = vector.extract_strided_slice %45 {offsets = [0, 64], sizes = [8, 32], strides = [1, 1]} : vector<8x96xf32> to vector<8x32xf32>
    %49 = vector.extract_strided_slice %46 {offsets = [0, 0], sizes = [8, 8], strides = [1, 1]} : vector<8x32xf32> to vector<8x8xf32>
    %50 = vector.extract_strided_slice %47 {offsets = [0, 0], sizes = [8, 8], strides = [1, 1]} : vector<8x32xf32> to vector<8x8xf32>
    %51 = vector.extract_strided_slice %48 {offsets = [0, 0], sizes = [8, 8], strides = [1, 1]} : vector<8x32xf32> to vector<8x8xf32>
    %52 = arith.truncf %49 : vector<8x8xf32> to vector<8x8xbf16>
    %53 = arith.truncf %50 : vector<8x8xf32> to vector<8x8xbf16>
    %cst_30 = arith.constant dense<0.000000e+00> : vector<8x8xf32>
    %54 = tpu.matmul %52, %53, %cst_30 {dimension_numbers = #tpu.dot_dimension_numbers<[1], [1], [0], [0], [0, 0, 1, 0], [], []>} : vector<8x8xbf16>, vector<8x8xbf16>, vector<8x8xf32> -> vector<8x8xf32>
    %55 = arith.addf %54, %10 : vector<8x8xf32>
    %cst_31 = arith.constant dense<0xFF800000> : vector<8xf32>
    %56 = vector.multi_reduction <maximumf>, %55, %cst_31 [1] : vector<8x8xf32> to vector<8xf32>
    %57 = vector.shape_cast %56 : vector<8xf32> to vector<8x1xf32>
    %58 = vector.broadcast %57 : vector<8x1xf32> to vector<8x8xf32>
    %59 = arith.subf %55, %58 : vector<8x8xf32>
    %60 = math.exp %59 : vector<8x8xf32>
    %cst_32 = arith.constant dense<0.000000e+00> : vector<8xf32>
    %61 = vector.multi_reduction <add>, %60, %cst_32 [1] : vector<8x8xf32> to vector<8xf32>
    %62 = vector.shape_cast %61 : vector<8xf32> to vector<8x1xf32>
    %63 = vector.broadcast %62 : vector<8x1xf32> to vector<8x8xf32>
    %64 = arith.divf %60, %63 : vector<8x8xf32>
    %65 = arith.truncf %64 : vector<8x8xf32> to vector<8x8xbf16>
    %66 = arith.truncf %51 : vector<8x8xf32> to vector<8x8xbf16>
    %cst_33 = arith.constant dense<0.000000e+00> : vector<8x8xf32>
    %67 = tpu.matmul %65, %66, %cst_33 {dimension_numbers = #tpu.dot_dimension_numbers<[1], [0], [0], [1], [0, 0, 1, 1], [], []>} : vector<8x8xbf16>, vector<8x8xbf16>, vector<8x8xf32> -> vector<8x8xf32>
    %68 = vector.extract_strided_slice %46 {offsets = [0, 8], sizes = [8, 8], strides = [1, 1]} : vector<8x32xf32> to vector<8x8xf32>
    %69 = vector.extract_strided_slice %47 {offsets = [0, 8], sizes = [8, 8], strides = [1, 1]} : vector<8x32xf32> to vector<8x8xf32>
    %70 = vector.extract_strided_slice %48 {offsets = [0, 8], sizes = [8, 8], strides = [1, 1]} : vector<8x32xf32> to vector<8x8xf32>
    %71 = arith.truncf %68 : vector<8x8xf32> to vector<8x8xbf16>
    %72 = arith.truncf %69 : vector<8x8xf32> to vector<8x8xbf16>
    %cst_34 = arith.constant dense<0.000000e+00> : vector<8x8xf32>
    %73 = tpu.matmul %71, %72, %cst_34 {dimension_numbers = #tpu.dot_dimension_numbers<[1], [1], [0], [0], [0, 0, 1, 0], [], []>} : vector<8x8xbf16>, vector<8x8xbf16>, vector<8x8xf32> -> vector<8x8xf32>
    %74 = arith.addf %73, %10 : vector<8x8xf32>
    %cst_35 = arith.constant dense<0xFF800000> : vector<8xf32>
    %75 = vector.multi_reduction <maximumf>, %74, %cst_35 [1] : vector<8x8xf32> to vector<8xf32>
    %76 = vector.shape_cast %75 : vector<8xf32> to vector<8x1xf32>
    %77 = vector.broadcast %76 : vector<8x1xf32> to vector<8x8xf32>
    %78 = arith.subf %74, %77 : vector<8x8xf32>
    %79 = math.exp %78 : vector<8x8xf32>
    %cst_36 = arith.constant dense<0.000000e+00> : vector<8xf32>
    %80 = vector.multi_reduction <add>, %79, %cst_36 [1] : vector<8x8xf32> to vector<8xf32>
    %81 = vector.shape_cast %80 : vector<8xf32> to vector<8x1xf32>
    %82 = vector.broadcast %81 : vector<8x1xf32> to vector<8x8xf32>
    %83 = arith.divf %79, %82 : vector<8x8xf32>
    %84 = arith.truncf %83 : vector<8x8xf32> to vector<8x8xbf16>
    %85 = arith.truncf %70 : vector<8x8xf32> to vector<8x8xbf16>
    %cst_37 = arith.constant dense<0.000000e+00> : vector<8x8xf32>
    %86 = tpu.matmul %84, %85, %cst_37 {dimension_numbers = #tpu.dot_dimension_numbers<[1], [0], [0], [1], [0, 0, 1, 1], [], []>} : vector<8x8xbf16>, vector<8x8xbf16>, vector<8x8xf32> -> vector<8x8xf32>
    %87 = vector.extract_strided_slice %46 {offsets = [0, 16], sizes = [8, 8], strides = [1, 1]} : vector<8x32xf32> to vector<8x8xf32>
    %88 = vector.extract_strided_slice %47 {offsets = [0, 16], sizes = [8, 8], strides = [1, 1]} : vector<8x32xf32> to vector<8x8xf32>
    %89 = vector.extract_strided_slice %48 {offsets = [0, 16], sizes = [8, 8], strides = [1, 1]} : vector<8x32xf32> to vector<8x8xf32>
    %90 = arith.truncf %87 : vector<8x8xf32> to vector<8x8xbf16>
    %91 = arith.truncf %88 : vector<8x8xf32> to vector<8x8xbf16>
    %cst_38 = arith.constant dense<0.000000e+00> : vector<8x8xf32>
    %92 = tpu.matmul %90, %91, %cst_38 {dimension_numbers = #tpu.dot_dimension_numbers<[1], [1], [0], [0], [0, 0, 1, 0], [], []>} : vector<8x8xbf16>, vector<8x8xbf16>, vector<8x8xf32> -> vector<8x8xf32>
    %93 = arith.addf %92, %10 : vector<8x8xf32>
    %cst_39 = arith.constant dense<0xFF800000> : vector<8xf32>
    %94 = vector.multi_reduction <maximumf>, %93, %cst_39 [1] : vector<8x8xf32> to vector<8xf32>
    %95 = vector.shape_cast %94 : vector<8xf32> to vector<8x1xf32>
    %96 = vector.broadcast %95 : vector<8x1xf32> to vector<8x8xf32>
    %97 = arith.subf %93, %96 : vector<8x8xf32>
    %98 = math.exp %97 : vector<8x8xf32>
    %cst_40 = arith.constant dense<0.000000e+00> : vector<8xf32>
    %99 = vector.multi_reduction <add>, %98, %cst_40 [1] : vector<8x8xf32> to vector<8xf32>
    %100 = vector.shape_cast %99 : vector<8xf32> to vector<8x1xf32>
    %101 = vector.broadcast %100 : vector<8x1xf32> to vector<8x8xf32>
    %102 = arith.divf %98, %101 : vector<8x8xf32>
    %103 = arith.truncf %102 : vector<8x8xf32> to vector<8x8xbf16>
    %104 = arith.truncf %89 : vector<8x8xf32> to vector<8x8xbf16>
    %cst_41 = arith.constant dense<0.000000e+00> : vector<8x8xf32>
    %105 = tpu.matmul %103, %104, %cst_41 {dimension_numbers = #tpu.dot_dimension_numbers<[1], [0], [0], [1], [0, 0, 1, 1], [], []>} : vector<8x8xbf16>, vector<8x8xbf16>, vector<8x8xf32> -> vector<8x8xf32>
    %106 = vector.extract_strided_slice %46 {offsets = [0, 24], sizes = [8, 8], strides = [1, 1]} : vector<8x32xf32> to vector<8x8xf32>
    %107 = vector.extract_strided_slice %47 {offsets = [0, 24], sizes = [8, 8], strides = [1, 1]} : vector<8x32xf32> to vector<8x8xf32>
    %108 = vector.extract_strided_slice %48 {offsets = [0, 24], sizes = [8, 8], strides = [1, 1]} : vector<8x32xf32> to vector<8x8xf32>
    %109 = arith.truncf %106 : vector<8x8xf32> to vector<8x8xbf16>
    %110 = arith.truncf %107 : vector<8x8xf32> to vector<8x8xbf16>
    %cst_42 = arith.constant dense<0.000000e+00> : vector<8x8xf32>
    %111 = tpu.matmul %109, %110, %cst_42 {dimension_numbers = #tpu.dot_dimension_numbers<[1], [1], [0], [0], [0, 0, 1, 0], [], []>} : vector<8x8xbf16>, vector<8x8xbf16>, vector<8x8xf32> -> vector<8x8xf32>
    %112 = arith.addf %111, %10 : vector<8x8xf32>
    %cst_43 = arith.constant dense<0xFF800000> : vector<8xf32>
    %113 = vector.multi_reduction <maximumf>, %112, %cst_43 [1] : vector<8x8xf32> to vector<8xf32>
    %114 = vector.shape_cast %113 : vector<8xf32> to vector<8x1xf32>
    %115 = vector.broadcast %114 : vector<8x1xf32> to vector<8x8xf32>
    %116 = arith.subf %112, %115 : vector<8x8xf32>
    %117 = math.exp %116 : vector<8x8xf32>
    %cst_44 = arith.constant dense<0.000000e+00> : vector<8xf32>
    %118 = vector.multi_reduction <add>, %117, %cst_44 [1] : vector<8x8xf32> to vector<8xf32>
    %119 = vector.shape_cast %118 : vector<8xf32> to vector<8x1xf32>
    %120 = vector.broadcast %119 : vector<8x1xf32> to vector<8x8xf32>
    %121 = arith.divf %117, %120 : vector<8x8xf32>
    %122 = arith.truncf %121 : vector<8x8xf32> to vector<8x8xbf16>
    %123 = arith.truncf %108 : vector<8x8xf32> to vector<8x8xbf16>
    %cst_45 = arith.constant dense<0.000000e+00> : vector<8x8xf32>
    %124 = tpu.matmul %122, %123, %cst_45 {dimension_numbers = #tpu.dot_dimension_numbers<[1], [0], [0], [1], [0, 0, 1, 1], [], []>} : vector<8x8xbf16>, vector<8x8xbf16>, vector<8x8xf32> -> vector<8x8xf32>
    %125 = tpu.concatenate %67, %86, %105, %124 in 1 : vector<8x8xf32>, vector<8x8xf32>, vector<8x8xf32>, vector<8x8xf32> -> vector<8x32xf32>
    %c0_46 = arith.constant 0 : index
    %c0_47 = arith.constant 0 : index
    %126 = vector.load %arg9[%c0_46, %c0_47] : memref<32x32xbf16, #tpu.memory_space<vmem>>, vector<32x32xbf16>
    %127 = arith.truncf %125 : vector<8x32xf32> to vector<8x32xbf16>
    %cst_48 = arith.constant dense<0.000000e+00> : vector<8x32xf32>
    %128 = tpu.matmul %127, %126, %cst_48 {dimension_numbers = #tpu.dot_dimension_numbers<[1], [0], [0], [1], [0, 0, 1, 1], [], []>} : vector<8x32xbf16>, vector<32x32xbf16>, vector<8x32xf32> -> vector<8x32xf32>
    %129 = arith.addf %1, %128 : vector<8x32xf32>
    %c0_49 = arith.constant 0 : index
    %c0_50 = arith.constant 0 : index
    %130 = vector.load %arg10[%c0_49, %c0_50] : memref<1x32xf32, #tpu.memory_space<vmem>>, vector<1x32xf32>
    %131 = vector.broadcast %130 : vector<1x32xf32> to vector<8x32xf32>
    %132 = arith.addf %129, %131 : vector<8x32xf32>
    %c0_51 = arith.constant 0 : index
    %c0_52 = arith.constant 0 : index
    %133 = vector.load %arg11[%c0_51, %c0_52] : memref<1x32xf32, #tpu.memory_space<vmem>>, vector<1x32xf32>
    %c0_53 = arith.constant 0 : index
    %c0_54 = arith.constant 0 : index
    %134 = vector.load %arg12[%c0_53, %c0_54] : memref<1x32xf32, #tpu.memory_space<vmem>>, vector<1x32xf32>
    %cst_55 = arith.constant dense<0.000000e+00> : vector<8xf32>
    %135 = vector.multi_reduction <add>, %132, %cst_55 [1] : vector<8x32xf32> to vector<8xf32>
    %136 = vector.shape_cast %135 : vector<8xf32> to vector<8x1xf32>
    %cst_56 = arith.constant 3.200000e+01 : f32
    %137 = vector.broadcast %cst_56 : f32 to vector<8x1xf32>
    %138 = arith.divf %136, %137 : vector<8x1xf32>
    %139 = vector.broadcast %138 : vector<8x1xf32> to vector<8x32xf32>
    %140 = arith.subf %132, %139 : vector<8x32xf32>
    %141 = arith.mulf %140, %140 : vector<8x32xf32>
    %cst_57 = arith.constant dense<0.000000e+00> : vector<8xf32>
    %142 = vector.multi_reduction <add>, %141, %cst_57 [1] : vector<8x32xf32> to vector<8xf32>
    %143 = vector.shape_cast %142 : vector<8xf32> to vector<8x1xf32>
    %cst_58 = arith.constant 0.0322580636 : f32
    %144 = vector.broadcast %cst_58 : f32 to vector<8x1xf32>
    %145 = arith.mulf %143, %144 : vector<8x1xf32>
    %146 = vector.broadcast %133 : vector<1x32xf32> to vector<8x32xf32>
    %147 = arith.mulf %146, %140 : vector<8x32xf32>
    %148 = math.sqrt %145 : vector<8x1xf32>
    %cst_59 = arith.constant 9.99999997E-7 : f32
    %149 = vector.broadcast %cst_59 : f32 to vector<8x1xf32>
    %150 = arith.addf %148, %149 : vector<8x1xf32>
    %151 = vector.broadcast %150 : vector<8x1xf32> to vector<8x32xf32>
    %152 = arith.divf %147, %151 : vector<8x32xf32>
    %153 = vector.broadcast %134 : vector<1x32xf32> to vector<8x32xf32>
    %154 = arith.addf %152, %153 : vector<8x32xf32>
    %c0_60 = arith.constant 0 : index
    %c0_61 = arith.constant 0 : index
    %155 = vector.load %arg13[%c0_60, %c0_61] : memref<32x32xbf16, #tpu.memory_space<vmem>>, vector<32x32xbf16>
    %156 = arith.truncf %154 : vector<8x32xf32> to vector<8x32xbf16>
    %cst_62 = arith.constant dense<0.000000e+00> : vector<8x32xf32>
    %157 = tpu.matmul %156, %155, %cst_62 {dimension_numbers = #tpu.dot_dimension_numbers<[1], [0], [0], [1], [0, 0, 1, 1], [], []>} : vector<8x32xbf16>, vector<32x32xbf16>, vector<8x32xf32> -> vector<8x32xf32>
    %c0_63 = arith.constant 0 : index
    %c0_64 = arith.constant 0 : index
    %158 = vector.load %arg14[%c0_63, %c0_64] : memref<1x32xf32, #tpu.memory_space<vmem>>, vector<1x32xf32>
    %159 = vector.broadcast %158 : vector<1x32xf32> to vector<8x32xf32>
    %160 = arith.addf %157, %159 : vector<8x32xf32>
    %c0_65 = arith.constant 0 : index
    %c0_66 = arith.constant 0 : index
    %161 = vector.load %arg15[%c0_65, %c0_66] : memref<32x64xbf16, #tpu.memory_space<vmem>>, vector<32x64xbf16>
    %162 = arith.truncf %3 : vector<8x32xf32> to vector<8x32xbf16>
    %cst_67 = arith.constant dense<0.000000e+00> : vector<8x64xf32>
    %163 = tpu.matmul %162, %161, %cst_67 {dimension_numbers = #tpu.dot_dimension_numbers<[1], [0], [0], [1], [0, 0, 1, 1], [], []>} : vector<8x32xbf16>, vector<32x64xbf16>, vector<8x64xf32> -> vector<8x64xf32>
    %c0_68 = arith.constant 0 : index
    %c0_69 = arith.constant 0 : index
    %164 = vector.load %arg16[%c0_68, %c0_69] : memref<1x64xf32, #tpu.memory_space<vmem>>, vector<1x64xf32>
    %165 = vector.broadcast %164 : vector<1x64xf32> to vector<8x64xf32>
    %166 = arith.addf %163, %165 : vector<8x64xf32>
    %167 = vector.extract_strided_slice %166 {offsets = [0, 0], sizes = [8, 32], strides = [1, 1]} : vector<8x64xf32> to vector<8x32xf32>
    %168 = vector.extract_strided_slice %166 {offsets = [0, 32], sizes = [8, 32], strides = [1, 1]} : vector<8x64xf32> to vector<8x32xf32>
    %169 = vector.extract_strided_slice %160 {offsets = [0, 0], sizes = [8, 8], strides = [1, 1]} : vector<8x32xf32> to vector<8x8xf32>
    %170 = vector.extract_strided_slice %167 {offsets = [0, 0], sizes = [8, 8], strides = [1, 1]} : vector<8x32xf32> to vector<8x8xf32>
    %171 = vector.extract_strided_slice %168 {offsets = [0, 0], sizes = [8, 8], strides = [1, 1]} : vector<8x32xf32> to vector<8x8xf32>
    %172 = arith.truncf %169 : vector<8x8xf32> to vector<8x8xbf16>
    %173 = arith.truncf %170 : vector<8x8xf32> to vector<8x8xbf16>
    %cst_70 = arith.constant dense<0.000000e+00> : vector<8x8xf32>
    %174 = tpu.matmul %172, %173, %cst_70 {dimension_numbers = #tpu.dot_dimension_numbers<[1], [1], [0], [0], [0, 0, 1, 0], [], []>} : vector<8x8xbf16>, vector<8x8xbf16>, vector<8x8xf32> -> vector<8x8xf32>
    %175 = vector.broadcast %17 : vector<1x8xf32> to vector<8x8xf32>
    %176 = arith.addf %174, %175 : vector<8x8xf32>
    %cst_71 = arith.constant dense<0xFF800000> : vector<8xf32>
    %177 = vector.multi_reduction <maximumf>, %176, %cst_71 [1] : vector<8x8xf32> to vector<8xf32>
    %178 = vector.shape_cast %177 : vector<8xf32> to vector<8x1xf32>
    %179 = vector.broadcast %178 : vector<8x1xf32> to vector<8x8xf32>
    %180 = arith.subf %176, %179 : vector<8x8xf32>
    %181 = math.exp %180 : vector<8x8xf32>
    %cst_72 = arith.constant dense<0.000000e+00> : vector<8xf32>
    %182 = vector.multi_reduction <add>, %181, %cst_72 [1] : vector<8x8xf32> to vector<8xf32>
    %183 = vector.shape_cast %182 : vector<8xf32> to vector<8x1xf32>
    %184 = vector.broadcast %183 : vector<8x1xf32> to vector<8x8xf32>
    %185 = arith.divf %181, %184 : vector<8x8xf32>
    %186 = arith.truncf %185 : vector<8x8xf32> to vector<8x8xbf16>
    %187 = arith.truncf %171 : vector<8x8xf32> to vector<8x8xbf16>
    %cst_73 = arith.constant dense<0.000000e+00> : vector<8x8xf32>
    %188 = tpu.matmul %186, %187, %cst_73 {dimension_numbers = #tpu.dot_dimension_numbers<[1], [0], [0], [1], [0, 0, 1, 1], [], []>} : vector<8x8xbf16>, vector<8x8xbf16>, vector<8x8xf32> -> vector<8x8xf32>
    %189 = vector.extract_strided_slice %160 {offsets = [0, 8], sizes = [8, 8], strides = [1, 1]} : vector<8x32xf32> to vector<8x8xf32>
    %190 = vector.extract_strided_slice %167 {offsets = [0, 8], sizes = [8, 8], strides = [1, 1]} : vector<8x32xf32> to vector<8x8xf32>
    %191 = vector.extract_strided_slice %168 {offsets = [0, 8], sizes = [8, 8], strides = [1, 1]} : vector<8x32xf32> to vector<8x8xf32>
    %192 = arith.truncf %189 : vector<8x8xf32> to vector<8x8xbf16>
    %193 = arith.truncf %190 : vector<8x8xf32> to vector<8x8xbf16>
    %cst_74 = arith.constant dense<0.000000e+00> : vector<8x8xf32>
    %194 = tpu.matmul %192, %193, %cst_74 {dimension_numbers = #tpu.dot_dimension_numbers<[1], [1], [0], [0], [0, 0, 1, 0], [], []>} : vector<8x8xbf16>, vector<8x8xbf16>, vector<8x8xf32> -> vector<8x8xf32>
    %195 = vector.broadcast %17 : vector<1x8xf32> to vector<8x8xf32>
    %196 = arith.addf %194, %195 : vector<8x8xf32>
    %cst_75 = arith.constant dense<0xFF800000> : vector<8xf32>
    %197 = vector.multi_reduction <maximumf>, %196, %cst_75 [1] : vector<8x8xf32> to vector<8xf32>
    %198 = vector.shape_cast %197 : vector<8xf32> to vector<8x1xf32>
    %199 = vector.broadcast %198 : vector<8x1xf32> to vector<8x8xf32>
    %200 = arith.subf %196, %199 : vector<8x8xf32>
    %201 = math.exp %200 : vector<8x8xf32>
    %cst_76 = arith.constant dense<0.000000e+00> : vector<8xf32>
    %202 = vector.multi_reduction <add>, %201, %cst_76 [1] : vector<8x8xf32> to vector<8xf32>
    %203 = vector.shape_cast %202 : vector<8xf32> to vector<8x1xf32>
    %204 = vector.broadcast %203 : vector<8x1xf32> to vector<8x8xf32>
    %205 = arith.divf %201, %204 : vector<8x8xf32>
    %206 = arith.truncf %205 : vector<8x8xf32> to vector<8x8xbf16>
    %207 = arith.truncf %191 : vector<8x8xf32> to vector<8x8xbf16>
    %cst_77 = arith.constant dense<0.000000e+00> : vector<8x8xf32>
    %208 = tpu.matmul %206, %207, %cst_77 {dimension_numbers = #tpu.dot_dimension_numbers<[1], [0], [0], [1], [0, 0, 1, 1], [], []>} : vector<8x8xbf16>, vector<8x8xbf16>, vector<8x8xf32> -> vector<8x8xf32>
    %209 = vector.extract_strided_slice %160 {offsets = [0, 16], sizes = [8, 8], strides = [1, 1]} : vector<8x32xf32> to vector<8x8xf32>
    %210 = vector.extract_strided_slice %167 {offsets = [0, 16], sizes = [8, 8], strides = [1, 1]} : vector<8x32xf32> to vector<8x8xf32>
    %211 = vector.extract_strided_slice %168 {offsets = [0, 16], sizes = [8, 8], strides = [1, 1]} : vector<8x32xf32> to vector<8x8xf32>
    %212 = arith.truncf %209 : vector<8x8xf32> to vector<8x8xbf16>
    %213 = arith.truncf %210 : vector<8x8xf32> to vector<8x8xbf16>
    %cst_78 = arith.constant dense<0.000000e+00> : vector<8x8xf32>
    %214 = tpu.matmul %212, %213, %cst_78 {dimension_numbers = #tpu.dot_dimension_numbers<[1], [1], [0], [0], [0, 0, 1, 0], [], []>} : vector<8x8xbf16>, vector<8x8xbf16>, vector<8x8xf32> -> vector<8x8xf32>
    %215 = vector.broadcast %17 : vector<1x8xf32> to vector<8x8xf32>
    %216 = arith.addf %214, %215 : vector<8x8xf32>
    %cst_79 = arith.constant dense<0xFF800000> : vector<8xf32>
    %217 = vector.multi_reduction <maximumf>, %216, %cst_79 [1] : vector<8x8xf32> to vector<8xf32>
    %218 = vector.shape_cast %217 : vector<8xf32> to vector<8x1xf32>
    %219 = vector.broadcast %218 : vector<8x1xf32> to vector<8x8xf32>
    %220 = arith.subf %216, %219 : vector<8x8xf32>
    %221 = math.exp %220 : vector<8x8xf32>
    %cst_80 = arith.constant dense<0.000000e+00> : vector<8xf32>
    %222 = vector.multi_reduction <add>, %221, %cst_80 [1] : vector<8x8xf32> to vector<8xf32>
    %223 = vector.shape_cast %222 : vector<8xf32> to vector<8x1xf32>
    %224 = vector.broadcast %223 : vector<8x1xf32> to vector<8x8xf32>
    %225 = arith.divf %221, %224 : vector<8x8xf32>
    %226 = arith.truncf %225 : vector<8x8xf32> to vector<8x8xbf16>
    %227 = arith.truncf %211 : vector<8x8xf32> to vector<8x8xbf16>
    %cst_81 = arith.constant dense<0.000000e+00> : vector<8x8xf32>
    %228 = tpu.matmul %226, %227, %cst_81 {dimension_numbers = #tpu.dot_dimension_numbers<[1], [0], [0], [1], [0, 0, 1, 1], [], []>} : vector<8x8xbf16>, vector<8x8xbf16>, vector<8x8xf32> -> vector<8x8xf32>
    %229 = vector.extract_strided_slice %160 {offsets = [0, 24], sizes = [8, 8], strides = [1, 1]} : vector<8x32xf32> to vector<8x8xf32>
    %230 = vector.extract_strided_slice %167 {offsets = [0, 24], sizes = [8, 8], strides = [1, 1]} : vector<8x32xf32> to vector<8x8xf32>
    %231 = vector.extract_strided_slice %168 {offsets = [0, 24], sizes = [8, 8], strides = [1, 1]} : vector<8x32xf32> to vector<8x8xf32>
    %232 = arith.truncf %229 : vector<8x8xf32> to vector<8x8xbf16>
    %233 = arith.truncf %230 : vector<8x8xf32> to vector<8x8xbf16>
    %cst_82 = arith.constant dense<0.000000e+00> : vector<8x8xf32>
    %234 = tpu.matmul %232, %233, %cst_82 {dimension_numbers = #tpu.dot_dimension_numbers<[1], [1], [0], [0], [0, 0, 1, 0], [], []>} : vector<8x8xbf16>, vector<8x8xbf16>, vector<8x8xf32> -> vector<8x8xf32>
    %235 = vector.broadcast %17 : vector<1x8xf32> to vector<8x8xf32>
    %236 = arith.addf %234, %235 : vector<8x8xf32>
    %cst_83 = arith.constant dense<0xFF800000> : vector<8xf32>
    %237 = vector.multi_reduction <maximumf>, %236, %cst_83 [1] : vector<8x8xf32> to vector<8xf32>
    %238 = vector.shape_cast %237 : vector<8xf32> to vector<8x1xf32>
    %239 = vector.broadcast %238 : vector<8x1xf32> to vector<8x8xf32>
    %240 = arith.subf %236, %239 : vector<8x8xf32>
    %241 = math.exp %240 : vector<8x8xf32>
    %cst_84 = arith.constant dense<0.000000e+00> : vector<8xf32>
    %242 = vector.multi_reduction <add>, %241, %cst_84 [1] : vector<8x8xf32> to vector<8xf32>
    %243 = vector.shape_cast %242 : vector<8xf32> to vector<8x1xf32>
    %244 = vector.broadcast %243 : vector<8x1xf32> to vector<8x8xf32>
    %245 = arith.divf %241, %244 : vector<8x8xf32>
    %246 = arith.truncf %245 : vector<8x8xf32> to vector<8x8xbf16>
    %247 = arith.truncf %231 : vector<8x8xf32> to vector<8x8xbf16>
    %cst_85 = arith.constant dense<0.000000e+00> : vector<8x8xf32>
    %248 = tpu.matmul %246, %247, %cst_85 {dimension_numbers = #tpu.dot_dimension_numbers<[1], [0], [0], [1], [0, 0, 1, 1], [], []>} : vector<8x8xbf16>, vector<8x8xbf16>, vector<8x8xf32> -> vector<8x8xf32>
    %249 = tpu.concatenate %188, %208, %228, %248 in 1 : vector<8x8xf32>, vector<8x8xf32>, vector<8x8xf32>, vector<8x8xf32> -> vector<8x32xf32>
    %c0_86 = arith.constant 0 : index
    %c0_87 = arith.constant 0 : index
    %250 = vector.load %arg17[%c0_86, %c0_87] : memref<32x32xbf16, #tpu.memory_space<vmem>>, vector<32x32xbf16>
    %251 = arith.truncf %249 : vector<8x32xf32> to vector<8x32xbf16>
    %cst_88 = arith.constant dense<0.000000e+00> : vector<8x32xf32>
    %252 = tpu.matmul %251, %250, %cst_88 {dimension_numbers = #tpu.dot_dimension_numbers<[1], [0], [0], [1], [0, 0, 1, 1], [], []>} : vector<8x32xbf16>, vector<32x32xbf16>, vector<8x32xf32> -> vector<8x32xf32>
    %253 = arith.addf %132, %252 : vector<8x32xf32>
    %c0_89 = arith.constant 0 : index
    %c0_90 = arith.constant 0 : index
    %254 = vector.load %arg18[%c0_89, %c0_90] : memref<1x32xf32, #tpu.memory_space<vmem>>, vector<1x32xf32>
    %255 = vector.broadcast %254 : vector<1x32xf32> to vector<8x32xf32>
    %256 = arith.addf %253, %255 : vector<8x32xf32>
    %c0_91 = arith.constant 0 : index
    %c0_92 = arith.constant 0 : index
    %c0_93 = arith.constant 0 : index
    %257 = vector.load %arg19[%c0_91, %c0_92, %c0_93] : memref<1x8x32xf32, #tpu.memory_space<vmem>>, vector<1x8x32xf32>
    %258 = vector.shape_cast %257 : vector<1x8x32xf32> to vector<8x32xf32>
    %259 = vector.shape_cast %256 : vector<8x32xf32> to vector<1x8x32xf32>
    tpu.vector_store %arg19[%c0_91, %c0_92, %c0_93], %259 {strides = array<i32>} : memref<1x8x32xf32, #tpu.memory_space<vmem>>, vector<1x8x32xf32>,
    return
  }
  func.func @transform_0(%arg0: i32) -> (i32, i32, i32) {
    %c0_i32 = arith.constant 0 : i32
    %c0_i32_0 = arith.constant 0 : i32
    %c0_i32_1 = arith.constant 0 : i32
    return %arg0, %c0_i32, %c0_i32_0 : i32, i32, i32
  }
  func.func @transform_1(%arg0: i32) -> (i32, i32, i32) {
    %c0_i32 = arith.constant 0 : i32
    %c0_i32_0 = arith.constant 0 : i32
    %c0_i32_1 = arith.constant 0 : i32
    return %arg0, %c0_i32, %c0_i32_0 : i32, i32, i32
  }
  func.func @transform_2(%arg0: i32) -> (i32, i32, i32) {
    %c0_i32 = arith.constant 0 : i32
    %c0_i32_0 = arith.constant 0 : i32
    %c0_i32_1 = arith.constant 0 : i32
    return %arg0, %c0_i32, %c0_i32_0 : i32, i32, i32
  }
  func.func @transform_3(%arg0: i32) -> (i32, i32, i32) {
    %c0_i32 = arith.constant 0 : i32
    %c0_i32_0 = arith.constant 0 : i32
    %c0_i32_1 = arith.constant 0 : i32
    return %arg0, %c0_i32, %c0_i32_0 : i32, i32, i32
  }
  func.func @transform_4(%arg0: i32) -> (i32, i32) {
    %c0_i32 = arith.constant 0 : i32
    %c0_i32_0 = arith.constant 0 : i32
    %c0_i32_1 = arith.constant 0 : i32
    return %c0_i32, %c0_i32_0 : i32, i32
  }
  func.func @transform_5(%arg0: i32) -> (i32, i32) {
    %c0_i32 = arith.constant 0 : i32
    %c0_i32_0 = arith.constant 0 : i32
    %c0_i32_1 = arith.constant 0 : i32
    return %c0_i32, %c0_i32_0 : i32, i32
  }
  func.func @transform_6(%arg0: i32) -> (i32, i32) {
    %c0_i32 = arith.constant 0 : i32
    %c0_i32_0 = arith.constant 0 : i32
    %c0_i32_1 = arith.constant 0 : i32
    return %c0_i32, %c0_i32_0 : i32, i32
  }
  func.func @transform_7(%arg0: i32) -> (i32, i32) {
    %c0_i32 = arith.constant 0 : i32
    %c0_i32_0 = arith.constant 0 : i32
    %c0_i32_1 = arith.constant 0 : i32
    return %c0_i32, %c0_i32_0 : i32, i32
  }
  func.func @transform_8(%arg0: i32) -> (i32, i32) {
    %c0_i32 = arith.constant 0 : i32
    %c0_i32_0 = arith.constant 0 : i32
    %c0_i32_1 = arith.constant 0 : i32
    return %c0_i32, %c0_i32_0 : i32, i32
  }
  func.func @transform_9(%arg0: i32) -> (i32, i32) {
    %c0_i32 = arith.constant 0 : i32
    %c0_i32_0 = arith.constant 0 : i32
    %c0_i32_1 = arith.constant 0 : i32
    return %c0_i32, %c0_i32_0 : i32, i32
  }
  func.func @transform_10(%arg0: i32) -> (i32, i32) {
    %c0_i32 = arith.constant 0 : i32
    %c0_i32_0 = arith.constant 0 : i32
    %c0_i32_1 = arith.constant 0 : i32
    return %c0_i32, %c0_i32_0 : i32, i32
  }
  func.func @transform_11(%arg0: i32) -> (i32, i32) {
    %c0_i32 = arith.constant 0 : i32
    %c0_i32_0 = arith.constant 0 : i32
    %c0_i32_1 = arith.constant 0 : i32
    return %c0_i32, %c0_i32_0 : i32, i32
  }
  func.func @transform_12(%arg0: i32) -> (i32, i32) {
    %c0_i32 = arith.constant 0 : i32
    %c0_i32_0 = arith.constant 0 : i32
    %c0_i32_1 = arith.constant 0 : i32
    return %c0_i32, %c0_i32_0 : i32, i32
  }
  func.func @transform_13(%arg0: i32) -> (i32, i32) {
    %c0_i32 = arith.constant 0 : i32
    %c0_i32_0 = arith.constant 0 : i32
    %c0_i32_1 = arith.constant 0 : i32
    return %c0_i32, %c0_i32_0 : i32, i32
  }
  func.func @transform_14(%arg0: i32) -> (i32, i32) {
    %c0_i32 = arith.constant 0 : i32
    %c0_i32_0 = arith.constant 0 : i32
    %c0_i32_1 = arith.constant 0 : i32
    return %c0_i32, %c0_i32_0 : i32, i32
  }
  func.func @transform_15(%arg0: i32) -> (i32, i32) {
    %c0_i32 = arith.constant 0 : i32
    %c0_i32_0 = arith.constant 0 : i32
    %c0_i32_1 = arith.constant 0 : i32
    return %c0_i32, %c0_i32_0 : i32, i32
  }
  func.func @transform_16(%arg0: i32) -> (i32, i32) {
    %c0_i32 = arith.constant 0 : i32
    %c0_i32_0 = arith.constant 0 : i32
    %c0_i32_1 = arith.constant 0 : i32
    return %c0_i32, %c0_i32_0 : i32, i32
  }
  func.func @transform_17(%arg0: i32) -> (i32, i32) {
    %c0_i32 = arith.constant 0 : i32
    %c0_i32_0 = arith.constant 0 : i32
    %c0_i32_1 = arith.constant 0 : i32
    return %c0_i32, %c0_i32_0 : i32, i32
  }
  func.func @transform_18(%arg0: i32) -> (i32, i32, i32) {
    %c0_i32 = arith.constant 0 : i32
    %c0_i32_0 = arith.constant 0 : i32
    %c0_i32_1 = arith.constant 0 : i32
    return %arg0, %c0_i32, %c0_i32_0 : i32, i32, i32
  }
}

module attributes {stable_mosaic.version = 11 : i64} {
  func.func @_layernorm_kernel(%arg0: i32, %arg1: memref<16x32xf32, #tpu.memory_space<vmem>>, %arg2: memref<1x32xf32, #tpu.memory_space<vmem>>, %arg3: memref<1x32xf32, #tpu.memory_space<vmem>>, %arg4: memref<16x32xf32, #tpu.memory_space<vmem>>) attributes {dimension_semantics = [#tpu.dimension_semantics<parallel>], iteration_bounds = array<i64: 1>, scalar_prefetch = 0 : i64, scratch_operands = 0 : i64, tpu.core_type = #tpu.core_type<tc>, window_params = [{transform_indices = @transform_0, window_bounds = array<i64: 16, 32>}, {pipeline_mode = #tpu.pipeline_mode<synchronous>, transform_indices = @transform_1, window_bounds = array<i64: 1, 32>}, {pipeline_mode = #tpu.pipeline_mode<synchronous>, transform_indices = @transform_2, window_bounds = array<i64: 1, 32>}, {transform_indices = @transform_3, window_bounds = array<i64: 16, 32>}]} {
    %c0 = arith.constant 0 : index
    %c0_0 = arith.constant 0 : index
    %0 = vector.load %arg1[%c0, %c0_0] : memref<16x32xf32, #tpu.memory_space<vmem>>, vector<16x32xf32>
    %c0_1 = arith.constant 0 : index
    %c0_2 = arith.constant 0 : index
    %1 = vector.load %arg2[%c0_1, %c0_2] : memref<1x32xf32, #tpu.memory_space<vmem>>, vector<1x32xf32>
    %c0_3 = arith.constant 0 : index
    %c0_4 = arith.constant 0 : index
    %2 = vector.load %arg3[%c0_3, %c0_4] : memref<1x32xf32, #tpu.memory_space<vmem>>, vector<1x32xf32>
    %cst = arith.constant dense<0.000000e+00> : vector<16xf32>
    %3 = vector.multi_reduction <add>, %0, %cst [1] : vector<16x32xf32> to vector<16xf32>
    %4 = vector.shape_cast %3 : vector<16xf32> to vector<16x1xf32>
    %cst_5 = arith.constant 3.200000e+01 : f32
    %5 = vector.broadcast %cst_5 : f32 to vector<16x1xf32>
    %6 = arith.divf %4, %5 : vector<16x1xf32>
    %7 = vector.broadcast %6 : vector<16x1xf32> to vector<16x32xf32>
    %8 = arith.subf %0, %7 : vector<16x32xf32>
    %9 = arith.mulf %8, %8 : vector<16x32xf32>
    %cst_6 = arith.constant dense<0.000000e+00> : vector<16xf32>
    %10 = vector.multi_reduction <add>, %9, %cst_6 [1] : vector<16x32xf32> to vector<16xf32>
    %11 = vector.shape_cast %10 : vector<16xf32> to vector<16x1xf32>
    %cst_7 = arith.constant 0.0322580636 : f32
    %12 = vector.broadcast %cst_7 : f32 to vector<16x1xf32>
    %13 = arith.mulf %11, %12 : vector<16x1xf32>
    %14 = vector.broadcast %1 : vector<1x32xf32> to vector<16x32xf32>
    %15 = arith.mulf %14, %8 : vector<16x32xf32>
    %16 = math.sqrt %13 : vector<16x1xf32>
    %cst_8 = arith.constant 9.99999997E-7 : f32
    %17 = vector.broadcast %cst_8 : f32 to vector<16x1xf32>
    %18 = arith.addf %16, %17 : vector<16x1xf32>
    %19 = vector.broadcast %18 : vector<16x1xf32> to vector<16x32xf32>
    %20 = arith.divf %15, %19 : vector<16x32xf32>
    %21 = vector.broadcast %2 : vector<1x32xf32> to vector<16x32xf32>
    %22 = arith.addf %20, %21 : vector<16x32xf32>
    %c0_9 = arith.constant 0 : index
    %c0_10 = arith.constant 0 : index
    %23 = vector.load %arg4[%c0_9, %c0_10] : memref<16x32xf32, #tpu.memory_space<vmem>>, vector<16x32xf32>
    tpu.vector_store %arg4[%c0_9, %c0_10], %22 {strides = array<i32>} : memref<16x32xf32, #tpu.memory_space<vmem>>, vector<16x32xf32>,
    return
  }
  func.func @transform_0(%arg0: i32) -> (i32, i32) {
    %c0_i32 = arith.constant 0 : i32
    %c0_i32_0 = arith.constant 0 : i32
    return %arg0, %c0_i32 : i32, i32
  }
  func.func @transform_1(%arg0: i32) -> (i32, i32) {
    %c0_i32 = arith.constant 0 : i32
    %c0_i32_0 = arith.constant 0 : i32
    %c0_i32_1 = arith.constant 0 : i32
    return %c0_i32, %c0_i32_0 : i32, i32
  }
  func.func @transform_2(%arg0: i32) -> (i32, i32) {
    %c0_i32 = arith.constant 0 : i32
    %c0_i32_0 = arith.constant 0 : i32
    %c0_i32_1 = arith.constant 0 : i32
    return %c0_i32, %c0_i32_0 : i32, i32
  }
  func.func @transform_3(%arg0: i32) -> (i32, i32) {
    %c0_i32 = arith.constant 0 : i32
    %c0_i32_0 = arith.constant 0 : i32
    return %arg0, %c0_i32 : i32, i32
  }
}

</mosaic_0001>

<bundles_post_ra>
// kernel: decoder_forward.6
= control target key start
LH: loop header
LB: loop body
LE: loop exit
PB: predicated region body
PF: predicated region fallthrough
CT: control target
= control target key end

     0   :  { %vm31_vm0 = vcmask 261120   ;;  %v310_v14 = vmov 0.0   ;;  %vm311_vm1 = vmmov 0   ;;  %vm192_vm6 = vcmask 523264   ;;  %s411_s0 = inlined_call_operand.vmem [shape: f32[16,32], index: 0, kind: input, shape index: {}, may-alias: {0,7}]   ;;  %s412_s3 = inlined_call_operand.vmem [shape: bf16[32,64], index: 3, kind: input, shape index: {}]   ;;  %s413_s5 = inlined_call_operand.vmem [shape: bf16[64,32], index: 5, kind: input, shape index: {}]   ;;  %s414_s1 = inlined_call_operand.vmem [shape: f32[1,32], index: 1, kind: input, shape index: {}]   ;;  %s415_s2 = inlined_call_operand.vmem [shape: f32[1,32], index: 2, kind: input, shape index: {}]   ;;  %s416_s4 = inlined_call_operand.vmem [shape: f32[1,64], index: 4, kind: input, shape index: {}]   ;;  %s417_s6 = inlined_call_operand.vmem [shape: f32[1,32], index: 6, kind: input, shape index: {}]   ;;  %s418_s7 = inlined_call_operand.vmem [shape: f32[16,32], index: 7, kind: output, shape index: {}, may-alias: {0,7}]  }
   0x1   :  { %v355_v0 = vld [vmem:[%s411_s0] sm:$0xff]  ;;  %v360_v1 = vld [vmem:[%s411_s0 + $0x8] sm:$0xff]  ;;  %274 = vmatprep.subr.bf16.mxu0 %v310_v14  ;;  %278 = vmatprep.mubr.msk.bf16.mxu0 %vm311_vm1, %v310_v14  ;;  %v300_v46 = vld [vmem:[%s413_s5 + $0x10] sm:$0xff]  }
   0x2   :  { %v32_v2 = vsel %vm31_vm0, %v355_v0, 0.0  ;;  %v35_v3 = vsel %vm31_vm0, %v360_v1, 0.0  ;;  %v296_v15 = vld [vmem:[%s412_s3] sm:$0xff]   ;;  %282 = vmatprep.subr.bf16.mxu1 %v310_v14  ;;  %290 = vmatprep.mubr.msk.bf16.mxu1 %vm311_vm1, %v310_v14  ;;  %v297_v16 = vld [vmem:[%s412_s3 + $0x8] sm:$0xff]   ;;  %v301_v47 = vld [vmem:[%s413_s5 + $0x18] sm:$0xff]  }
   0x3   :  { %33 = vadd.xlane.f32.xlu0 %v32_v2  ;;  %275 = vmatpush3.bf16.msra.mxu0 %v296_v15  ;;  %v298_v17 = vld [vmem:[%s413_s5] sm:$0xff]   ;;  %v299_v18 = vld [vmem:[%s413_s5 + $0x8] sm:$0xff]  }
   0x4   :  { %276 = vmatprep.subr.bf16.mxu0 %v310_v14  ;;  %283 = vmatpush3.bf16.msra.mxu1 %v298_v17  ;;  %v254_v35 = vld [vmem:[%s414_s1] ss:$0 sm:$0xff] }
   0x5   :  { %284 = vmatprep.subr.bf16.mxu1 %v310_v14  ;;  %v255_v41 = vld [vmem:[%s415_s2] ss:$0 sm:$0xff] }
   0x6   :  { %v256_v48 = vld [vmem:[%s416_s4] ss:$0 sm:$0xff] }
   0x7   :  { %36 = vadd.xlane.f32.xlu0 %v35_v3  ;;  %277 = vmatpush3.bf16.msra.mxu0 %v297_v16  ;;  %v265_v59 = vld [vmem:[%s417_s6] ss:$0 sm:$0xff] }
   0x8   :  { %285 = vmatpush3.bf16.msra.mxu1 %v299_v18 }
   0x9   :  { %286 = vmatprep.subr.bf16.mxu1 %v310_v14 }
   0xc   :  { %287 = vmatpush3.bf16.msra.mxu1 %v300_v46 }
   0xd   :  { %288 = vmatprep.subr.bf16.mxu1 %v310_v14 }
  0x10   :  { %289 = vmatpush3.bf16.msra.mxu1 %v301_v47 }
  0x90   :  { %v34_v4 = vpop.xlane.xlu0 %33 }
  0x91   :  { %v39_v5 = vmul.f32 0.03125, %v34_v4 }
  0x93   :  { %v41_v6 = vsub.f32 %v355_v0, %v39_v5 }
  0x94   :  { %v37_v7 = vpop.xlane.xlu0 %36 }
  0x95   :  { %v40_v8 = vmul.f32 0.03125, %v37_v7  ;;  %v43_v9 = vmul.f32 %v41_v6, %v41_v6  ;;  %v59_v37 = vmul.f32 %v254_v35, %v41_v6 }
  0x97   :  { %v42_v10 = vsub.f32 %v360_v1, %v40_v8  ;;  %v45_v11 = vsel %vm31_vm0, %v43_v9, 0.0 }
  0x98   :  { %46 = vadd.xlane.f32.xlu1 %v45_v11 }
  0x99   :  { %v44_v12 = vmul.f32 %v42_v10, %v42_v10  ;;  %v60_v38 = vmul.f32 %v254_v35, %v42_v10 }
  0x9b   :  { %v48_v13 = vsel %vm31_vm0, %v44_v12, 0.0 }
  0x9c   :  { %49 = vadd.xlane.f32.xlu1 %v48_v13 }
 0x125   :  { %v47_v19 = vpop.xlane.xlu1 %46 }
 0x126   :  { %v51_v20 = vmul.f32 0.032258064, %v47_v19 }
 0x128   :  { %302 = vrsqrt.f32 %v51_v20  ;;  %vm63_vm2 = vcmp.eq.f32.partialorder %v51_v20, inf  ;;  %v66_v25 = vand.u32 2147483648, %v51_v20  ;;  %vm65_vm3 = vcmp.eq.f32.partialorder %v51_v20, 0.0 }
 0x129   :  { %v50_v21 = vpop.xlane.xlu1 %49 }
 0x12a   :  { %v52_v22 = vmul.f32 0.032258064, %v50_v21 }
 0x12c   :  { %304 = vrsqrt.f32 %v52_v22  ;;  %vm70_vm4 = vcmp.eq.f32.partialorder %v52_v22, inf  ;;  %v73_v31 = vand.u32 2147483648, %v52_v22  ;;  %vm72_vm5 = vcmp.eq.f32.partialorder %v52_v22, 0.0 }
 0x132   :  { %v303_v23 = vpop.eup %302 }
 0x133   :  { %v62_v24 = vmul.f32 %v303_v23, %v51_v20 }
 0x135   :  { %v64_v26 = vsel %vm63_vm2, %v51_v20, %v62_v24 }
 0x136   :  { %v305_v27 = vpop.eup %304  ;;  %v67_v28 = vsel %vm65_vm3, %v66_v25, %v64_v26 }
 0x137   :  { %v75_v29 = vadd.f32 1e-06, %v67_v28  ;;  %v69_v30 = vmul.f32 %v305_v27, %v52_v22 }
 0x139   :  { %306 = vrcp.f32 %v75_v29  ;;  %v71_v32 = vsel %vm70_vm4, %v52_v22, %v69_v30 }
 0x13a   :  { %v74_v33 = vsel %vm72_vm5, %v73_v31, %v71_v32 }
 0x13b   :  { %v76_v34 = vadd.f32 1e-06, %v74_v33 }
 0x13d   :  { %308 = vrcp.f32 %v76_v34 }
 0x143   :  { %v307_v36 = vpop.eup %306 }
 0x144   :  { %v78_v39 = vmul.f32 %v307_v36, %v59_v37 }
 0x146   :  { %v87_v43 = vadd.f32 %v255_v41, %v78_v39 }
 0x147   :  { %v309_v40 = vpop.eup %308 }
 0x148   :  { %v80_v42 = vmul.f32 %v309_v40, %v60_v38 }
 0x14a   :  { %v88_v44 = vadd.f32 %v255_v41, %v80_v42 }
 0x14c   :  { %v93_v45 = vpack.c.bf16 %v88_v44, %v87_v43 }
 0x14e   :  { %279 = vmatmul.mubr.msk.bf16.vlgmr.msra.gmra.mrb[0].mxu0 %vm31_vm0, %v93_v45 }
 0x221   :  { %v150_v49 = vpop.f32.mrb[0].mxu0 }
 0x222   :  { %v151_v50 = vadd.f32 %v256_v48, %v150_v49  ;;  %v280_v51 = vpop.f32.mrb[1].mxu0 }
 0x223   :  { %v153_v52 = vpop.f32.mrb[2].mxu0 }
 0x224   :  { %v154_v53 = vadd.f32 %v256_v48, %v153_v52  ;;  %v281_v54 = vpop.f32.mrb[3].mxu0  ;;  %v157_v55 = vmax.f32 %v151_v50, 0.0 }
 0x226   :  { %v158_v56 = vmax.f32 %v154_v53, 0.0 }
 0x228   :  { %v167_v57 = vpack.c.bf16 %v158_v56, %v157_v55 }
 0x22a   :  { %291 = vmatmul.mubr.msk.bf16.vlgmr.msra.gmra.mrb[0].mxu1 %vm192_vm6, %v167_v57 }
 0x2fd   :  { %v230_v58 = vpop.f32.mrb[0].mxu1 }
 0x2fe   :  { %v237_v60 = vadd.f32 %v230_v58, %v355_v0  ;;  %v292_v61 = vpop.f32.mrb[1].mxu1 }
 0x2ff   :  { %v233_v62 = vpop.f32.mrb[2].mxu1 }
 0x300   :  { %v246_v63 = vadd.f32 %v265_v59, %v237_v60  ;;  %v238_v2 = vadd.f32 %v233_v62, %v360_v1  ;;  %v293_v3 = vpop.f32.mrb[3].mxu1 }
 0x302   :  { %248 = vst.msk [vmem:[%s418_s7] sm:$0xff] %vm31_vm0, %v246_v63  ;;  %v247_v4 = vadd.f32 %v265_v59, %v238_v2 }
 0x304   :  { %249 = vst.msk [vmem:[%s418_s7 + $0x8] sm:$0xff] %vm31_vm0, %v247_v4 }

// kernel: decoder_forward.9
= control target key start
LH: loop header
LB: loop body
LE: loop exit
PB: predicated region body
PF: predicated region fallthrough
CT: control target
= control target key end

     0   :  { %vm19_vm0 = vcmask 261120   ;;  %s185_s0 = inlined_call_operand.vmem [shape: f32[16,32], index: 0, kind: input, shape index: {}]   ;;  %s186_s1 = inlined_call_operand.vmem [shape: f32[1,32], index: 1, kind: input, shape index: {}]   ;;  %s187_s2 = inlined_call_operand.vmem [shape: f32[1,32], index: 2, kind: input, shape index: {}]   ;;  %s188_s3 = inlined_call_operand.hbm [shape: f32[16,32], index: 3, kind: output, shape index: {}]  }
   0x1   :  { %v15_v0 = vld [vmem:[%s185_s0] sm:$0xff]  ;;  %v16_v1 = vld [vmem:[%s185_s0 + $0x8] sm:$0xff] }
   0x2   :  { %v20_v2 = vsel %vm19_vm0, %v15_v0, 0.0 }
   0x3   :  { %8 = vsyncpa [#allocation3], 0  ;;  %21 = vadd.xlane.f32.xlu0 %v20_v2  ;;  %v23_v3 = vsel %vm19_vm0, %v16_v1, 0.0  ;;  %v95_v30 = vld [vmem:[%s186_s1] ss:$0 sm:$0xff]  ;;  %s132_s19 = smov [#allocation2]  }
   0x4   :  { %v96_v33 = vld [vmem:[%s187_s2] ss:$0 sm:$0xff]  ;;  %s84_s20 = sshll.u32 %s132_s19, 4  ;;  %s85_s20 = int_to_ptr.vmem [resolvable:$true] %s84_s20 }
   0x5   :  { %s108_s1 = scalar_lea.vmem %s85_s20, 256  ;;  %p113_p1 = scmp.lt.s32.totalorder %s85_s20, %s85_s20 }
   0x6   :  { %p109_p0 = scmp.ne.s32.totalorder %s85_s20, %s108_s1  ;;  %p114_p2 = scmp.lt.s32.totalorder %s108_s1, %s108_s1 }
   0x7   :  { %24 = vadd.xlane.f32.xlu0 %v23_v3 }
   0x8   :  { %p115_p3 = por %p114_p2, %p113_p1 }
   0xa   :  { %p116_p4 = pnand %p115_p3, %p109_p0 }
  0x90   :  { %v22_v4 = vpop.xlane.xlu0 %21 }
  0x91   :  { %v27_v5 = vmul.f32 0.03125, %v22_v4 }
  0x93   :  { %v29_v6 = vsub.f32 %v15_v0, %v27_v5 }
  0x94   :  { %v25_v7 = vpop.xlane.xlu0 %24 }
  0x95   :  { %v28_v8 = vmul.f32 0.03125, %v25_v7  ;;  %v31_v9 = vmul.f32 %v29_v6, %v29_v6  ;;  %v47_v31 = vmul.f32 %v95_v30, %v29_v6 }
  0x97   :  { %v30_v10 = vsub.f32 %v16_v1, %v28_v8  ;;  %v33_v11 = vsel %vm19_vm0, %v31_v9, 0.0 }
  0x98   :  { %34 = vadd.xlane.f32.xlu1 %v33_v11 }
  0x99   :  { %v32_v12 = vmul.f32 %v30_v10, %v30_v10  ;;  %v48_v35 = vmul.f32 %v95_v30, %v30_v10 }
  0x9b   :  { %v36_v13 = vsel %vm19_vm0, %v32_v12, 0.0 }
  0x9c   :  { %37 = vadd.xlane.f32.xlu1 %v36_v13 }
 0x125   :  { %v35_v14 = vpop.xlane.xlu1 %34 }
 0x126   :  { %v39_v15 = vmul.f32 0.032258064, %v35_v14 }
 0x128   :  { %100 = vrsqrt.f32 %v39_v15  ;;  %vm51_vm1 = vcmp.eq.f32.partialorder %v39_v15, inf  ;;  %v54_v20 = vand.u32 2147483648, %v39_v15  ;;  %vm53_vm2 = vcmp.eq.f32.partialorder %v39_v15, 0.0 }
 0x129   :  { %v38_v16 = vpop.xlane.xlu1 %37 }
 0x12a   :  { %v40_v17 = vmul.f32 0.032258064, %v38_v16 }
 0x12c   :  { %102 = vrsqrt.f32 %v40_v17  ;;  %vm58_vm3 = vcmp.eq.f32.partialorder %v40_v17, inf  ;;  %v61_v26 = vand.u32 2147483648, %v40_v17  ;;  %vm60_vm4 = vcmp.eq.f32.partialorder %v40_v17, 0.0 }
 0x132   :  { %v101_v18 = vpop.eup %100 }
 0x133   :  { %v50_v19 = vmul.f32 %v101_v18, %v39_v15 }
 0x135   :  { %v52_v21 = vsel %vm51_vm1, %v39_v15, %v50_v19 }
 0x136   :  { %v103_v22 = vpop.eup %102  ;;  %v55_v23 = vsel %vm53_vm2, %v54_v20, %v52_v21 }
 0x137   :  { %v63_v24 = vadd.f32 1e-06, %v55_v23  ;;  %v57_v25 = vmul.f32 %v103_v22, %v40_v17 }
 0x139   :  { %104 = vrcp.f32 %v63_v24  ;;  %v59_v27 = vsel %vm58_vm3, %v40_v17, %v57_v25 }
 0x13a   :  { %v62_v28 = vsel %vm60_vm4, %v61_v26, %v59_v27 }
 0x13b   :  { %v64_v29 = vadd.f32 1e-06, %v62_v28 }
 0x13d   :  { %106 = vrcp.f32 %v64_v29 }
 0x143   :  { %v105_v32 = vpop.eup %104 }
 0x144   :  { %v66_v34 = vmul.f32 %v105_v32, %v47_v31 }
 0x146   :  { %v75_v36 = vadd.f32 %v96_v33, %v66_v34 }
 0x147   :  { %v107_v37 = vpop.eup %106 }
 0x148   :  { %v68_v38 = vmul.f32 %v107_v37, %v48_v35  ;;  %77 = vst.msk [vmem:[#allocation2] sm:$0xff] %vm19_vm0, %v75_v36 }
 0x14a   :  { %v76_v39 = vadd.f32 %v96_v33, %v68_v38 }
 0x14c   :  { %78 = vst.msk [vmem:[#allocation2 + $0x8] sm:$0xff] %vm19_vm0, %v76_v39 }
 0x14d   :  { %119 = shalt.err (!%p116_p4)
}
 0x14e   :  { %s120_s22 = scalar_lea.hbm %s188_s3, 256 }
 0x14f   :  { %p121_p5 = scmp.ne.s32.totalorder %s188_s3, %s120_s22  ;;  %p124_p6 = scmp.lt.u32.totalorder %s120_s22, %s188_s3 }
 0x151   :  { %p126_p7 = pnand %p124_p6, %p121_p5 }
 0x153   :  { %129 = shalt.err (!%p126_p7)
}
 0x154   :  { %s133_s27 = smov 128   ;;  %s134_s28 = smov 8  }
 0x155   :  { %90 = dma.vmem_to_hbm [thread:$0]  %s85_s20, 256, %s188_s3, [#allocation3], %s133_s27, %s133_s27, %s134_s28  }
 0x156   :  { %130 = dma.done.wait [#allocation3], 256  }
 0x157   :  { %131 = vsyncadd [#allocation3], 4294967040 }
 0x158   :  { %94 = vsyncpa [#allocation3], 1 }

// kernel: decoder_forward.7
= control target key start
LH: loop header
LB: loop body
LE: loop exit
PB: predicated region body
PF: predicated region fallthrough
CT: control target
= control target key end

     0   :  { %s2475_s27 = smov 0   ;;  %s2759_s0 = inlined_call_operand.vmem [shape: f32[2,8,32], index: 0, kind: input, shape index: {}, may-alias: {0,18}]   ;;  %s2760_s1 = inlined_call_operand.vmem [shape: f32[2,8,32], index: 1, kind: input, shape index: {}]   ;;  %s2761_s2 = inlined_call_operand.vmem [shape: f32[2,8,8], index: 2, kind: input, shape index: {}]   ;;  %s2762_s3 = inlined_call_operand.vmem [shape: f32[2,1,8], index: 3, kind: input, shape index: {}]   ;;  %s2763_s4 = inlined_call_operand.vmem [shape: f32[1,32], index: 4, kind: input, shape index: {}]   ;;  %s2764_s5 = inlined_call_operand.vmem [shape: f32[1,32], index: 5, kind: input, shape index: {}]   ;;  %s2765_s6 = inlined_call_operand.vmem [shape: bf16[32,96], index: 6, kind: input, shape index: {}]   ;;  %s2766_s7 = inlined_call_operand.vmem [shape: f32[1,96], index: 7, kind: input, shape index: {}]   ;;  %s2767_s8 = inlined_call_operand.vmem [shape: bf16[32,32], index: 8, kind: input, shape index: {}]   ;;  %s2768_s9 = inlined_call_operand.vmem [shape: f32[1,32], index: 9, kind: input, shape index: {}]   ;;  %s2769_s10 = inlined_call_operand.vmem [shape: f32[1,32], index: 10, kind: input, shape index: {}]   ;;  %s2770_s11 = inlined_call_operand.vmem [shape: f32[1,32], index: 11, kind: input, shape index: {}]   ;;  %s2771_s12 = inlined_call_operand.vmem [shape: bf16[32,32], index: 12, kind: input, shape index: {}]   ;;  %s2772_s13 = inlined_call_operand.vmem [shape: f32[1,32], index: 13, kind: input, shape index: {}]   ;;  %s2773_s14 = inlined_call_operand.vmem [shape: bf16[32,64], index: 14, kind: input, shape index: {}]   ;;  %s2774_s15 = inlined_call_operand.vmem [shape: f32[1,64], index: 15, kind: input, shape index: {}]   ;;  %s2775_s16 = inlined_call_operand.vmem [shape: bf16[32,32], index: 16, kind: input, shape index: {}]   ;;  %s2776_s17 = inlined_call_operand.vmem [shape: f32[1,32], index: 17, kind: input, shape index: {}]   ;;  %s2777_s18 = inlined_call_operand.vmem [shape: f32[2,8,32], index: 18, kind: output, shape index: {}, may-alias: {0,18}]  }
   0x1   :  { %2789 = sst [smem:[#allocation2_spill]] %s2759_s0 }
   0x2   :  { %2790 = sst [smem:[#allocation3_spill]] %s2760_s1 }
   0x3   :  { %2791 = sst [smem:[#allocation4_spill]] %s2761_s2 }
   0x4 LB: > { %s2048_s28 = sadd.s32 4294967295, %s2362_s27   ;;  %p2052_p0 = scmp.ge.s32.totalorder %s2362_s27, 1  ;;  %s2362_s27 = sphi %s2475_s27, %s28_s27  }
   0x5   : > { %p537_p1 = scmp.lt.s32.totalorder %s2362_s27, 3 }
   0x7   : > { %p538_p2 = pnand %p2052_p0, %p537_p1 }
   0x8   : > { %p600_p3 = scmp.lt.s32.totalorder (!%p538_p2), %s2048_s28, 1  ;;  %vm630_vm0 = vcmask (!%p538_p2), 261120   ;;  %s2792_s19 = sld [smem:[#allocation2_spill]] (!%p538_p2)  ;;  %v2306_v7 = vld [vmem:[%s2765_s6] sm:$0xff] (!%p538_p2)   ;;  %v2364_v8 = vmov (!%p538_p2), 0.0   ;;  %vm2365_vm1 = vmmov (!%p538_p2), 0  }
   0x9   : > { %541 = sbr.rel (%p538_p2) target bundleno = 3614 (0xe1e), region = 92  ;;  %2146 = vmatprep.subr.bf16.mxu0 (!%p538_p2), %v2364_v8  ;;  %2150 = vmatprep.mubr.msk.bf16.mxu0 (!%p538_p2), %vm2365_vm1, %v2364_v8  ;;  %v2307_v9 = vld [vmem:[%s2765_s6 + $0x8] sm:$0xff] (!%p538_p2)   ;;  %v2057_v18 = vld [vmem:[%s2763_s4] ss:$0 sm:$0xff] (!%p538_p2)  ;;  %s2784_s20 = smov (!%p538_p2), 88   ;;  %vm737_vm4 = vcmask (!%p538_p2), 64512  }
   0xa   : > { %2147 = vmatpush3.bf16.msra.mxu0 (!%p538_p2), %v2306_v7  ;;  %2154 = vmatprep.subr.bf16.mxu1 (!%p538_p2), %v2364_v8  ;;  %v2058_v21 = vld [vmem:[%s2764_s5] ss:$0 sm:$0xff] (!%p538_p2)  ;;  %s2778_s21 = smov (!%p538_p2), 80   ;;  %s2787_s22 = smov (!%p538_p2), 112   ;;  %vm801_vm6 = vcmask (!%p538_p2), 1043456   ;;  %vm1188_vm7 = vcmask (!%p538_p2), 130048  }
   0xb   : > { %2148 = vmatprep.subr.bf16.mxu0 (!%p538_p2), %v2364_v8  ;;  %2156 = vmatprep.mubr.msk.bf16.mxu1 (!%p538_p2), %vm2365_vm1, %v2364_v8  ;;  %v2059_v25 = vld [vmem:[%s2766_s7] ss:$0 sm:$0xff] (!%p538_p2)  ;;  %s2782_s2 = smov (!%p538_p2), 72   ;;  %s2785_s23 = smov (!%p538_p2), 104   ;;  %vm1190_vm8 = vcmask (!%p538_p2), 195584  }
   0xc   : > { %s2793_s26 = sld [smem:[#allocation4_spill]] (!%p538_p2)  ;;  %s2373_s0 = smov (!%p538_p2), 64  }
   0xd   : > { %s2374_s24 = smov (!%p538_p2), 56   ;;  %s2375_s25 = smov (!%p538_p2), 48  }
   0xe   : > { %2149 = vmatpush3.bf16.msra.mxu0 (!%p538_p2), %v2307_v9 }
   0xf   : > { %2160 = vmatprep.subr.bf16.mxu0 (!%p538_p2), %v2364_v8 }
  0x10   : > { %s2805_s28 = smov (!%p600_p3, %s2048_s28), 1 }
  0x11   : > { %s2486_s29 = sshll.u32 %s2805_s28, 3 }
  0x12   : > { %s603_s1 = scalar_lea.vmem %s2792_s19, %s2486_s29  ;;  %s2366_s19 = smov 120  }
  0x13   : > { %v2492_v0 = vld [vmem:[%s603_s1] sm:$0xff]  ;;  %s2783_s1 = smov 96   ;;  %s611_s30 = scalar_lea.vmem %s2793_s26, %s2486_s29 }
  0x14   : > { %v631_v1 = vsel %vm630_vm0, %v2492_v0, 0.0  ;;  %v622_v43 = vld [vmem:[%s611_s30] sm:$0xff]  ;;  %s2376_s26 = smov 40   ;;  %s2781_s30 = smov 8  }
  0x15   : > { %632 = vadd.xlane.f32.xlu0 %v631_v1  ;;  %vm623_vm5 = vcmp.eq.f32.partialorder %v622_v43, 0.0 }
  0x16   : > { %v624_v44 = vsel %vm623_vm5, -1e+09, %v2364_v8 }
  0xa2   : > { %v633_v2 = vpop.xlane.xlu0 %632 }
  0xa3   : > { %v635_v3 = vmul.f32 0.03125, %v633_v2 }
  0xa5   : > { %v636_v4 = vsub.f32 %v2492_v0, %v635_v3 }
  0xa7   : > { %v637_v5 = vmul.f32 %v636_v4, %v636_v4  ;;  %v648_v19 = vmul.f32 %v2057_v18, %v636_v4 }
  0xa9   : > { %v638_v6 = vsel %vm630_vm0, %v637_v5, 0.0 }
  0xaa   : > { %639 = vadd.xlane.f32.xlu0 %v638_v6 }
 0x137   : > { %v640_v10 = vpop.xlane.xlu0 %639 }
 0x138   : > { %v641_v11 = vmul.f32 0.032258064, %v640_v10 }
 0x13a   : > { %2316 = vrsqrt.f32 %v641_v11  ;;  %vm651_vm2 = vcmp.eq.f32.partialorder %v641_v11, inf  ;;  %v654_v14 = vand.u32 2147483648, %v641_v11  ;;  %vm653_vm3 = vcmp.eq.f32.partialorder %v641_v11, 0.0 }
 0x144   : > { %v2317_v12 = vpop.eup %2316 }
 0x145   : > { %v650_v13 = vmul.f32 %v2317_v12, %v641_v11 }
 0x147   : > { %v652_v15 = vsel %vm651_vm2, %v641_v11, %v650_v13 }
 0x148   : > { %v655_v16 = vsel %vm653_vm3, %v654_v14, %v652_v15 }
 0x149   : > { %v656_v17 = vadd.f32 1e-06, %v655_v16 }
 0x14b   : > { %2318 = vrcp.f32 %v656_v17 }
 0x155   : > { %v2319_v20 = vpop.eup %2318 }
 0x156   : > { %v658_v22 = vmul.f32 %v2319_v20, %v648_v19 }
 0x158   : > { %v665_v23 = vadd.f32 %v2058_v21, %v658_v22 }
 0x15a   : > { %v670_v24 = vpack.c.bf16 %v665_v23, %v665_v23 }
 0x15c   : > { %2151 = vmatmul.mubr.msk.bf16.vlgmr.msra.gmra.mrb[0].mxu0 %vm630_vm0, %v670_v24 }
 0x15d   : > { %2162 = vmatprep.mubr.msk.bf16.mxu0 %vm2365_vm1, %v2364_v8 }
 0x22f   : > { %v727_v26 = vpop.f32.mrb[0].mxu0 }
 0x230   : > { %v728_v27 = vadd.f32 %v2059_v25, %v727_v26  ;;  %v2152_v28 = vpop.f32.mrb[1].mxu0 }
 0x231   : > { %v730_v29 = vpop.f32.mrb[2].mxu0 }
 0x232   : > { %v2524_v30 = vpack.c.bf16 %v728_v27, %v728_v27  ;;  %v2153_v31 = vpop.f32.mrb[3].mxu0 }
 0x234   : > { %845 = vrot.lane.b32.xlu0 %v2524_v30, %s2366_s19  ;;  %735 = vrot.lane.b32.xlu1 %v2524_v30, %s2783_s1  ;;  %s614_s1 = scalar_lea.vmem %s2762_s3, %s2805_s28  ;;  %s2797_s28 = smov 88  }
 0x238   : > { %847 = vrot.lane.b32.xlu1 %v2524_v30, %s2784_s20  ;;  %s2798_s20 = smov 96  }
 0x23c   : > { %957 = vrot.lane.b32.xlu1 %v2524_v30, %s2778_s21  ;;  %s2780_s21 = smov 16  }
 0x240   : > { %955 = vrot.lane.b32.xlu1 %v2524_v30, %s2787_s22  ;;  %s2800_s22 = smov 80  }
 0x244   : > { %1067 = vrot.lane.b32.xlu1 %v2524_v30, %s2782_s2  ;;  %s2801_s2 = smov 8  }
 0x248   : > { %1065 = vrot.lane.b32.xlu1 %v2524_v30, %s2785_s23 }
 0x2a6   : > { %v736_v32 = vpop.permute.xlu1 %735  ;;  %v846_v37 = vpop.permute.xlu0 %845 }
 0x2a7   : > { %v742_v33 = vsel %vm737_vm4, %v736_v32, 0 }
 0x2a8   : > { %2155 = vmatpush3.bf16.xpose.msra.mxu1 %v742_v33 }
 0x2a9   : > { %2166 = vmatprep.subr.bf16.mxu1 %v2364_v8 }
 0x2aa   : > { %v848_v34 = vpop.permute.xlu1 %847 }
 0x2ab   : > { %v853_v35 = vsel %vm737_vm4, %v848_v34, 0 }
 0x2ae   : > { %v958_v36 = vpop.permute.xlu1 %957 }
 0x2af   : > { %2157 = vmatmul.mubr.msk.bf16.vlgmr.msra.gmra.mrb[0].mxu1 %vm737_vm4, %v2524_v30  ;;  %v963_v39 = vsel %vm737_vm4, %v958_v36, 0 }
 0x2b0   : > { %2167 = vmatpush3.bf16.xpose.msra.mxu1 %v853_v35  ;;  %2168 = vmatprep.mubr.msk.bf16.mxu1 %vm2365_vm1, %v2364_v8 }
 0x2b1   : > { %2178 = vmatprep.subr.bf16.mxu1 %v2364_v8 }
 0x2b2   : > { %v956_v38 = vpop.permute.xlu1 %955 }
 0x2b6   : > { %v1068_v40 = vpop.permute.xlu1 %1067 }
 0x2b7   : > { %2169 = vmatmul.mubr.msk.bf16.vlgmr.msra.gmra.mrb[4].mxu1 %vm737_vm4, %v846_v37  ;;  %v1073_v41 = vsel %vm737_vm4, %v1068_v40, 0 }
 0x2b8   : > { %2179 = vmatpush3.bf16.xpose.msra.mxu1 %v963_v39  ;;  %2180 = vmatprep.mubr.msk.bf16.mxu1 %vm2365_vm1, %v2364_v8 }
 0x2b9   : > { %2190 = vmatprep.subr.bf16.mxu1 %v2364_v8 }
 0x2ba   : > { %v1066_v42 = vpop.permute.xlu1 %1065 }
 0x2bf   : > { %2181 = vmatmul.mubr.msk.bf16.vlgmr.msra.gmra.mrb[8].mxu1 %vm737_vm4, %v956_v38 }
 0x2c0   : > { %2191 = vmatpush3.bf16.xpose.msra.mxu1 %v1073_v41  ;;  %2192 = vmatprep.mubr.msk.bf16.mxu1 %vm2365_vm1, %v2364_v8 }
 0x2c1   : > { %2202 = vmatprep.subr.bf16.mxu1 %v2364_v8 }
 0x2c7   : > { %2193 = vmatmul.mubr.msk.bf16.vlgmr.msra.gmra.mrb[12].mxu1 %vm737_vm4, %v1066_v42 }
 0x2c8   : > { %2206 = vmatprep.mubr.msk.bf16.mxu1 %vm2365_vm1, %v2364_v8 }
 0x382   : > { %v778_v45 = vpop.f32.mrb[0].mxu1 }
 0x383   : > { %v779_v46 = vadd.f32 %v778_v45, %v624_v44  ;;  %v2158_v47 = vpop.f32.mrb[1].mxu1 }
 0x384   : > { %v781_v48 = vpop.f32.mrb[2].mxu1 }
 0x385   : > { %v2159_v49 = vpop.f32.mrb[3].mxu1  ;;  %v784_v50 = vsel %vm737_vm4, %v779_v46, -inf }
 0x386   : > { %785 = vmax.xlane.f32.xlu1 %v784_v50 }
 0x38a   : > { %v889_v51 = vpop.f32.mrb[4].mxu1 }
 0x38b   : > { %v890_v52 = vadd.f32 %v889_v51, %v624_v44  ;;  %v2170_v53 = vpop.f32.mrb[5].mxu1 }
 0x38c   : > { %v892_v54 = vpop.f32.mrb[6].mxu1 }
 0x38d   : > { %v2171_v55 = vpop.f32.mrb[7].mxu1  ;;  %v895_v56 = vsel %vm737_vm4, %v890_v52, -inf }
 0x38e   : > { %896 = vmax.xlane.f32.xlu0 %v895_v56 }
 0x392   : > { %v999_v57 = vpop.f32.mrb[8].mxu1 }
 0x393   : > { %v1000_v58 = vadd.f32 %v999_v57, %v624_v44  ;;  %v2182_v59 = vpop.f32.mrb[9].mxu1 }
 0x394   : > { %v1002_v60 = vpop.f32.mrb[10].mxu1  ;;  %v2308_v59 = vld [vmem:[%s2767_s8] sm:$0xff]  }
 0x395   : > { %v2183_v61 = vpop.f32.mrb[11].mxu1  ;;  %v1005_v62 = vsel %vm737_vm4, %v1000_v58, -inf  ;;  %2203 = vmatpush3.bf16.msra.mxu1 %v2308_v59  ;;  %v2309_v60 = vld [vmem:[%s2767_s8 + $0x8] sm:$0xff]  }
 0x396   : > { %1006 = vmax.xlane.f32.xlu1 %v1005_v62  ;;  %2204 = vmatprep.subr.bf16.mxu1 %v2364_v8 }
 0x399   : > { %2205 = vmatpush3.bf16.msra.mxu1 %v2309_v60 }
 0x39a   : > { %v1109_v63 = vpop.f32.mrb[12].mxu1  ;;  %2218 = vmatprep.subr.bf16.mxu1 %v2364_v8 }
 0x39b   : > { %v1110_v1 = vadd.f32 %v1109_v63, %v624_v44  ;;  %v2194_v2 = vpop.f32.mrb[13].mxu1 }
 0x39c   : > { %v1112_v3 = vpop.f32.mrb[14].mxu1 }
 0x39d   : > { %v2195_v4 = vpop.f32.mrb[15].mxu1  ;;  %v1115_v5 = vsel %vm737_vm4, %v1110_v1, -inf }
 0x39e   : > { %1116 = vmax.xlane.f32.xlu0 %v1115_v5 }
 0x413   : > { %v786_v6 = vpop.xlane.xlu1 %785 }
 0x414   : > { %v787_v7 = vsub.f32 %v779_v46, %v786_v6 }
 0x416   : > { %v788_v9 = vmul.f32 1.442695, %v787_v7 }
 0x418   : > { %2320 = vpow2.f32 %v788_v9 }
 0x41b   : > { %v897_v10 = vpop.xlane.xlu0 %896 }
 0x41c   : > { %v898_v11 = vsub.f32 %v890_v52, %v897_v10 }
 0x41e   : > { %v899_v12 = vmul.f32 1.442695, %v898_v11 }
 0x420   : > { %2322 = vpow2.f32 %v899_v12 }
 0x422   : > { %v2321_v13 = vpop.eup %2320 }
 0x423   : > { %v790_v14 = vsel %vm737_vm4, %v2321_v13, 0.0  ;;  %v1007_v22 = vpop.xlane.xlu1 %1006 }
 0x424   : > { %791 = vadd.xlane.f32.xlu1 %v790_v14  ;;  %v1008_v23 = vsub.f32 %v1000_v58, %v1007_v22 }
 0x426   : > { %v1009_v24 = vmul.f32 1.442695, %v1008_v23 }
 0x42a   : > { %v2323_v15 = vpop.eup %2322 }
 0x42b   : > { %v1117_v16 = vpop.xlane.xlu0 %1116  ;;  %v901_v17 = vsel %vm737_vm4, %v2323_v15, 0.0 }
 0x42c   : > { %v1118_v18 = vsub.f32 %v1110_v1, %v1117_v16  ;;  %902 = vadd.xlane.f32.xlu0 %v901_v17 }
 0x42e   : > { %v1119_v19 = vmul.f32 1.442695, %v1118_v18 }
 0x430   : > { %2324 = vpow2.f32 %v1119_v19 }
 0x431   : > { %2326 = vpow2.f32 %v1009_v24 }
 0x435   : > { %796 = vrot.lane.b32.xlu1 %v2524_v30, %s2373_s0  ;;  %s2779_s0 = smov 24  }
 0x43a   : > { %v2325_v20 = vpop.eup %2324 }
 0x43b   : > { %v1121_v21 = vsel %vm737_vm4, %v2325_v20, 0.0  ;;  %v2327_v25 = vpop.eup %2326 }
 0x43c   : > { %1122 = vadd.xlane.f32.xlu0 %v1121_v21  ;;  %v1011_v26 = vsel %vm737_vm4, %v2327_v25, 0.0 }
 0x452   : > { %907 = vrot.lane.b32.xlu0 %v2524_v30, %s2374_s24  ;;  %s2795_s24 = smov 112  }
 0x459   : > { %1012 = vadd.xlane.f32.xlu1 %v1011_v26 }
 0x46a   : > { %1017 = vrot.lane.b32.xlu1 %v2524_v30, %s2375_s25  ;;  %s2794_s25 = sld [smem:[#allocation3_spill]] }
 0x46e   : > { %1127 = vrot.lane.b32.xlu1 %v2524_v30, %s2376_s26 }
 0x4b1   : > { %v792_v27 = vpop.xlane.xlu1 %791 }
 0x4b2   : > { %2328 = vrcp.f32 %v792_v27  ;;  %v2311_v27 = vld [vmem:[%s2773_s14 + $0x8] sm:$0xff]  }
 0x4b5   : > { %v797_v28 = vpop.permute.xlu1 %796 }
 0x4b6   : > { %v803_v29 = vsel %vm801_vm6, %v797_v28, 0 }
 0x4b7   : > { %2161 = vmatpush3.bf16.msra.mxu0 %v803_v29  ;;  %v2312_v29 = vld [vmem:[%s2771_s12] sm:$0xff]  }
 0x4b8   : > { %2172 = vmatprep.subr.bf16.mxu0 %v2364_v8 }
 0x4b9   : > { %v903_v32 = vpop.xlane.xlu0 %902 }
 0x4ba   : > { %2330 = vrcp.f32 %v903_v32 }
 0x4bc   : > { %v2329_v31 = vpop.eup %2328 }
 0x4bd   : > { %v794_v33 = vmul.f32 %v2329_v31, %v2321_v13  ;;  %v2313_v31 = vld [vmem:[%s2771_s12 + $0x8] sm:$0xff]  }
 0x4bf   : > { %v795_v34 = vpack.c.bf16 %v794_v33, %v794_v33 }
 0x4c1   : > { %2163 = vmatmul.mubr.msk.bf16.vlgmr.msra.gmra.mrb[4].mxu0 %vm737_vm4, %v795_v34 }
 0x4c2   : > { %2174 = vmatprep.mubr.msk.bf16.mxu0 %vm2365_vm1, %v2364_v8 }
 0x4c4   : > { %v2331_v30 = vpop.eup %2330 }
 0x4c5   : > { %v905_v36 = vmul.f32 %v2331_v30, %v2323_v15  ;;  %v2074_v15 = vld [vmem:[%s2768_s9] ss:$0 sm:$0xff] }
 0x4c7   : > { %v906_v39 = vpack.c.bf16 %v905_v36, %v905_v36 }
 0x4c9   : > { %v1123_v35 = vpop.xlane.xlu0 %1122 }
 0x4cd   : > { %v908_v37 = vpop.permute.xlu0 %907 }
 0x4ce   : > { %v913_v38 = vsel %vm801_vm6, %v908_v37, 0 }
 0x4cf   : > { %2173 = vmatpush3.bf16.msra.mxu0 %v913_v38 }
 0x4d0   : > { %2184 = vmatprep.subr.bf16.mxu0 %v2364_v8 }
 0x4d2   : > { %2175 = vmatmul.mubr.msk.bf16.vlgmr.msra.gmra.mrb[8].mxu0 %vm737_vm4, %v906_v39 }
 0x4d3   : > { %2186 = vmatprep.mubr.msk.bf16.mxu0 %vm2365_vm1, %v2364_v8 }
 0x4e6   : > { %v1013_v40 = vpop.xlane.xlu1 %1012 }
 0x4e7   : > { %2332 = vrcp.f32 %v1013_v40  ;;  %v2075_v40 = vld [vmem:[%s2769_s10] ss:$0 sm:$0xff] }
 0x4e8   : > { %2334 = vrcp.f32 %v1123_v35 }
 0x4ea   : > { %v1018_v41 = vpop.permute.xlu1 %1017 }
 0x4eb   : > { %v1023_v42 = vsel %vm801_vm6, %v1018_v41, 0 }
 0x4ec   : > { %2185 = vmatpush3.bf16.msra.mxu0 %v1023_v42 }
 0x4ed   : > { %2196 = vmatprep.subr.bf16.mxu0 %v2364_v8 }
 0x4ee   : > { %v1128_v45 = vpop.permute.xlu1 %1127 }
 0x4ef   : > { %v1133_v48 = vsel %vm801_vm6, %v1128_v45, 0 }
 0x4f1   : > { %v2333_v43 = vpop.eup %2332 }
 0x4f2   : > { %v1015_v44 = vmul.f32 %v2333_v43, %v2327_v25  ;;  %v2335_v47 = vpop.eup %2334  ;;  %v2076_v43 = vld [vmem:[%s2770_s11] ss:$0 sm:$0xff] }
 0x4f3   : > { %v1125_v49 = vmul.f32 %v2335_v47, %v2325_v20  ;;  %v2081_v47 = vld [vmem:[%s2774_s15] ss:$0 sm:$0xff] }
 0x4f4   : > { %v1016_v46 = vpack.c.bf16 %v1015_v44, %v1015_v44 }
 0x4f5   : > { %v1126_v50 = vpack.c.bf16 %v1125_v49, %v1125_v49 }
 0x4f6   : > { %2187 = vmatmul.mubr.msk.bf16.vlgmr.msra.gmra.mrb[12].mxu0 %vm737_vm4, %v1016_v46 }
 0x4f7   : > { %2197 = vmatpush3.bf16.msra.mxu0 %v1133_v48  ;;  %2198 = vmatprep.mubr.msk.bf16.mxu0 %vm2365_vm1, %v2364_v8 }
 0x4f8   : > { %2210 = vmatprep.subr.bf16.mxu0 %v2364_v8 }
 0x4fe   : > { %2199 = vmatmul.mubr.msk.bf16.vlgmr.msra.gmra.mrb[16].mxu0 %vm737_vm4, %v1126_v50 }
 0x4ff   : > { %2214 = vmatprep.mubr.msk.bf16.mxu0 %vm2365_vm1, %v2364_v8  ;;  %2211 = vmatpush3.bf16.msra.mxu0 %v2312_v29 }
 0x500   : > { %2212 = vmatprep.subr.bf16.mxu0 %v2364_v8 }
 0x503   : > { %2213 = vmatpush3.bf16.msra.mxu0 %v2313_v31 }
 0x504   : > { %2226 = vmatprep.subr.bf16.mxu0 %v2364_v8 }
 0x594   : > { %v839_v51 = vpop.f32.mrb[4].mxu0 }
 0x595   : > { %v2164_v52 = vpop.f32.mrb[5].mxu0 }
 0x596   : > { %v842_v53 = vpop.f32.mrb[6].mxu0 }
 0x597   : > { %v2165_v54 = vpop.f32.mrb[7].mxu0 }
 0x5a5   : > { %v949_v55 = vpop.f32.mrb[8].mxu0 }
 0x5a6   : > { %1176 = vrot.lane.b32.xlu0 %v949_v55, %s2781_s30  ;;  %v2176_v56 = vpop.f32.mrb[9].mxu0  ;;  %v2077_v55 = vld [vmem:[%s2772_s13] ss:$0 sm:$0xff] }
 0x5a7   : > { %v952_v57 = vpop.f32.mrb[10].mxu0 }
 0x5a8   : > { %v2177_v58 = vpop.f32.mrb[11].mxu0 }
 0x5c9   : > { %v1059_v61 = vpop.f32.mrb[12].mxu0 }
 0x5ca   : > { %1180 = vrot.lane.b32.xlu1 %v1059_v61, %s2780_s21  ;;  %v2188_v62 = vpop.f32.mrb[13].mxu0  ;;  %s2799_s21 = smov 72  }
 0x5cb   : > { %v1062_v63 = vpop.f32.mrb[14].mxu0 }
 0x5cc   : > { %v2189_v1 = vpop.f32.mrb[15].mxu0 }
 0x5d1   : > { %v1169_v2 = vpop.f32.mrb[16].mxu0 }
 0x5d2   : > { %1184 = vrot.lane.b32.xlu0 %v1169_v2, %s2779_s0  ;;  %v2200_v3 = vpop.f32.mrb[17].mxu0  ;;  %s607_s0 = scalar_lea.vmem %s2794_s25, %s2486_s29  ;;  %s2796_s25 = smov 104  }
 0x5d3   : > { %v1172_v4 = vpop.f32.mrb[18].mxu0  ;;  %v621_v28 = vld [vmem:[%s607_s0] sm:$0xff] }
 0x5d4   : > { %v2201_v5 = vpop.f32.mrb[19].mxu0  ;;  %v1368_v32 = vpack.c.bf16 %v621_v28, %v621_v28 }
 0x618   : > { %v1177_v6 = vpop.permute.xlu0 %1176 }
 0x619   : > { %v1187_v9 = vsel %vm737_vm4, %v839_v51, %v1177_v6 }
 0x63c   : > { %v1181_v7 = vpop.permute.xlu1 %1180 }
 0x63d   : > { %v1189_v10 = vsel %vm1188_vm7, %v1187_v9, %v1181_v7  ;;  %v1434_v9 = vlaneseq }
 0x644   : > { %v1185_v11 = vpop.permute.xlu0 %1184 }
 0x645   : > { %v1191_v12 = vsel %vm1190_vm8, %v1189_v10, %v1185_v11  ;;  %v625_v10 = vld [vmem:[%s614_s1] sm:$0x1]  ;;  %v1435_v11 = vshrl.u32 %v1434_v9, 7 }
 0x646   : > { %v1196_v13 = vpack.c.bf16 %v1191_v12, %v1191_v12  ;;  %vm626_vm11 = vcmp.eq.f32.partialorder %v625_v10, 0.0 }
 0x647   : > { %v1436_v12 = vsub.s32 0, %v1435_v11 }
 0x648   : > { %2207 = vmatmul.mubr.msk.bf16.vlgmr.msra.gmra.mrb[16].mxu1 %vm630_vm0, %v1196_v13  ;;  %v627_v13 = vsel %vm626_vm11, -1e+09, %v2364_v8 }
 0x649   : > { %2222 = vmatprep.mubr.msk.bf16.mxu1 %vm2365_vm1, %v2364_v8 }
 0x71b   : > { %v1246_v14 = vpop.f32.mrb[16].mxu1 }
 0x71c   : > { %v1252_v16 = vadd.f32 %v1246_v14, %v2492_v0  ;;  %v2208_v17 = vpop.f32.mrb[17].mxu1  ;;  %v2310_v0 = vld [vmem:[%s2773_s14] sm:$0xff]   ;;  %v1437_v14 = vrot.slane %v627_v13, %v1436_v12 }
 0x71d   : > { %v1249_v18 = vpop.f32.mrb[18].mxu1  ;;  %2219 = vmatpush3.bf16.msra.mxu1 %v2310_v0 }
 0x71e   : > { %v2619_v19 = vadd.f32 %v2074_v15, %v1252_v16  ;;  %v2209_v20 = vpop.f32.mrb[19].mxu1  ;;  %2220 = vmatprep.subr.bf16.mxu1 %v2364_v8 }
 0x720   : > { %v1263_v21 = vsel %vm630_vm0, %v2619_v19, 0.0 }
 0x721   : > { %1264 = vadd.xlane.f32.xlu1 %v1263_v21  ;;  %2221 = vmatpush3.bf16.msra.mxu1 %v2311_v27 }
 0x722   : > { %2232 = vmatprep.subr.bf16.mxu1 %v2364_v8 }
 0x724   : > { %2223 = vmatmul.mubr.msk.bf16.vlgmr.msra.gmra.mrb[20].mxu1 %vm630_vm0, %v1368_v32 }
 0x725   : > { %2234 = vmatprep.mubr.msk.bf16.mxu1 %vm2365_vm1, %v2364_v8 }
 0x7ae   : > { %v1265_v22 = vpop.xlane.xlu1 %1264 }
 0x7af   : > { %v1266_v23 = vmul.f32 0.03125, %v1265_v22 }
 0x7b1   : > { %v1267_v24 = vsub.f32 %v2619_v19, %v1266_v23 }
 0x7b3   : > { %v1268_v25 = vmul.f32 %v1267_v24, %v1267_v24  ;;  %v1279_v41 = vmul.f32 %v2075_v40, %v1267_v24 }
 0x7b5   : > { %v1269_v26 = vsel %vm630_vm0, %v1268_v25, 0.0 }
 0x7b6   : > { %1270 = vadd.xlane.f32.xlu0 %v1269_v26 }
 0x7f7   : > { %v1425_v48 = vpop.f32.mrb[20].mxu1 }
 0x7f8   : > { %v1426_v49 = vadd.f32 %v2081_v47, %v1425_v48  ;;  %v2224_v50 = vpop.f32.mrb[21].mxu1 }
 0x7f9   : > { %v1428_v51 = vpop.f32.mrb[22].mxu1 }
 0x7fa   : > { %v2660_v52 = vpack.c.bf16 %v1426_v49, %v1426_v49  ;;  %v2225_v53 = vpop.f32.mrb[23].mxu1 }
 0x7fc   : > { %1549 = vrot.lane.b32.xlu0 %v2660_v52, %s2366_s19  ;;  %v1443_v54 = vsel %vm737_vm4, %v2660_v52, 0 }
 0x843   : > { %v1271_v33 = vpop.xlane.xlu0 %1270 }
 0x844   : > { %v1272_v34 = vmul.f32 0.032258064, %v1271_v33 }
 0x846   : > { %2336 = vrsqrt.f32 %v1272_v34  ;;  %vm1282_vm9 = vcmp.eq.f32.partialorder %v1272_v34, inf  ;;  %v1285_v36 = vand.u32 2147483648, %v1272_v34  ;;  %vm1284_vm10 = vcmp.eq.f32.partialorder %v1272_v34, 0.0 }
 0x850   : > { %v2337_v30 = vpop.eup %2336 }
 0x851   : > { %v1281_v35 = vmul.f32 %v2337_v30, %v1272_v34 }
 0x853   : > { %v1283_v37 = vsel %vm1282_vm9, %v1272_v34, %v1281_v35 }
 0x854   : > { %v1286_v38 = vsel %vm1284_vm10, %v1285_v36, %v1283_v37 }
 0x855   : > { %v1287_v39 = vadd.f32 1e-06, %v1286_v38 }
 0x857   : > { %2338 = vrcp.f32 %v1287_v39 }
 0x861   : > { %v2339_v42 = vpop.eup %2338 }
 0x862   : > { %v1289_v44 = vmul.f32 %v2339_v42, %v1279_v41 }
 0x864   : > { %v1296_v45 = vadd.f32 %v2076_v43, %v1289_v44 }
 0x866   : > { %v1301_v46 = vpack.c.bf16 %v1296_v45, %v1296_v45 }
 0x868   : > { %2215 = vmatmul.mubr.msk.bf16.vlgmr.msra.gmra.mrb[20].mxu0 %vm630_vm0, %v1301_v46 }
 0x869   : > { %2228 = vmatprep.mubr.msk.bf16.mxu0 %vm2365_vm1, %v2364_v8  ;;  %2227 = vmatpush3.bf16.xpose.msra.mxu0 %v1443_v54 }
 0x86a   : > { %2238 = vmatprep.subr.bf16.mxu0 %v2364_v8 }
 0x86e   : > { %v1550_v59 = vpop.permute.xlu0 %1549 }
 0x86f   : > { %v1555_v63 = vsel %vm737_vm4, %v1550_v59, 0 }
 0x93b   : > { %v1358_v56 = vpop.f32.mrb[20].mxu0 }
 0x93c   : > { %v1359_v57 = vadd.f32 %v2077_v55, %v1358_v56  ;;  %v2216_v58 = vpop.f32.mrb[21].mxu0 }
 0x93d   : > { %v1361_v60 = vpop.f32.mrb[22].mxu0 }
 0x93e   : > { %v1431_v61 = vpack.c.bf16 %v1359_v57, %v1359_v57  ;;  %v2217_v62 = vpop.f32.mrb[23].mxu0 }
 0x940   : > { %1657 = vrot.lane.b32.xlu0 %v1431_v61, %s2795_s24  ;;  %1547 = vrot.lane.b32.xlu1 %v1431_v61, %s2366_s19  ;;  %s2803_s19 = smov 24  }
 0x941   : > { %2229 = vmatmul.mubr.msk.bf16.vlgmr.msra.gmra.mrb[24].mxu0 %vm737_vm4, %v1431_v61 }
 0x942   : > { %2239 = vmatpush3.bf16.xpose.msra.mxu0 %v1555_v63  ;;  %2240 = vmatprep.mubr.msk.bf16.mxu0 %vm2365_vm1, %v2364_v8 }
 0x943   : > { %2250 = vmatprep.subr.bf16.mxu0 %v2364_v8 }
 0x944   : > { %1767 = vrot.lane.b32.xlu0 %v1431_v61, %s2796_s25  ;;  %1659 = vrot.lane.b32.xlu1 %v2660_v52, %s2795_s24 }
 0x948   : > { %1769 = vrot.lane.b32.xlu1 %v2660_v52, %s2796_s25  ;;  %s2802_s25 = smov 16  }
 0x9b2   : > { %v1548_v1 = vpop.permute.xlu1 %1547  ;;  %v1658_v5 = vpop.permute.xlu0 %1657 }
 0x9b3   : > { %2241 = vmatmul.mubr.msk.bf16.vlgmr.msra.gmra.mrb[28].mxu0 %vm737_vm4, %v1548_v1 }
 0x9b4   : > { %2252 = vmatprep.mubr.msk.bf16.mxu0 %vm2365_vm1, %v2364_v8 }
 0x9b6   : > { %v1660_v2 = vpop.permute.xlu1 %1659  ;;  %v1768_v7 = vpop.permute.xlu0 %1767 }
 0x9b7   : > { %v1665_v3 = vsel %vm737_vm4, %v1660_v2, 0 }
 0x9b8   : > { %2251 = vmatpush3.bf16.xpose.msra.mxu0 %v1665_v3 }
 0x9b9   : > { %2262 = vmatprep.subr.bf16.mxu0 %v2364_v8 }
 0x9ba   : > { %v1770_v4 = vpop.permute.xlu1 %1769 }
 0x9bb   : > { %v1775_v6 = vsel %vm737_vm4, %v1770_v4, 0 }
 0x9bf   : > { %2253 = vmatmul.mubr.msk.bf16.vlgmr.msra.gmra.mrb[32].mxu0 %vm737_vm4, %v1658_v5 }
 0x9c0   : > { %2263 = vmatpush3.bf16.xpose.msra.mxu0 %v1775_v6  ;;  %2264 = vmatprep.mubr.msk.bf16.mxu0 %vm2365_vm1, %v2364_v8 }
 0x9c1   : > { %2274 = vmatprep.subr.bf16.mxu0 %v2364_v8 }
 0x9c7   : > { %2265 = vmatmul.mubr.msk.bf16.vlgmr.msra.gmra.mrb[36].mxu0 %vm737_vm4, %v1768_v7 }
 0x9c8   : > { %2278 = vmatprep.mubr.msk.bf16.mxu0 %vm2365_vm1, %v2364_v8 }
 0xa14   : > { %v1479_v15 = vpop.f32.mrb[24].mxu0 }
 0xa15   : > { %v1480_v16 = vadd.f32 %v1479_v15, %v1437_v14  ;;  %v2230_v17 = vpop.f32.mrb[25].mxu0 }
 0xa16   : > { %v1482_v18 = vpop.f32.mrb[26].mxu0 }
 0xa17   : > { %v2231_v20 = vpop.f32.mrb[27].mxu0  ;;  %v1485_v21 = vsel %vm737_vm4, %v1480_v16, -inf }
 0xa18   : > { %1486 = vmax.xlane.f32.xlu1 %v1485_v21 }
 0xa86   : > { %v1591_v22 = vpop.f32.mrb[28].mxu0 }
 0xa87   : > { %v1592_v23 = vadd.f32 %v1591_v22, %v1437_v14  ;;  %v2242_v24 = vpop.f32.mrb[29].mxu0 }
 0xa88   : > { %v1594_v25 = vpop.f32.mrb[30].mxu0 }
 0xa89   : > { %v2243_v26 = vpop.f32.mrb[31].mxu0  ;;  %v1597_v0 = vsel %vm737_vm4, %v1592_v23, -inf }
 0xa8a   : > { %1598 = vmax.xlane.f32.xlu0 %v1597_v0 }
 0xa92   : > { %v1701_v27 = vpop.f32.mrb[32].mxu0 }
 0xa93   : > { %v1702_v28 = vadd.f32 %v1701_v27, %v1437_v14  ;;  %v2254_v29 = vpop.f32.mrb[33].mxu0 }
 0xa94   : > { %v1704_v31 = vpop.f32.mrb[34].mxu0  ;;  %v2314_v29 = vld [vmem:[%s2775_s16] sm:$0xff]  }
 0xa95   : > { %v2255_v32 = vpop.f32.mrb[35].mxu0  ;;  %v1707_v33 = vsel %vm737_vm4, %v1702_v28, -inf  ;;  %2275 = vmatpush3.bf16.msra.mxu0 %v2314_v29  ;;  %v2315_v31 = vld [vmem:[%s2775_s16 + $0x8] sm:$0xff]  }
 0xa96   : > { %1708 = vmax.xlane.f32.xlu0 %v1707_v33  ;;  %2276 = vmatprep.subr.bf16.mxu0 %v2364_v8 }
 0xa99   : > { %2277 = vmatpush3.bf16.msra.mxu0 %v2315_v31 }
 0xa9a   : > { %v1811_v34 = vpop.f32.mrb[36].mxu0 }
 0xa9b   : > { %v1812_v30 = vadd.f32 %v1811_v34, %v1437_v14  ;;  %v2266_v35 = vpop.f32.mrb[37].mxu0 }
 0xa9c   : > { %v1814_v36 = vpop.f32.mrb[38].mxu0 }
 0xa9d   : > { %v2267_v37 = vpop.f32.mrb[39].mxu0  ;;  %v1817_v38 = vsel %vm737_vm4, %v1812_v30, -inf }
 0xa9e   : > { %1818 = vmax.xlane.f32.xlu1 %v1817_v38 }
 0xaa5   : > { %v1487_v39 = vpop.xlane.xlu1 %1486 }
 0xaa6   : > { %v1488_v40 = vsub.f32 %v1480_v16, %v1487_v39 }
 0xaa8   : > { %v1489_v41 = vmul.f32 1.442695, %v1488_v40 }
 0xaaa   : > { %2340 = vpow2.f32 %v1489_v41 }
 0xab4   : > { %v2341_v42 = vpop.eup %2340 }
 0xab5   : > { %v1491_v43 = vsel %vm737_vm4, %v2341_v42, 0.0 }
 0xab6   : > { %1492 = vadd.xlane.f32.xlu0 %v1491_v43 }
 0xb17   : > { %v1599_v44 = vpop.xlane.xlu0 %1598 }
 0xb18   : > { %v1600_v45 = vsub.f32 %v1592_v23, %v1599_v44 }
 0xb1a   : > { %v1601_v46 = vmul.f32 1.442695, %v1600_v45 }
 0xb1c   : > { %2342 = vpow2.f32 %v1601_v46  ;;  %v2096_v46 = vld [vmem:[%s2776_s17] ss:$0 sm:$0xff] }
 0xb23   : > { %v1709_v47 = vpop.xlane.xlu0 %1708 }
 0xb24   : > { %v1710_v48 = vsub.f32 %v1702_v28, %v1709_v47 }
 0xb26   : > { %v2343_v49 = vpop.eup %2342  ;;  %v1711_v50 = vmul.f32 1.442695, %v1710_v48 }
 0xb27   : > { %v1603_v51 = vsel %vm737_vm4, %v2343_v49, 0.0 }
 0xb28   : > { %2344 = vpow2.f32 %v1711_v50  ;;  %1604 = vadd.xlane.f32.xlu1 %v1603_v51 }
 0xb2b   : > { %v1819_v55 = vpop.xlane.xlu1 %1818 }
 0xb2c   : > { %v1820_v56 = vsub.f32 %v1812_v30, %v1819_v55 }
 0xb2e   : > { %v1821_v57 = vmul.f32 1.442695, %v1820_v56 }
 0xb30   : > { %2346 = vpow2.f32 %v1821_v57 }
 0xb32   : > { %v2345_v53 = vpop.eup %2344 }
 0xb33   : > { %v1713_v54 = vsel %vm737_vm4, %v2345_v53, 0.0 }
 0xb34   : > { %1714 = vadd.xlane.f32.xlu0 %v1713_v54 }
 0xb39   : > { %1609 = vrot.lane.b32.xlu1 %v2660_v52, %s2797_s28 }
 0xb3a   : > { %v2347_v58 = vpop.eup %2346 }
 0xb3b   : > { %v1823_v59 = vsel %vm737_vm4, %v2347_v58, 0.0 }
 0xb43   : > { %v1493_v60 = vpop.xlane.xlu0 %1492 }
 0xb44   : > { %2348 = vrcp.f32 %v1493_v60 }
 0xb4a   : > { %1498 = vrot.lane.b32.xlu0 %v2660_v52, %s2798_s20 }
 0xb4e   : > { %1829 = vrot.lane.b32.xlu0 %v2660_v52, %s2799_s21  ;;  %v2349_v62 = vpop.eup %2348  ;;  %s618_s21 = scalar_lea.vmem %s2777_s18, %s2486_s29 }
 0xb4f   : > { %v1495_v1 = vmul.f32 %v2349_v62, %v2341_v42 }
 0xb51   : > { %v1496_v5 = vpack.c.bf16 %v1495_v1, %v1495_v1 }
 0xb5d   : > { %1824 = vadd.xlane.f32.xlu1 %v1823_v59 }
 0xb6e   : > { %1719 = vrot.lane.b32.xlu1 %v2660_v52, %s2800_s22 }
 0xbb5   : > { %v1605_v61 = vpop.xlane.xlu1 %1604 }
 0xbb6   : > { %2350 = vrcp.f32 %v1605_v61 }
 0xbb9   : > { %v1610_v4 = vpop.permute.xlu1 %1609 }
 0xbba   : > { %v1615_v7 = vsel %vm801_vm6, %v1610_v4, 0 }
 0xbc0   : > { %v2351_v6 = vpop.eup %2350 }
 0xbc1   : > { %v1715_v63 = vpop.xlane.xlu0 %1714  ;;  %v1607_v52 = vmul.f32 %v2351_v6, %v2343_v49 }
 0xbc2   : > { %2352 = vrcp.f32 %v1715_v63 }
 0xbc3   : > { %v1608_v9 = vpack.c.bf16 %v1607_v52, %v1607_v52 }
 0xbc5   : > { %v1499_v2 = vpop.permute.xlu0 %1498 }
 0xbc6   : > { %v1504_v3 = vsel %vm801_vm6, %v1499_v2, 0 }
 0xbc7   : > { %2233 = vmatpush3.bf16.msra.mxu1 %v1504_v3 }
 0xbc8   : > { %2244 = vmatprep.subr.bf16.mxu1 %v2364_v8 }
 0xbc9   : > { %v1830_v15 = vpop.permute.xlu0 %1829 }
 0xbca   : > { %2235 = vmatmul.mubr.msk.bf16.vlgmr.msra.gmra.mrb[24].mxu1 %vm737_vm4, %v1496_v5  ;;  %v1835_v17 = vsel %vm801_vm6, %v1830_v15, 0 }
 0xbcb   : > { %2245 = vmatpush3.bf16.msra.mxu1 %v1615_v7  ;;  %2246 = vmatprep.mubr.msk.bf16.mxu1 %vm2365_vm1, %v2364_v8 }
 0xbcc   : > { %2256 = vmatprep.subr.bf16.mxu1 %v2364_v8  ;;  %v2353_v10 = vpop.eup %2352 }
 0xbcd   : > { %v1717_v12 = vmul.f32 %v2353_v10, %v2345_v53 }
 0xbcf   : > { %v1718_v16 = vpack.c.bf16 %v1717_v12, %v1717_v12 }
 0xbd2   : > { %2247 = vmatmul.mubr.msk.bf16.vlgmr.msra.gmra.mrb[28].mxu1 %vm737_vm4, %v1608_v9 }
 0xbd3   : > { %2258 = vmatprep.mubr.msk.bf16.mxu1 %vm2365_vm1, %v2364_v8 }
 0xbea   : > { %v1825_v11 = vpop.xlane.xlu1 %1824 }
 0xbeb   : > { %2354 = vrcp.f32 %v1825_v11 }
 0xbee   : > { %v1720_v13 = vpop.permute.xlu1 %1719 }
 0xbef   : > { %v1725_v14 = vsel %vm801_vm6, %v1720_v13, 0 }
 0xbf0   : > { %2257 = vmatpush3.bf16.msra.mxu1 %v1725_v14 }
 0xbf1   : > { %2268 = vmatprep.subr.bf16.mxu1 %v2364_v8 }
 0xbf3   : > { %2259 = vmatmul.mubr.msk.bf16.vlgmr.msra.gmra.mrb[32].mxu1 %vm737_vm4, %v1718_v16 }
 0xbf4   : > { %2269 = vmatpush3.bf16.msra.mxu1 %v1835_v17  ;;  %2270 = vmatprep.mubr.msk.bf16.mxu1 %vm2365_vm1, %v2364_v8 }
 0xbf5   : > { %v2355_v18 = vpop.eup %2354 }
 0xbf6   : > { %v1827_v20 = vmul.f32 %v2355_v18, %v2347_v58 }
 0xbf8   : > { %v1828_v21 = vpack.c.bf16 %v1827_v20, %v1827_v20 }
 0xbfb   : > { %2271 = vmatmul.mubr.msk.bf16.vlgmr.msra.gmra.mrb[36].mxu1 %vm737_vm4, %v1828_v21 }
 0xc9d   : > { %v1540_v22 = vpop.f32.mrb[24].mxu1 }
 0xc9e   : > { %v2236_v23 = vpop.f32.mrb[25].mxu1 }
 0xc9f   : > { %v1543_v24 = vpop.f32.mrb[26].mxu1 }
 0xca0   : > { %v2237_v25 = vpop.f32.mrb[27].mxu1 }
 0xca5   : > { %v1651_v26 = vpop.f32.mrb[28].mxu1 }
 0xca6   : > { %1878 = vrot.lane.b32.xlu1 %v1651_v26, %s2801_s2  ;;  %v2248_v0 = vpop.f32.mrb[29].mxu1 }
 0xca7   : > { %v1654_v27 = vpop.f32.mrb[30].mxu1 }
 0xca8   : > { %v2249_v28 = vpop.f32.mrb[31].mxu1 }
 0xcc6   : > { %v1761_v32 = vpop.f32.mrb[32].mxu1 }
 0xcc7   : > { %1882 = vrot.lane.b32.xlu0 %v1761_v32, %s2802_s25  ;;  %v2260_v33 = vpop.f32.mrb[33].mxu1 }
 0xcc8   : > { %v1764_v34 = vpop.f32.mrb[34].mxu1 }
 0xcc9   : > { %v2261_v30 = vpop.f32.mrb[35].mxu1 }
 0xcce   : > { %v1871_v35 = vpop.f32.mrb[36].mxu1 }
 0xccf   : > { %1886 = vrot.lane.b32.xlu1 %v1871_v35, %s2803_s19  ;;  %v2272_v36 = vpop.f32.mrb[37].mxu1 }
 0xcd0   : > { %v1874_v37 = vpop.f32.mrb[38].mxu1 }
 0xcd1   : > { %v2273_v38 = vpop.f32.mrb[39].mxu1 }
 0xd18   : > { %v1879_v39 = vpop.permute.xlu1 %1878 }
 0xd19   : > { %v1889_v40 = vsel %vm737_vm4, %v1540_v22, %v1879_v39 }
 0xd39   : > { %v1883_v8 = vpop.permute.xlu0 %1882 }
 0xd3a   : > { %v1890_v41 = vsel %vm1188_vm7, %v1889_v40, %v1883_v8 }
 0xd41   : > { %v1887_v42 = vpop.permute.xlu1 %1886 }
 0xd42   : > { %v1891_v43 = vsel %vm1190_vm8, %v1890_v41, %v1887_v42 }
 0xd43   : > { %v1896_v44 = vpack.c.bf16 %v1891_v43, %v1891_v43 }
 0xd45   : > { %2279 = vmatmul.mubr.msk.bf16.vlgmr.msra.gmra.mrb[40].mxu0 %vm630_vm0, %v1896_v44 }
 0xe18   : > { %v1946_v45 = vpop.f32.mrb[40].mxu0 }
 0xe19   : > { %v1952_v47 = vadd.f32 %v1946_v45, %v2619_v19  ;;  %v2280_v48 = vpop.f32.mrb[41].mxu0 }
 0xe1a   : > { %v1949_v49 = vpop.f32.mrb[42].mxu0 }
 0xe1b   : > { %v1960_v50 = vadd.f32 %v2096_v46, %v1952_v47  ;;  %v2281_v51 = vpop.f32.mrb[43].mxu0 }
 0xe1d   : > { %1961 = vst.msk [vmem:[%s618_s21] sm:$0xff] %vm630_vm0, %v1960_v50 }
 0xe1e PF: > { %s28_s27 = sadd.s32 1, %s2362_s27  }
 0xe1f   : > { %p25_p4 = scmp.ge.s32.totalorder %s28_s27, 4  }
 0xe21   :  { %27 = sbr.rel (!%p25_p4) target bundleno = 4 (0x4), region = 131 }

// kernel: decoder_forward.5
= control target key start
LH: loop header
LB: loop body
LE: loop exit
PB: predicated region body
PF: predicated region fallthrough
CT: control target
= control target key end

     0   :  { %s3088_s0 = inlined_call_operand.vmem [shape: f32[2,8,32], index: 0, kind: input, shape index: {}, may-alias: {0,18}]   ;;  %s3089_s1 = inlined_call_operand.vmem [shape: f32[2,8,32], index: 1, kind: input, shape index: {}]   ;;  %s3090_s2 = inlined_call_operand.hbm [shape: f32[2,8,8], index: 2, kind: input, shape index: {}]   ;;  %s3091_s3 = inlined_call_operand.hbm [shape: f32[2,1,8], index: 3, kind: input, shape index: {}]   ;;  %s3092_s4 = inlined_call_operand.vmem [shape: f32[1,32], index: 4, kind: input, shape index: {}]   ;;  %s3093_s5 = inlined_call_operand.vmem [shape: f32[1,32], index: 5, kind: input, shape index: {}]   ;;  %s3094_s6 = inlined_call_operand.vmem [shape: bf16[32,96], index: 6, kind: input, shape index: {}]   ;;  %s3095_s7 = inlined_call_operand.vmem [shape: f32[1,96], index: 7, kind: input, shape index: {}]   ;;  %s3096_s8 = inlined_call_operand.vmem [shape: bf16[32,32], index: 8, kind: input, shape index: {}]   ;;  %s3097_s9 = inlined_call_operand.vmem [shape: f32[1,32], index: 9, kind: input, shape index: {}]   ;;  %s3098_s10 = inlined_call_operand.vmem [shape: f32[1,32], index: 10, kind: input, shape index: {}]   ;;  %s3099_s11 = inlined_call_operand.vmem [shape: f32[1,32], index: 11, kind: input, shape index: {}]   ;;  %s3100_s12 = inlined_call_operand.vmem [shape: bf16[32,32], index: 12, kind: input, shape index: {}]   ;;  %s3101_s13 = inlined_call_operand.vmem [shape: f32[1,32], index: 13, kind: input, shape index: {}]   ;;  %s3102_s14 = inlined_call_operand.vmem [shape: bf16[32,64], index: 14, kind: input, shape index: {}]   ;;  %s3103_s15 = inlined_call_operand.vmem [shape: f32[1,64], index: 15, kind: input, shape index: {}]   ;;  %s3104_s16 = inlined_call_operand.vmem [shape: bf16[32,32], index: 16, kind: input, shape index: {}]   ;;  %s3105_s17 = inlined_call_operand.vmem [shape: f32[1,32], index: 17, kind: input, shape index: {}]   ;;  %s3106_s18 = inlined_call_operand.vmem [shape: f32[2,8,32], index: 18, kind: output, shape index: {}, may-alias: {0,18}]  }
   0x1   :  { %3120 = sst [smem:[#allocation11_spill]] %s3088_s0 }
   0x2   :  { %3121 = sst [smem:[#allocation12_spill]] %s3089_s1 }
   0x3   :  { %3122 = sst [smem:[#allocation13_spill]] %s3090_s2 }
   0x4   :  { %3123 = sst [smem:[#allocation14_spill]] %s3105_s17 }
   0x5   :  { %3124 = sst [smem:[#allocation15_spill]] %s3106_s18 }
   0x6   :  { %23 = vsyncpa [#allocation3], 0 }
   0x7   :  { %25 = vsyncpa [#allocation3 + $0x1], 0 }
   0x8   :  { %26 = vsyncpa [#allocation5], 0 }
   0x9   :  { %28 = vsyncpa [#allocation5 + $0x1], 0  ;;  %s2670_s27 = smov 0   ;;  %s2672_s28 = smov 0  }
   0xa   :  { %s2674_s29 = smov 0   ;;  %s2676_s30 = smov 0  }
   0xb LB: > { %3125 = sst [smem:[#allocation8_spill]] %s2551_s29  ;;  %s2689_s0 = sadd.s32 4294967295, %s2555_s30   ;;  %s2555_s30 = sphi %s2676_s30, %s3148_s30   ;;  %s2551_s29 = sphi %s2674_s29, %s3150_s29   ;;  %s2547_s28 = sphi %s2672_s28, %s3152_s28   ;;  %s2543_s27 = sphi %s2670_s27, %s3151_s27  }
   0xc   : > { %s2692_s19 = sadd.s32 1, %s2555_s30   ;;  %s93_s20 = sadd.s32 1, %s2551_s29 }
   0xd   : > { %3126 = sst [smem:[#allocation9_spill]] %s2692_s19  ;;  %s90_s1 = ssub.s32 %s2555_s30, %s2692_s19 }
   0xe   : > { %p91_p0 = scmp.eq.s32.totalorder %s90_s1, 0  ;;  %p100_p1 = scmp.ne.s32.totalorder %s2551_s29, %s2547_s28 }
   0xf   : > { %p101_p2 = scmp.eq.s32.totalorder %s2555_s30, 0  ;;  %p106_p3 = scmp.ne.s32.totalorder %s2547_s28, %s2543_s27 }
  0x10   : > { %s2702_s21 = scalar_select %p91_p0, %s2551_s29, %s93_s20  }
  0x11   : > { %p102_p4 = por %p101_p2, %p100_p1  ;;  %p107_p5 = scmp.eq.s32.totalorder %s2689_s0, 0 }
  0x12   : > { %3127 = sst [smem:[#allocation10_spill]] %s2702_s21  ;;  %p2358_p6 = scmp.lt.s32.totalorder %s2555_s30, 2 }
  0x13   : > { %p2706_p7 = por %p107_p5, %p106_p3  ;;  %s2711_s2 = sand.u32 1, %s2551_s29  }
  0x14   : > { %s2114_s23 = sshll.u32 %s2711_s2, 3  ;;  %s2115_s24 = sshll.u32 %s2555_s30, 7 }
  0x15   : > { %s3128_s22 = scalar_select %p2706_p7, 1, 0 }
  0x16   : > { %s3129_s1 = sld [smem:[#allocation13_spill]]  ;;  %s536_s27 = scalar_lea.vmem [#allocation2], %s2114_s23 }
  0x17   : > { %s543_s20 = sshll.u32 %s536_s27, 4  ;;  %p2722_p8 = pnand %p2358_p6, %p102_p4  ;;  %s2720_s20 = int_to_ptr.vmem [resolvable:$true] %s543_s20 }
  0x18   : > { %s533_s29 = scalar_lea.sflag [#allocation3], %s2711_s2 }
  0x19   : > { %p2459_p12 = pneg %p2722_p8 }
  0x1c   : > { %s2718_s19 = scalar_lea.hbm %s3129_s1, %s2115_s24  ;;  %s2462_s26 = scalar_lea.hbm %s3129_s1, 256 }
  0x1d   : > { %s2457_s25 = scalar_lea.hbm %s2718_s19, 128  ;;  %p2463_p1 = scmp.lt.u32.totalorder %s2718_s19, %s3129_s1 }
  0x1e   : > { %p2458_p11 = scmp.ne.s32.totalorder %s2718_s19, %s2457_s25  ;;  %p2464_p2 = scmp.lt.u32.totalorder %s2462_s26, %s2457_s25 }
  0x1f   : > { %p2466_p4 = scmp.lt.u32.totalorder %s2457_s25, %s2718_s19 }
  0x20   : > { %p2460_p13 = pnand %p2459_p12, %p2458_p11  ;;  %p2465_p3 = por %p2464_p2, %p2463_p1 }
  0x22   : > { %p2461_p0 = pneg %p2460_p13  ;;  %p2467_p5 = por %p2466_p4, %p2465_p3 }
  0x24   : > { %p2468_p6 = pnand %p2467_p5, %p2461_p0 }
  0x26   : > { %2471 = shalt.err (!%p2468_p6)
}
  0x27   : > { %s2472_s17 = scalar_lea.vmem %s2720_s20, 128  ;;  %s2557_s23 = smov [#allocation2]  }
  0x28   : > { %p2473_p11 = scmp.ne.s32.totalorder %s2720_s20, %s2472_s17  ;;  %s2477_s24 = sshll.u32 %s2557_s23, 4  ;;  %s2478_s24 = int_to_ptr.vmem [resolvable:$false] %s2477_s24 }
  0x29   : > { %s2479_s18 = scalar_lea.vmem %s2478_s24, 256  ;;  %p2480_p10 = scmp.lt.s32.totalorder %s2720_s20, %s2478_s24 }
  0x2a   : > { %p2475_p13 = pnand %p2473_p11, %p2459_p12  ;;  %p2481_p1 = scmp.lt.s32.totalorder %s2479_s18, %s2472_s17 }
  0x2c   : > { %p2476_p9 = pneg %p2475_p13  ;;  %p2482_p2 = por %p2481_p1, %p2480_p10 }
  0x2e   : > { %p2483_p3 = pnand %p2482_p2, %p2476_p9 }
  0x30   : > { %2486 = shalt.err (!%p2483_p3)
}
  0x31   : > { %2354 = dma.hbm_to_vmem [thread:$0]  (!%p2722_p8), %s2718_s19, 128, %s2720_s20, %s533_s29  }
  0x32   : > { %p3131_p0 = scmp.lt.s32.totalorder %s2555_s30, 3  ;;  %p3132_p4 = scmp.ge.s32.totalorder %s2555_s30, 1 }
  0x33   : > { %s2116_s17 = sshll.u32 %s2555_s30, 4  ;;  %s553_s26 = scalar_lea.vmem [#allocation4], %s2711_s2 }
  0x34   : > { %p2758_p5 = pnand %p3132_p4, %p3131_p0  ;;  %s560_s27 = sshll.u32 %s553_s26, 4  ;;  %s561_s27 = int_to_ptr.vmem [resolvable:$true] %s560_s27 }
  0x35   : > { %s2767_s18 = scalar_lea.hbm %s3091_s3, %s2116_s17  ;;  %s551_s29 = scalar_lea.sflag [#allocation5], %s2711_s2 }
  0x36   : > { %s3133_s25 = scalar_select %p2758_p5, 1, 0 }
  0x37   : > { %s2487_s19 = scalar_lea.hbm %s2767_s18, 16  ;;  %s2492_s26 = scalar_lea.hbm %s3091_s3, 32 }
  0x38   : > { %p2488_p9 = scmp.ne.s32.totalorder %s2767_s18, %s2487_s19  ;;  %p2493_p11 = scmp.lt.u32.totalorder %s2767_s18, %s3091_s3 }
  0x39   : > { %p2494_p13 = scmp.lt.u32.totalorder %s2492_s26, %s2487_s19  ;;  %p2496_p2 = scmp.lt.u32.totalorder %s2487_s19, %s2767_s18 }
  0x3a   : > { %p2490_p10 = pnand %p2488_p9, %p2459_p12 }
  0x3b   : > { %p2495_p1 = por %p2494_p13, %p2493_p11 }
  0x3c   : > { %p2491_p6 = pneg %p2490_p10 }
  0x3d   : > { %p2497_p3 = por %p2496_p2, %p2495_p1 }
  0x3f   : > { %p2498_p0 = pnand %p2497_p3, %p2491_p6 }
  0x41   : > { %2501 = shalt.err (!%p2498_p0)
}
  0x42   : > { %s2502_s2 = scalar_lea.vmem %s561_s27, 16  ;;  %s2558_s17 = smov [#allocation4]  }
  0x43   : > { %p2503_p4 = scmp.ne.s32.totalorder %s561_s27, %s2502_s2  ;;  %s2507_s24 = sshll.u32 %s2558_s17, 4  ;;  %s2508_s24 = int_to_ptr.vmem [resolvable:$false] %s2507_s24 }
  0x44   : > { %s2509_s30 = scalar_lea.vmem %s2508_s24, 32  ;;  %p2510_p7 = scmp.lt.s32.totalorder %s561_s27, %s2508_s24 }
  0x45   : > { %p2505_p9 = pnand %p2503_p4, %p2459_p12  ;;  %p2511_p5 = scmp.lt.s32.totalorder %s2509_s30, %s2502_s2 }
  0x47   : > { %p2506_p10 = pneg %p2505_p9  ;;  %p2512_p11 = por %p2511_p5, %p2510_p7 }
  0x49   : > { %p2513_p13 = pnand %p2512_p11, %p2506_p10 }
  0x4b   : > { %2516 = shalt.err (!%p2513_p13)
}
  0x4c   : > { %2357 = dma.hbm_to_vmem [thread:$0]  (!%p2722_p8), %s2767_s18, 16, %s561_s27, %s551_s29  }
  0x4d   : > { %p3134_p6 = scmp.ne.s32.totalorder %s3133_s25, 0 }
  0x4e   : > { %s2792_s1 = sand.u32 (!%p3134_p6), 1, %s2547_s28   ;;  %p3135_p7 = scmp.ne.s32.totalorder (!%p3134_p6), %s3128_s22, 0 }
  0x4f   : > { %569 = sbr.rel (%p3134_p6) target bundleno = 3691 (0xe6b), region = 92  ;;  %s2118_s19 = sshll.u32 (!%p3134_p6), %s2792_s1, 3 }
  0x50   : > { %s572_s20 = scalar_lea.sflag (!%p3134_p6), [#allocation3], %s2792_s1  ;;  %s2796_s26 = scalar_lea.vmem (!%p3134_p6), [#allocation2], %s2118_s19 }
  0x56   : > { %2534 = dma.done.wait (%p3135_p7), %s572_s20, 128  }
  0x57   : > { %2536 = vsyncadd (%p3135_p7), %s572_s20, 4294967168  ;;  %s581_s21 = scalar_lea.sflag [#allocation5], %s2792_s1 }
  0x58   : > { %2538 = dma.done.wait (%p3135_p7), %s581_s21, 16  }
  0x59   : > { %2540 = vsyncadd (%p3135_p7), %s581_s21, 4294967280  ;;  %p647_p8 = scmp.lt.s32.totalorder %s2689_s0, 1  ;;  %s3136_s23 = sld [smem:[#allocation11_spill]]  ;;  %vm670_vm0 = vcmask 261120   ;;  %v2407_v7 = vld [vmem:[%s3094_s6] sm:$0xff]   ;;  %v2559_v8 = vmov 0.0  }
  0x5a   : > { %2211 = vmatprep.subr.bf16.mxu0 %v2559_v8  ;;  %vm2560_vm1 = vmmov 0   ;;  %v2408_v9 = vld [vmem:[%s3094_s6 + $0x8] sm:$0xff]   ;;  %2219 = vmatprep.subr.bf16.mxu1 %v2559_v8  ;;  %v2122_v18 = vld [vmem:[%s3092_s4] ss:$0 sm:$0xff]  ;;  %s3116_s22 = smov 80   ;;  %s2565_s17 = smov 112  }
  0x5b   : > { %s3154_s0 = smov (!%p647_p8, %s2689_s0), 1  ;;  %2215 = vmatprep.mubr.msk.bf16.mxu0 %vm2560_vm1, %v2559_v8  ;;  %2212 = vmatpush3.bf16.msra.mxu0 %v2407_v7  ;;  %v2123_v21 = vld [vmem:[%s3093_s5] ss:$0 sm:$0xff]  ;;  %s3117_s24 = smov 72   ;;  %vm777_vm4 = vcmask 64512   ;;  %vm841_vm6 = vcmask 1043456  }
  0x5c   : > { %s2810_s27 = sshll.u32 %s3154_s0, 3  ;;  %2213 = vmatprep.subr.bf16.mxu0 %v2559_v8  ;;  %2221 = vmatprep.mubr.msk.bf16.mxu1 %vm2560_vm1, %v2559_v8  ;;  %v2124_v25 = vld [vmem:[%s3095_s7] ss:$0 sm:$0xff]  ;;  %s3119_s0 = smov 88   ;;  %vm1228_vm7 = vcmask 130048   ;;  %vm1230_vm8 = vcmask 195584  }
  0x5d   : > { %s2567_s30 = smov 104   ;;  %v662_v43 = vld [vmem:[%s2796_s26] sm:$0xff]  ;;  %s2568_s26 = smov 64  }
  0x5e   : > { %vm663_vm5 = vcmp.eq.f32.partialorder %v662_v43, 0.0  ;;  %s2569_s19 = smov 56   ;;  %s2570_s20 = smov 48  }
  0x5f   : > { %s650_s2 = scalar_lea.vmem %s3136_s23, %s2810_s27  ;;  %2214 = vmatpush3.bf16.msra.mxu0 %v2408_v9  ;;  %s2561_s23 = smov 120   ;;  %v664_v44 = vsel %vm663_vm5, -1e+09, %v2559_v8 }
  0x60   : > { %v2816_v0 = vld [vmem:[%s650_s2] sm:$0xff]  ;;  %2225 = vmatprep.subr.bf16.mxu0 %v2559_v8  ;;  %s3118_s2 = smov 96   ;;  %s2571_s21 = smov 40  }
  0x61   : > { %v671_v1 = vsel %vm670_vm0, %v2816_v0, 0.0  ;;  %s3115_s18 = smov 8   ;;  %s3113_s29 = smov 24  }
  0x62   : > { %672 = vadd.xlane.f32.xlu0 %v671_v1 }
  0xef   : > { %v673_v2 = vpop.xlane.xlu0 %672 }
  0xf0   : > { %v675_v3 = vmul.f32 0.03125, %v673_v2 }
  0xf2   : > { %v676_v4 = vsub.f32 %v2816_v0, %v675_v3 }
  0xf4   : > { %v677_v5 = vmul.f32 %v676_v4, %v676_v4  ;;  %v688_v19 = vmul.f32 %v2122_v18, %v676_v4 }
  0xf6   : > { %v678_v6 = vsel %vm670_vm0, %v677_v5, 0.0 }
  0xf7   : > { %679 = vadd.xlane.f32.xlu0 %v678_v6 }
 0x184   : > { %v680_v10 = vpop.xlane.xlu0 %679 }
 0x185   : > { %v681_v11 = vmul.f32 0.032258064, %v680_v10 }
 0x187   : > { %2417 = vrsqrt.f32 %v681_v11  ;;  %vm691_vm2 = vcmp.eq.f32.partialorder %v681_v11, inf  ;;  %v694_v14 = vand.u32 2147483648, %v681_v11  ;;  %vm693_vm3 = vcmp.eq.f32.partialorder %v681_v11, 0.0 }
 0x191   : > { %v2418_v12 = vpop.eup %2417 }
 0x192   : > { %v690_v13 = vmul.f32 %v2418_v12, %v681_v11 }
 0x194   : > { %v692_v15 = vsel %vm691_vm2, %v681_v11, %v690_v13 }
 0x195   : > { %v695_v16 = vsel %vm693_vm3, %v694_v14, %v692_v15 }
 0x196   : > { %v696_v17 = vadd.f32 1e-06, %v695_v16 }
 0x198   : > { %2419 = vrcp.f32 %v696_v17 }
 0x1a2   : > { %v2420_v20 = vpop.eup %2419 }
 0x1a3   : > { %v698_v22 = vmul.f32 %v2420_v20, %v688_v19 }
 0x1a5   : > { %v705_v23 = vadd.f32 %v2123_v21, %v698_v22 }
 0x1a7   : > { %v710_v24 = vpack.c.bf16 %v705_v23, %v705_v23 }
 0x1a9   : > { %2216 = vmatmul.mubr.msk.bf16.vlgmr.msra.gmra.mrb[0].mxu0 %vm670_vm0, %v710_v24 }
 0x1aa   : > { %2227 = vmatprep.mubr.msk.bf16.mxu0 %vm2560_vm1, %v2559_v8 }
 0x27c   : > { %v767_v26 = vpop.f32.mrb[0].mxu0 }
 0x27d   : > { %v768_v27 = vadd.f32 %v2124_v25, %v767_v26  ;;  %v2217_v28 = vpop.f32.mrb[1].mxu0 }
 0x27e   : > { %v770_v29 = vpop.f32.mrb[2].mxu0 }
 0x27f   : > { %v2848_v30 = vpack.c.bf16 %v768_v27, %v768_v27  ;;  %v2218_v31 = vpop.f32.mrb[3].mxu0 }
 0x281   : > { %885 = vrot.lane.b32.xlu0 %v2848_v30, %s2561_s23  ;;  %775 = vrot.lane.b32.xlu1 %v2848_v30, %s3118_s2 }
 0x285   : > { %887 = vrot.lane.b32.xlu1 %v2848_v30, %s3119_s0 }
 0x289   : > { %997 = vrot.lane.b32.xlu1 %v2848_v30, %s3116_s22  ;;  %s3144_s22 = smov 16  }
 0x28d   : > { %995 = vrot.lane.b32.xlu1 %v2848_v30, %s2565_s17 }
 0x291   : > { %1107 = vrot.lane.b32.xlu1 %v2848_v30, %s3117_s24  ;;  %s3145_s24 = smov 24  }
 0x295   : > { %1105 = vrot.lane.b32.xlu1 %v2848_v30, %s2567_s30 }
 0x2f3   : > { %v776_v32 = vpop.permute.xlu1 %775  ;;  %v886_v37 = vpop.permute.xlu0 %885 }
 0x2f4   : > { %v782_v33 = vsel %vm777_vm4, %v776_v32, 0 }
 0x2f5   : > { %2220 = vmatpush3.bf16.xpose.msra.mxu1 %v782_v33 }
 0x2f6   : > { %2231 = vmatprep.subr.bf16.mxu1 %v2559_v8 }
 0x2f7   : > { %v888_v34 = vpop.permute.xlu1 %887 }
 0x2f8   : > { %v893_v35 = vsel %vm777_vm4, %v888_v34, 0 }
 0x2fb   : > { %v998_v36 = vpop.permute.xlu1 %997 }
 0x2fc   : > { %2222 = vmatmul.mubr.msk.bf16.vlgmr.msra.gmra.mrb[0].mxu1 %vm777_vm4, %v2848_v30  ;;  %v1003_v39 = vsel %vm777_vm4, %v998_v36, 0 }
 0x2fd   : > { %2232 = vmatpush3.bf16.xpose.msra.mxu1 %v893_v35  ;;  %2233 = vmatprep.mubr.msk.bf16.mxu1 %vm2560_vm1, %v2559_v8 }
 0x2fe   : > { %2243 = vmatprep.subr.bf16.mxu1 %v2559_v8 }
 0x2ff   : > { %v996_v38 = vpop.permute.xlu1 %995 }
 0x303   : > { %v1108_v40 = vpop.permute.xlu1 %1107 }
 0x304   : > { %2234 = vmatmul.mubr.msk.bf16.vlgmr.msra.gmra.mrb[4].mxu1 %vm777_vm4, %v886_v37  ;;  %v1113_v41 = vsel %vm777_vm4, %v1108_v40, 0 }
 0x305   : > { %2244 = vmatpush3.bf16.xpose.msra.mxu1 %v1003_v39  ;;  %2245 = vmatprep.mubr.msk.bf16.mxu1 %vm2560_vm1, %v2559_v8 }
 0x306   : > { %2255 = vmatprep.subr.bf16.mxu1 %v2559_v8 }
 0x307   : > { %v1106_v42 = vpop.permute.xlu1 %1105 }
 0x30c   : > { %2246 = vmatmul.mubr.msk.bf16.vlgmr.msra.gmra.mrb[8].mxu1 %vm777_vm4, %v996_v38 }
 0x30d   : > { %2256 = vmatpush3.bf16.xpose.msra.mxu1 %v1113_v41  ;;  %2257 = vmatprep.mubr.msk.bf16.mxu1 %vm2560_vm1, %v2559_v8 }
 0x30e   : > { %2267 = vmatprep.subr.bf16.mxu1 %v2559_v8 }
 0x314   : > { %2258 = vmatmul.mubr.msk.bf16.vlgmr.msra.gmra.mrb[12].mxu1 %vm777_vm4, %v1106_v42 }
 0x315   : > { %2271 = vmatprep.mubr.msk.bf16.mxu1 %vm2560_vm1, %v2559_v8 }
 0x3cf   : > { %v818_v45 = vpop.f32.mrb[0].mxu1 }
 0x3d0   : > { %v819_v46 = vadd.f32 %v818_v45, %v664_v44  ;;  %v2223_v47 = vpop.f32.mrb[1].mxu1 }
 0x3d1   : > { %v821_v48 = vpop.f32.mrb[2].mxu1 }
 0x3d2   : > { %v2224_v49 = vpop.f32.mrb[3].mxu1  ;;  %v824_v50 = vsel %vm777_vm4, %v819_v46, -inf }
 0x3d3   : > { %825 = vmax.xlane.f32.xlu1 %v824_v50 }
 0x3d7   : > { %v929_v51 = vpop.f32.mrb[4].mxu1 }
 0x3d8   : > { %v930_v52 = vadd.f32 %v929_v51, %v664_v44  ;;  %v2235_v53 = vpop.f32.mrb[5].mxu1 }
 0x3d9   : > { %v932_v54 = vpop.f32.mrb[6].mxu1 }
 0x3da   : > { %v2236_v55 = vpop.f32.mrb[7].mxu1  ;;  %v935_v56 = vsel %vm777_vm4, %v930_v52, -inf }
 0x3db   : > { %936 = vmax.xlane.f32.xlu0 %v935_v56 }
 0x3df   : > { %v1039_v57 = vpop.f32.mrb[8].mxu1 }
 0x3e0   : > { %v1040_v58 = vadd.f32 %v1039_v57, %v664_v44  ;;  %v2247_v59 = vpop.f32.mrb[9].mxu1 }
 0x3e1   : > { %v1042_v60 = vpop.f32.mrb[10].mxu1  ;;  %v2409_v59 = vld [vmem:[%s3096_s8] sm:$0xff]  }
 0x3e2   : > { %v2248_v61 = vpop.f32.mrb[11].mxu1  ;;  %v1045_v62 = vsel %vm777_vm4, %v1040_v58, -inf  ;;  %2268 = vmatpush3.bf16.msra.mxu1 %v2409_v59  ;;  %v2410_v60 = vld [vmem:[%s3096_s8 + $0x8] sm:$0xff]  }
 0x3e3   : > { %1046 = vmax.xlane.f32.xlu1 %v1045_v62  ;;  %2269 = vmatprep.subr.bf16.mxu1 %v2559_v8 }
 0x3e6   : > { %2270 = vmatpush3.bf16.msra.mxu1 %v2410_v60 }
 0x3e7   : > { %v1149_v63 = vpop.f32.mrb[12].mxu1  ;;  %2283 = vmatprep.subr.bf16.mxu1 %v2559_v8 }
 0x3e8   : > { %v1150_v1 = vadd.f32 %v1149_v63, %v664_v44  ;;  %v2259_v2 = vpop.f32.mrb[13].mxu1 }
 0x3e9   : > { %v1152_v3 = vpop.f32.mrb[14].mxu1 }
 0x3ea   : > { %v2260_v4 = vpop.f32.mrb[15].mxu1  ;;  %v1155_v5 = vsel %vm777_vm4, %v1150_v1, -inf }
 0x3eb   : > { %1156 = vmax.xlane.f32.xlu0 %v1155_v5 }
 0x460   : > { %v826_v6 = vpop.xlane.xlu1 %825 }
 0x461   : > { %v827_v7 = vsub.f32 %v819_v46, %v826_v6 }
 0x463   : > { %v828_v9 = vmul.f32 1.442695, %v827_v7 }
 0x465   : > { %2421 = vpow2.f32 %v828_v9 }
 0x468   : > { %v937_v10 = vpop.xlane.xlu0 %936 }
 0x469   : > { %v938_v11 = vsub.f32 %v930_v52, %v937_v10 }
 0x46b   : > { %v939_v12 = vmul.f32 1.442695, %v938_v11 }
 0x46d   : > { %2423 = vpow2.f32 %v939_v12 }
 0x46f   : > { %v2422_v13 = vpop.eup %2421 }
 0x470   : > { %v830_v14 = vsel %vm777_vm4, %v2422_v13, 0.0  ;;  %v1047_v22 = vpop.xlane.xlu1 %1046 }
 0x471   : > { %831 = vadd.xlane.f32.xlu1 %v830_v14  ;;  %v1048_v23 = vsub.f32 %v1040_v58, %v1047_v22 }
 0x473   : > { %v1049_v24 = vmul.f32 1.442695, %v1048_v23 }
 0x477   : > { %v2424_v15 = vpop.eup %2423 }
 0x478   : > { %v1157_v16 = vpop.xlane.xlu0 %1156  ;;  %v941_v17 = vsel %vm777_vm4, %v2424_v15, 0.0 }
 0x479   : > { %v1158_v18 = vsub.f32 %v1150_v1, %v1157_v16  ;;  %942 = vadd.xlane.f32.xlu0 %v941_v17 }
 0x47b   : > { %v1159_v19 = vmul.f32 1.442695, %v1158_v18 }
 0x47d   : > { %2425 = vpow2.f32 %v1159_v19 }
 0x47e   : > { %2427 = vpow2.f32 %v1049_v24 }
 0x482   : > { %836 = vrot.lane.b32.xlu1 %v2848_v30, %s2568_s26  ;;  %s3142_s26 = smov 80  }
 0x487   : > { %v2426_v20 = vpop.eup %2425 }
 0x488   : > { %v1161_v21 = vsel %vm777_vm4, %v2426_v20, 0.0  ;;  %v2428_v25 = vpop.eup %2427 }
 0x489   : > { %1162 = vadd.xlane.f32.xlu0 %v1161_v21  ;;  %v1051_v26 = vsel %vm777_vm4, %v2428_v25, 0.0 }
 0x49f   : > { %947 = vrot.lane.b32.xlu0 %v2848_v30, %s2569_s19  ;;  %s3137_s19 = sld [smem:[#allocation12_spill]] }
 0x4a6   : > { %1052 = vadd.xlane.f32.xlu1 %v1051_v26 }
 0x4b7   : > { %1057 = vrot.lane.b32.xlu1 %v2848_v30, %s2570_s20 }
 0x4bb   : > { %1167 = vrot.lane.b32.xlu1 %v2848_v30, %s2571_s21  ;;  %s3114_s21 = smov 16  }
 0x4fe   : > { %v832_v27 = vpop.xlane.xlu1 %831 }
 0x4ff   : > { %2429 = vrcp.f32 %v832_v27 }
 0x502   : > { %v837_v28 = vpop.permute.xlu1 %836 }
 0x503   : > { %v843_v29 = vsel %vm841_vm6, %v837_v28, 0  ;;  %v2412_v28 = vld [vmem:[%s3102_s14 + $0x8] sm:$0xff]  }
 0x504   : > { %2226 = vmatpush3.bf16.msra.mxu0 %v843_v29  ;;  %v2413_v29 = vld [vmem:[%s3100_s12] sm:$0xff]  }
 0x505   : > { %2237 = vmatprep.subr.bf16.mxu0 %v2559_v8 }
 0x506   : > { %v943_v32 = vpop.xlane.xlu0 %942 }
 0x507   : > { %2431 = vrcp.f32 %v943_v32 }
 0x509   : > { %v2430_v31 = vpop.eup %2429 }
 0x50a   : > { %v834_v33 = vmul.f32 %v2430_v31, %v2422_v13  ;;  %v2414_v31 = vld [vmem:[%s3100_s12 + $0x8] sm:$0xff]  }
 0x50c   : > { %v835_v34 = vpack.c.bf16 %v834_v33, %v834_v33 }
 0x50e   : > { %2228 = vmatmul.mubr.msk.bf16.vlgmr.msra.gmra.mrb[4].mxu0 %vm777_vm4, %v835_v34 }
 0x50f   : > { %2239 = vmatprep.mubr.msk.bf16.mxu0 %vm2560_vm1, %v2559_v8 }
 0x511   : > { %v2432_v30 = vpop.eup %2431 }
 0x512   : > { %v945_v36 = vmul.f32 %v2432_v30, %v2424_v15  ;;  %v2139_v15 = vld [vmem:[%s3097_s9] ss:$0 sm:$0xff] }
 0x514   : > { %v946_v39 = vpack.c.bf16 %v945_v36, %v945_v36 }
 0x516   : > { %v1163_v35 = vpop.xlane.xlu0 %1162 }
 0x51a   : > { %v948_v37 = vpop.permute.xlu0 %947 }
 0x51b   : > { %v953_v38 = vsel %vm841_vm6, %v948_v37, 0 }
 0x51c   : > { %2238 = vmatpush3.bf16.msra.mxu0 %v953_v38 }
 0x51d   : > { %2249 = vmatprep.subr.bf16.mxu0 %v2559_v8 }
 0x51f   : > { %2240 = vmatmul.mubr.msk.bf16.vlgmr.msra.gmra.mrb[8].mxu0 %vm777_vm4, %v946_v39 }
 0x520   : > { %2251 = vmatprep.mubr.msk.bf16.mxu0 %vm2560_vm1, %v2559_v8 }
 0x533   : > { %v1053_v40 = vpop.xlane.xlu1 %1052 }
 0x534   : > { %2433 = vrcp.f32 %v1053_v40  ;;  %v2140_v40 = vld [vmem:[%s3098_s10] ss:$0 sm:$0xff] }
 0x535   : > { %2435 = vrcp.f32 %v1163_v35 }
 0x537   : > { %v1058_v41 = vpop.permute.xlu1 %1057 }
 0x538   : > { %v1063_v42 = vsel %vm841_vm6, %v1058_v41, 0 }
 0x539   : > { %2250 = vmatpush3.bf16.msra.mxu0 %v1063_v42 }
 0x53a   : > { %2261 = vmatprep.subr.bf16.mxu0 %v2559_v8 }
 0x53b   : > { %v1168_v45 = vpop.permute.xlu1 %1167 }
 0x53c   : > { %v1173_v48 = vsel %vm841_vm6, %v1168_v45, 0 }
 0x53e   : > { %v2434_v43 = vpop.eup %2433 }
 0x53f   : > { %v1055_v44 = vmul.f32 %v2434_v43, %v2428_v25  ;;  %v2436_v47 = vpop.eup %2435  ;;  %v2141_v43 = vld [vmem:[%s3099_s11] ss:$0 sm:$0xff] }
 0x540   : > { %v1165_v49 = vmul.f32 %v2436_v47, %v2426_v20  ;;  %v2146_v47 = vld [vmem:[%s3103_s15] ss:$0 sm:$0xff] }
 0x541   : > { %v1056_v46 = vpack.c.bf16 %v1055_v44, %v1055_v44 }
 0x542   : > { %v1166_v50 = vpack.c.bf16 %v1165_v49, %v1165_v49 }
 0x543   : > { %2252 = vmatmul.mubr.msk.bf16.vlgmr.msra.gmra.mrb[12].mxu0 %vm777_vm4, %v1056_v46 }
 0x544   : > { %2262 = vmatpush3.bf16.msra.mxu0 %v1173_v48  ;;  %2263 = vmatprep.mubr.msk.bf16.mxu0 %vm2560_vm1, %v2559_v8 }
 0x545   : > { %2275 = vmatprep.subr.bf16.mxu0 %v2559_v8 }
 0x54b   : > { %2264 = vmatmul.mubr.msk.bf16.vlgmr.msra.gmra.mrb[16].mxu0 %vm777_vm4, %v1166_v50 }
 0x54c   : > { %2279 = vmatprep.mubr.msk.bf16.mxu0 %vm2560_vm1, %v2559_v8  ;;  %2276 = vmatpush3.bf16.msra.mxu0 %v2413_v29 }
 0x54d   : > { %2277 = vmatprep.subr.bf16.mxu0 %v2559_v8 }
 0x550   : > { %2278 = vmatpush3.bf16.msra.mxu0 %v2414_v31 }
 0x551   : > { %2291 = vmatprep.subr.bf16.mxu0 %v2559_v8 }
 0x5e1   : > { %v879_v51 = vpop.f32.mrb[4].mxu0 }
 0x5e2   : > { %v2229_v52 = vpop.f32.mrb[5].mxu0 }
 0x5e3   : > { %v882_v53 = vpop.f32.mrb[6].mxu0 }
 0x5e4   : > { %v2230_v54 = vpop.f32.mrb[7].mxu0 }
 0x5f2   : > { %v989_v55 = vpop.f32.mrb[8].mxu0 }
 0x5f3   : > { %1216 = vrot.lane.b32.xlu0 %v989_v55, %s3115_s18  ;;  %v2241_v56 = vpop.f32.mrb[9].mxu0  ;;  %v2142_v55 = vld [vmem:[%s3101_s13] ss:$0 sm:$0xff] }
 0x5f4   : > { %v992_v57 = vpop.f32.mrb[10].mxu0 }
 0x5f5   : > { %v2242_v58 = vpop.f32.mrb[11].mxu0 }
 0x616   : > { %v1099_v61 = vpop.f32.mrb[12].mxu0 }
 0x617   : > { %1220 = vrot.lane.b32.xlu1 %v1099_v61, %s3114_s21  ;;  %v2253_v62 = vpop.f32.mrb[13].mxu0 }
 0x618   : > { %v1102_v63 = vpop.f32.mrb[14].mxu0 }
 0x619   : > { %v2254_v1 = vpop.f32.mrb[15].mxu0 }
 0x61e   : > { %v1209_v2 = vpop.f32.mrb[16].mxu0 }
 0x61f   : > { %1224 = vrot.lane.b32.xlu0 %v1209_v2, %s3113_s29  ;;  %v2265_v3 = vpop.f32.mrb[17].mxu0  ;;  %s654_s29 = scalar_lea.vmem %s3137_s19, %s2810_s27  ;;  %s3143_s19 = smov 8  }
 0x620   : > { %v1212_v4 = vpop.f32.mrb[18].mxu0  ;;  %v661_v27 = vld [vmem:[%s654_s29] sm:$0xff]  ;;  %s3146_s29 = sld [smem:[#allocation14_spill]] }
 0x621   : > { %v2266_v5 = vpop.f32.mrb[19].mxu0  ;;  %v1408_v32 = vpack.c.bf16 %v661_v27, %v661_v27 }
 0x665   : > { %v1217_v6 = vpop.permute.xlu0 %1216 }
 0x666   : > { %v1227_v9 = vsel %vm777_vm4, %v879_v51, %v1217_v6 }
 0x689   : > { %v1221_v7 = vpop.permute.xlu1 %1220 }
 0x68a   : > { %v1229_v10 = vsel %vm1228_vm7, %v1227_v9, %v1221_v7  ;;  %v1474_v9 = vlaneseq }
 0x691   : > { %v1225_v11 = vpop.permute.xlu0 %1224 }
 0x692   : > { %v1231_v12 = vsel %vm1230_vm8, %v1229_v10, %v1225_v11  ;;  %v1475_v11 = vshrl.u32 %v1474_v9, 7 }
 0x693   : > { %v1236_v13 = vpack.c.bf16 %v1231_v12, %v1231_v12 }
 0x694   : > { %v1476_v12 = vsub.s32 0, %v1475_v11 }
 0x695   : > { %2272 = vmatmul.mubr.msk.bf16.vlgmr.msra.gmra.mrb[16].mxu1 %vm670_vm0, %v1236_v13 }
 0x696   : > { %2287 = vmatprep.mubr.msk.bf16.mxu1 %vm2560_vm1, %v2559_v8 }
 0x768   : > { %v1286_v14 = vpop.f32.mrb[16].mxu1 }
 0x769   : > { %v1292_v16 = vadd.f32 %v1286_v14, %v2816_v0  ;;  %v2273_v17 = vpop.f32.mrb[17].mxu1  ;;  %v2411_v0 = vld [vmem:[%s3102_s14] sm:$0xff]  }
 0x76a   : > { %v1289_v18 = vpop.f32.mrb[18].mxu1  ;;  %2284 = vmatpush3.bf16.msra.mxu1 %v2411_v0 }
 0x76b   : > { %v2940_v19 = vadd.f32 %v2139_v15, %v1292_v16  ;;  %v2274_v20 = vpop.f32.mrb[19].mxu1  ;;  %2285 = vmatprep.subr.bf16.mxu1 %v2559_v8 }
 0x76d   : > { %v1303_v21 = vsel %vm670_vm0, %v2940_v19, 0.0 }
 0x76e   : > { %1304 = vadd.xlane.f32.xlu1 %v1303_v21  ;;  %2286 = vmatpush3.bf16.msra.mxu1 %v2412_v28 }
 0x76f   : > { %2297 = vmatprep.subr.bf16.mxu1 %v2559_v8 }
 0x771   : > { %2288 = vmatmul.mubr.msk.bf16.vlgmr.msra.gmra.mrb[20].mxu1 %vm670_vm0, %v1408_v32 }
 0x772   : > { %2299 = vmatprep.mubr.msk.bf16.mxu1 %vm2560_vm1, %v2559_v8 }
 0x7fb   : > { %v1305_v22 = vpop.xlane.xlu1 %1304 }
 0x7fc   : > { %v1306_v23 = vmul.f32 0.03125, %v1305_v22 }
 0x7fe   : > { %v1307_v24 = vsub.f32 %v2940_v19, %v1306_v23 }
 0x800   : > { %v1308_v25 = vmul.f32 %v1307_v24, %v1307_v24  ;;  %v1319_v41 = vmul.f32 %v2140_v40, %v1307_v24 }
 0x802   : > { %v1309_v26 = vsel %vm670_vm0, %v1308_v25, 0.0 }
 0x803   : > { %1310 = vadd.xlane.f32.xlu0 %v1309_v26 }
 0x844   : > { %v1465_v48 = vpop.f32.mrb[20].mxu1 }
 0x845   : > { %v1466_v49 = vadd.f32 %v2146_v47, %v1465_v48  ;;  %v2289_v50 = vpop.f32.mrb[21].mxu1 }
 0x846   : > { %v1468_v51 = vpop.f32.mrb[22].mxu1 }
 0x847   : > { %v2981_v52 = vpack.c.bf16 %v1466_v49, %v1466_v49  ;;  %v2290_v53 = vpop.f32.mrb[23].mxu1 }
 0x849   : > { %1589 = vrot.lane.b32.xlu0 %v2981_v52, %s2561_s23  ;;  %v1483_v54 = vsel %vm777_vm4, %v2981_v52, 0 }
 0x890   : > { %v1311_v33 = vpop.xlane.xlu0 %1310 }
 0x891   : > { %v1312_v34 = vmul.f32 0.032258064, %v1311_v33 }
 0x893   : > { %2437 = vrsqrt.f32 %v1312_v34  ;;  %vm1322_vm9 = vcmp.eq.f32.partialorder %v1312_v34, inf  ;;  %v1325_v36 = vand.u32 2147483648, %v1312_v34  ;;  %vm1324_vm10 = vcmp.eq.f32.partialorder %v1312_v34, 0.0 }
 0x89d   : > { %v2438_v30 = vpop.eup %2437 }
 0x89e   : > { %v1321_v35 = vmul.f32 %v2438_v30, %v1312_v34 }
 0x8a0   : > { %v1323_v37 = vsel %vm1322_vm9, %v1312_v34, %v1321_v35 }
 0x8a1   : > { %v1326_v38 = vsel %vm1324_vm10, %v1325_v36, %v1323_v37 }
 0x8a2   : > { %v1327_v39 = vadd.f32 1e-06, %v1326_v38 }
 0x8a4   : > { %2439 = vrcp.f32 %v1327_v39 }
 0x8ae   : > { %v2440_v42 = vpop.eup %2439 }
 0x8af   : > { %v1329_v44 = vmul.f32 %v2440_v42, %v1319_v41 }
 0x8b1   : > { %v1336_v45 = vadd.f32 %v2141_v43, %v1329_v44 }
 0x8b3   : > { %v1341_v46 = vpack.c.bf16 %v1336_v45, %v1336_v45 }
 0x8b5   : > { %2280 = vmatmul.mubr.msk.bf16.vlgmr.msra.gmra.mrb[20].mxu0 %vm670_vm0, %v1341_v46 }
 0x8b6   : > { %2293 = vmatprep.mubr.msk.bf16.mxu0 %vm2560_vm1, %v2559_v8  ;;  %2292 = vmatpush3.bf16.xpose.msra.mxu0 %v1483_v54 }
 0x8b7   : > { %2303 = vmatprep.subr.bf16.mxu0 %v2559_v8 }
 0x8bb   : > { %v1590_v59 = vpop.permute.xlu0 %1589 }
 0x8bc   : > { %v1595_v63 = vsel %vm777_vm4, %v1590_v59, 0 }
 0x988   : > { %v1398_v56 = vpop.f32.mrb[20].mxu0 }
 0x989   : > { %v1399_v57 = vadd.f32 %v2142_v55, %v1398_v56  ;;  %v2281_v58 = vpop.f32.mrb[21].mxu0 }
 0x98a   : > { %v1401_v60 = vpop.f32.mrb[22].mxu0 }
 0x98b   : > { %v1471_v61 = vpack.c.bf16 %v1399_v57, %v1399_v57  ;;  %v2282_v62 = vpop.f32.mrb[23].mxu0 }
 0x98d   : > { %1697 = vrot.lane.b32.xlu0 %v1471_v61, %s2565_s17  ;;  %1587 = vrot.lane.b32.xlu1 %v1471_v61, %s2561_s23  ;;  %s3138_s23 = scalar_lea.vmem [#allocation4], %s2792_s1  ;;  %s3139_s1 = smov 88  }
 0x98e   : > { %2294 = vmatmul.mubr.msk.bf16.vlgmr.msra.gmra.mrb[24].mxu0 %vm777_vm4, %v1471_v61  ;;  %v665_v10 = vld [vmem:[%s3138_s23] sm:$0x1] }
 0x98f   : > { %2304 = vmatpush3.bf16.xpose.msra.mxu0 %v1595_v63  ;;  %2305 = vmatprep.mubr.msk.bf16.mxu0 %vm2560_vm1, %v2559_v8  ;;  %vm666_vm11 = vcmp.eq.f32.partialorder %v665_v10, 0.0 }
 0x990   : > { %2315 = vmatprep.subr.bf16.mxu0 %v2559_v8  ;;  %v667_v13 = vsel %vm666_vm11, -1e+09, %v2559_v8 }
 0x991   : > { %1807 = vrot.lane.b32.xlu0 %v1471_v61, %s2567_s30  ;;  %1699 = vrot.lane.b32.xlu1 %v2981_v52, %s2565_s17  ;;  %v1477_v14 = vrot.slane %v667_v13, %v1476_v12  ;;  %s3140_s17 = smov 96  }
 0x995   : > { %1809 = vrot.lane.b32.xlu1 %v2981_v52, %s2567_s30  ;;  %s3141_s30 = smov 72  }
 0x9ff   : > { %v1588_v1 = vpop.permute.xlu1 %1587  ;;  %v1698_v5 = vpop.permute.xlu0 %1697 }
 0xa00   : > { %2306 = vmatmul.mubr.msk.bf16.vlgmr.msra.gmra.mrb[28].mxu0 %vm777_vm4, %v1588_v1 }
 0xa01   : > { %2317 = vmatprep.mubr.msk.bf16.mxu0 %vm2560_vm1, %v2559_v8 }
 0xa03   : > { %v1700_v2 = vpop.permute.xlu1 %1699  ;;  %v1808_v7 = vpop.permute.xlu0 %1807 }
 0xa04   : > { %v1705_v3 = vsel %vm777_vm4, %v1700_v2, 0 }
 0xa05   : > { %2316 = vmatpush3.bf16.xpose.msra.mxu0 %v1705_v3 }
 0xa06   : > { %2327 = vmatprep.subr.bf16.mxu0 %v2559_v8 }
 0xa07   : > { %v1810_v4 = vpop.permute.xlu1 %1809 }
 0xa08   : > { %v1815_v6 = vsel %vm777_vm4, %v1810_v4, 0 }
 0xa0c   : > { %2318 = vmatmul.mubr.msk.bf16.vlgmr.msra.gmra.mrb[32].mxu0 %vm777_vm4, %v1698_v5 }
 0xa0d   : > { %2328 = vmatpush3.bf16.xpose.msra.mxu0 %v1815_v6  ;;  %2329 = vmatprep.mubr.msk.bf16.mxu0 %vm2560_vm1, %v2559_v8 }
 0xa0e   : > { %2339 = vmatprep.subr.bf16.mxu0 %v2559_v8 }
 0xa14   : > { %2330 = vmatmul.mubr.msk.bf16.vlgmr.msra.gmra.mrb[36].mxu0 %vm777_vm4, %v1808_v7 }
 0xa15   : > { %2343 = vmatprep.mubr.msk.bf16.mxu0 %vm2560_vm1, %v2559_v8 }
 0xa61   : > { %v1519_v15 = vpop.f32.mrb[24].mxu0 }
 0xa62   : > { %v1520_v16 = vadd.f32 %v1519_v15, %v1477_v14  ;;  %v2295_v17 = vpop.f32.mrb[25].mxu0 }
 0xa63   : > { %v1522_v18 = vpop.f32.mrb[26].mxu0 }
 0xa64   : > { %v2296_v20 = vpop.f32.mrb[27].mxu0  ;;  %v1525_v21 = vsel %vm777_vm4, %v1520_v16, -inf }
 0xa65   : > { %1526 = vmax.xlane.f32.xlu1 %v1525_v21 }
 0xad3   : > { %v1631_v22 = vpop.f32.mrb[28].mxu0 }
 0xad4   : > { %v1632_v23 = vadd.f32 %v1631_v22, %v1477_v14  ;;  %v2307_v24 = vpop.f32.mrb[29].mxu0 }
 0xad5   : > { %v1634_v25 = vpop.f32.mrb[30].mxu0 }
 0xad6   : > { %v2308_v26 = vpop.f32.mrb[31].mxu0  ;;  %v1637_v0 = vsel %vm777_vm4, %v1632_v23, -inf }
 0xad7   : > { %1638 = vmax.xlane.f32.xlu0 %v1637_v0 }
 0xadf   : > { %v1741_v27 = vpop.f32.mrb[32].mxu0 }
 0xae0   : > { %v1742_v28 = vadd.f32 %v1741_v27, %v1477_v14  ;;  %v2319_v29 = vpop.f32.mrb[33].mxu0 }
 0xae1   : > { %v1744_v31 = vpop.f32.mrb[34].mxu0  ;;  %v2415_v29 = vld [vmem:[%s3104_s16] sm:$0xff]  }
 0xae2   : > { %v2320_v32 = vpop.f32.mrb[35].mxu0  ;;  %v1747_v33 = vsel %vm777_vm4, %v1742_v28, -inf  ;;  %2340 = vmatpush3.bf16.msra.mxu0 %v2415_v29  ;;  %v2416_v31 = vld [vmem:[%s3104_s16 + $0x8] sm:$0xff]  }
 0xae3   : > { %1748 = vmax.xlane.f32.xlu0 %v1747_v33  ;;  %2341 = vmatprep.subr.bf16.mxu0 %v2559_v8 }
 0xae6   : > { %2342 = vmatpush3.bf16.msra.mxu0 %v2416_v31 }
 0xae7   : > { %v1851_v34 = vpop.f32.mrb[36].mxu0 }
 0xae8   : > { %v1852_v30 = vadd.f32 %v1851_v34, %v1477_v14  ;;  %v2331_v35 = vpop.f32.mrb[37].mxu0 }
 0xae9   : > { %v1854_v36 = vpop.f32.mrb[38].mxu0 }
 0xaea   : > { %v2332_v37 = vpop.f32.mrb[39].mxu0  ;;  %v1857_v38 = vsel %vm777_vm4, %v1852_v30, -inf }
 0xaeb   : > { %1858 = vmax.xlane.f32.xlu1 %v1857_v38 }
 0xaf2   : > { %v1527_v39 = vpop.xlane.xlu1 %1526 }
 0xaf3   : > { %v1528_v40 = vsub.f32 %v1520_v16, %v1527_v39 }
 0xaf5   : > { %v1529_v41 = vmul.f32 1.442695, %v1528_v40 }
 0xaf7   : > { %2441 = vpow2.f32 %v1529_v41 }
 0xb01   : > { %v2442_v42 = vpop.eup %2441 }
 0xb02   : > { %v1531_v43 = vsel %vm777_vm4, %v2442_v42, 0.0 }
 0xb03   : > { %1532 = vadd.xlane.f32.xlu0 %v1531_v43 }
 0xb64   : > { %v1639_v44 = vpop.xlane.xlu0 %1638 }
 0xb65   : > { %v1640_v45 = vsub.f32 %v1632_v23, %v1639_v44 }
 0xb67   : > { %v1641_v46 = vmul.f32 1.442695, %v1640_v45 }
 0xb69   : > { %2443 = vpow2.f32 %v1641_v46  ;;  %v2161_v46 = vld [vmem:[%s3146_s29] ss:$0 sm:$0xff] }
 0xb70   : > { %v1749_v47 = vpop.xlane.xlu0 %1748 }
 0xb71   : > { %v1750_v48 = vsub.f32 %v1742_v28, %v1749_v47 }
 0xb73   : > { %v2444_v49 = vpop.eup %2443  ;;  %v1751_v50 = vmul.f32 1.442695, %v1750_v48 }
 0xb74   : > { %v1643_v51 = vsel %vm777_vm4, %v2444_v49, 0.0 }
 0xb75   : > { %2445 = vpow2.f32 %v1751_v50  ;;  %1644 = vadd.xlane.f32.xlu1 %v1643_v51 }
 0xb78   : > { %v1859_v55 = vpop.xlane.xlu1 %1858 }
 0xb79   : > { %v1860_v56 = vsub.f32 %v1852_v30, %v1859_v55 }
 0xb7b   : > { %v1861_v57 = vmul.f32 1.442695, %v1860_v56 }
 0xb7d   : > { %2447 = vpow2.f32 %v1861_v57 }
 0xb7f   : > { %v2446_v53 = vpop.eup %2445 }
 0xb80   : > { %v1753_v54 = vsel %vm777_vm4, %v2446_v53, 0.0 }
 0xb81   : > { %1754 = vadd.xlane.f32.xlu0 %v1753_v54 }
 0xb86   : > { %1649 = vrot.lane.b32.xlu1 %v2981_v52, %s3139_s1 }
 0xb87   : > { %v2448_v58 = vpop.eup %2447 }
 0xb88   : > { %v1863_v59 = vsel %vm777_vm4, %v2448_v58, 0.0 }
 0xb90   : > { %v1533_v60 = vpop.xlane.xlu0 %1532 }
 0xb91   : > { %2449 = vrcp.f32 %v1533_v60 }
 0xb97   : > { %1538 = vrot.lane.b32.xlu0 %v2981_v52, %s3140_s17  ;;  %s3147_s17 = sld [smem:[#allocation15_spill]] }
 0xb9b   : > { %1869 = vrot.lane.b32.xlu0 %v2981_v52, %s3141_s30  ;;  %v2450_v62 = vpop.eup %2449 }
 0xb9c   : > { %v1535_v1 = vmul.f32 %v2450_v62, %v2442_v42 }
 0xb9d   : > { %s658_s30 = scalar_lea.vmem %s3147_s17, %s2810_s27 }
 0xb9e   : > { %v1536_v5 = vpack.c.bf16 %v1535_v1, %v1535_v1 }
 0xbaa   : > { %1864 = vadd.xlane.f32.xlu1 %v1863_v59 }
 0xbbb   : > { %1759 = vrot.lane.b32.xlu1 %v2981_v52, %s3142_s26 }
 0xc02   : > { %v1645_v61 = vpop.xlane.xlu1 %1644 }
 0xc03   : > { %2451 = vrcp.f32 %v1645_v61 }
 0xc06   : > { %v1650_v4 = vpop.permute.xlu1 %1649 }
 0xc07   : > { %v1655_v7 = vsel %vm841_vm6, %v1650_v4, 0 }
 0xc0d   : > { %v2452_v6 = vpop.eup %2451 }
 0xc0e   : > { %v1755_v63 = vpop.xlane.xlu0 %1754  ;;  %v1647_v52 = vmul.f32 %v2452_v6, %v2444_v49 }
 0xc0f   : > { %2453 = vrcp.f32 %v1755_v63 }
 0xc10   : > { %v1648_v9 = vpack.c.bf16 %v1647_v52, %v1647_v52 }
 0xc12   : > { %v1539_v2 = vpop.permute.xlu0 %1538 }
 0xc13   : > { %v1544_v3 = vsel %vm841_vm6, %v1539_v2, 0 }
 0xc14   : > { %2298 = vmatpush3.bf16.msra.mxu1 %v1544_v3 }
 0xc15   : > { %2309 = vmatprep.subr.bf16.mxu1 %v2559_v8 }
 0xc16   : > { %v1870_v15 = vpop.permute.xlu0 %1869 }
 0xc17   : > { %2300 = vmatmul.mubr.msk.bf16.vlgmr.msra.gmra.mrb[24].mxu1 %vm777_vm4, %v1536_v5  ;;  %v1875_v17 = vsel %vm841_vm6, %v1870_v15, 0 }
 0xc18   : > { %2310 = vmatpush3.bf16.msra.mxu1 %v1655_v7  ;;  %2311 = vmatprep.mubr.msk.bf16.mxu1 %vm2560_vm1, %v2559_v8 }
 0xc19   : > { %2321 = vmatprep.subr.bf16.mxu1 %v2559_v8  ;;  %v2454_v10 = vpop.eup %2453 }
 0xc1a   : > { %v1757_v12 = vmul.f32 %v2454_v10, %v2446_v53 }
 0xc1c   : > { %v1758_v16 = vpack.c.bf16 %v1757_v12, %v1757_v12 }
 0xc1f   : > { %2312 = vmatmul.mubr.msk.bf16.vlgmr.msra.gmra.mrb[28].mxu1 %vm777_vm4, %v1648_v9 }
 0xc20   : > { %2323 = vmatprep.mubr.msk.bf16.mxu1 %vm2560_vm1, %v2559_v8 }
 0xc37   : > { %v1865_v11 = vpop.xlane.xlu1 %1864 }
 0xc38   : > { %2455 = vrcp.f32 %v1865_v11 }
 0xc3b   : > { %v1760_v13 = vpop.permute.xlu1 %1759 }
 0xc3c   : > { %v1765_v14 = vsel %vm841_vm6, %v1760_v13, 0 }
 0xc3d   : > { %2322 = vmatpush3.bf16.msra.mxu1 %v1765_v14 }
 0xc3e   : > { %2333 = vmatprep.subr.bf16.mxu1 %v2559_v8 }
 0xc40   : > { %2324 = vmatmul.mubr.msk.bf16.vlgmr.msra.gmra.mrb[32].mxu1 %vm777_vm4, %v1758_v16 }
 0xc41   : > { %2334 = vmatpush3.bf16.msra.mxu1 %v1875_v17  ;;  %2335 = vmatprep.mubr.msk.bf16.mxu1 %vm2560_vm1, %v2559_v8 }
 0xc42   : > { %v2456_v18 = vpop.eup %2455 }
 0xc43   : > { %v1867_v20 = vmul.f32 %v2456_v18, %v2448_v58 }
 0xc45   : > { %v1868_v21 = vpack.c.bf16 %v1867_v20, %v1867_v20 }
 0xc48   : > { %2336 = vmatmul.mubr.msk.bf16.vlgmr.msra.gmra.mrb[36].mxu1 %vm777_vm4, %v1868_v21 }
 0xcea   : > { %v1580_v22 = vpop.f32.mrb[24].mxu1 }
 0xceb   : > { %v2301_v23 = vpop.f32.mrb[25].mxu1 }
 0xcec   : > { %v1583_v24 = vpop.f32.mrb[26].mxu1 }
 0xced   : > { %v2302_v25 = vpop.f32.mrb[27].mxu1 }
 0xcf2   : > { %v1691_v26 = vpop.f32.mrb[28].mxu1 }
 0xcf3   : > { %1918 = vrot.lane.b32.xlu1 %v1691_v26, %s3143_s19  ;;  %v2313_v0 = vpop.f32.mrb[29].mxu1 }
 0xcf4   : > { %v1694_v27 = vpop.f32.mrb[30].mxu1 }
 0xcf5   : > { %v2314_v28 = vpop.f32.mrb[31].mxu1 }
 0xd13   : > { %v1801_v32 = vpop.f32.mrb[32].mxu1 }
 0xd14   : > { %1922 = vrot.lane.b32.xlu0 %v1801_v32, %s3144_s22  ;;  %v2325_v33 = vpop.f32.mrb[33].mxu1 }
 0xd15   : > { %v1804_v34 = vpop.f32.mrb[34].mxu1 }
 0xd16   : > { %v2326_v30 = vpop.f32.mrb[35].mxu1 }
 0xd1b   : > { %v1911_v35 = vpop.f32.mrb[36].mxu1 }
 0xd1c   : > { %1926 = vrot.lane.b32.xlu1 %v1911_v35, %s3145_s24  ;;  %v2337_v36 = vpop.f32.mrb[37].mxu1 }
 0xd1d   : > { %v1914_v37 = vpop.f32.mrb[38].mxu1 }
 0xd1e   : > { %v2338_v38 = vpop.f32.mrb[39].mxu1 }
 0xd65   : > { %v1919_v39 = vpop.permute.xlu1 %1918 }
 0xd66   : > { %v1929_v40 = vsel %vm777_vm4, %v1580_v22, %v1919_v39 }
 0xd86   : > { %v1923_v8 = vpop.permute.xlu0 %1922 }
 0xd87   : > { %v1930_v41 = vsel %vm1228_vm7, %v1929_v40, %v1923_v8 }
 0xd8e   : > { %v1927_v42 = vpop.permute.xlu1 %1926 }
 0xd8f   : > { %v1931_v43 = vsel %vm1230_vm8, %v1930_v41, %v1927_v42 }
 0xd90   : > { %v1936_v44 = vpack.c.bf16 %v1931_v43, %v1931_v43 }
 0xd92   : > { %2344 = vmatmul.mubr.msk.bf16.vlgmr.msra.gmra.mrb[40].mxu0 %vm670_vm0, %v1936_v44 }
 0xe65   : > { %v1986_v45 = vpop.f32.mrb[40].mxu0 }
 0xe66   : > { %v1992_v47 = vadd.f32 %v1986_v45, %v2940_v19  ;;  %v2345_v48 = vpop.f32.mrb[41].mxu0 }
 0xe67   : > { %v1989_v49 = vpop.f32.mrb[42].mxu0 }
 0xe68   : > { %v2000_v50 = vadd.f32 %v2161_v46, %v1992_v47  ;;  %v2346_v51 = vpop.f32.mrb[43].mxu0 }
 0xe6a   : > { %2001 = vst.msk [vmem:[%s658_s30] sm:$0xff] %vm670_vm0, %v2000_v50 }
 0xe6b PF: > { %s3148_s30 = sld [smem:[#allocation9_spill]]  ;;  %s3149_s26 = sld [smem:[#allocation8_spill]] }
 0xe6c   : > { %s3150_s29 = sld [smem:[#allocation10_spill]]  ;;  %s3151_s27 = smov %s2547_s28 }
 0xe71   : > { %p31_p12 = scmp.ge.s32.totalorder %s3148_s30, 4   ;;  %s3152_s28 = smov %s3149_s26 }
 0xe73   :  { %33 = sbr.rel (!%p31_p12) target bundleno = 11 (0xb), region = 151 }
 0xe7a   :  { %2021 = vsyncpa [#allocation3], 1 }
 0xe7b   :  { %2023 = vsyncpa [#allocation3 + $0x1], 1 }
 0xe7c   :  { %2024 = vsyncpa [#allocation5], 1 }
 0xe7d   :  { %2026 = vsyncpa [#allocation5 + $0x1], 1 }

</bundles_post_ra>
